<compile_context>
chip_gen: v6e
topology: v6e:2x2x1
jax: 0.10.0
libtpu: 0.0.40
codegen_flags: <defaults>
</compile_context>

<pallas_src>
import functools

import jax
import jax.numpy as jnp
from jax.experimental import pallas as pl
from jax.experimental.pallas import tpu as pltpu

_NEG_BIG = -1e30          # additive mask bias (exp underflows to exactly 0 in fp32)
_LN_EPS = 1e-12           # matches nn.LayerNorm(eps=1e-12)
_BF16 = jnp.bfloat16


# ----------------------------------------------------------------------------
# In-kernel helpers
# ----------------------------------------------------------------------------
def _add_layer_norm(x, res, gamma, beta):
    """LayerNorm(x + res) over the last axis (fp32).  gamma/beta are (1, D)."""
    h = x + res
    mean = jnp.mean(h, axis=-1, keepdims=True)
    var = jnp.mean(jnp.square(h - mean), axis=-1, keepdims=True)
    return (h - mean) * jax.lax.rsqrt(var + _LN_EPS) * gamma + beta


def _mha(Q, K, V, bias, wo, att_ref, H):
    """Multi-head attention on one query tile.

    Q:    (tq, D) fp32 (softmax scale already folded into the Q weights)
    K, V: (Sk, D) bf16
    bias: additive mask bias, broadcastable to (tq, Sk), fp32
    wo:   (D, D) bf16 output projection (already transposed to (in, out))
    att_ref: (1, H, tq, Sk) output ref for the attention probabilities
    Returns (tq, D) fp32.
    """
    tq, D = Q.shape
    Sk = K.shape[0]
    dh = D // H

    # Head split: reshape + a single major-axis transpose (no per-head slices).
    Qh = pltpu.einshape("qhd->hqd", Q.reshape(tq, H, dh)).astype(_BF16)   # (H,tq,dh)
    Kh = pltpu.einshape("khd->hkd", K.reshape(Sk, H, dh))                 # (H,Sk,dh)
    Vh = pltpu.einshape("khd->hkd", V.reshape(Sk, H, dh))                 # (H,Sk,dh)

    s = jnp.einsum('hqd,hkd->hqk', Qh, Kh,
                   preferred_element_type=jnp.float32)                    # (H,tq,Sk)
    s = s + bias[None]                                                    # additive mask

    m = jnp.max(s, axis=-1, keepdims=True)
    e = jnp.exp(s - m)
    p = e * pl.reciprocal(jnp.sum(e, axis=-1, keepdims=True), approx=True)
    att_ref[0] = p                                                        # fp32 probs

    ctx = jnp.einsum('hqk,hkd->hqd', p.astype(_BF16), Vh,
                     preferred_element_type=jnp.float32)                  # (H,tq,dh)
    # Merge heads -> (tq, D); one full-width MXU matmul for the output proj.
    merged = pltpu.einshape("hqd->qhd", ctx).reshape(tq, D).astype(_BF16)
    return jnp.dot(merged, wo, preferred_element_type=jnp.float32)        # (tq, D)


# ----------------------------------------------------------------------------
# Fused decoder-layer kernel
#   grid = (batch, query_tile); query_tile axis is "arbitrary" so the K/V
#   projections can be computed once per batch element and cached in VMEM.
# ----------------------------------------------------------------------------
def _decoder_layer_kernel(x_q_ref, x_full_ref, enc_ref, dec_mask_ref, enc_mask_ref,
                          wq1_ref, wkv1_ref, wo1_ref, ln1_g_ref, ln1_b_ref,
                          wq2_ref, wkv2_ref, wo2_ref, ln2_g_ref, ln2_b_ref,
                          w1_ref, b1_ref, w2_ref, b2_ref, ln3_g_ref, ln3_b_ref,
                          y_ref, att1_ref, att2_ref,
                          kv1_s, kv2_s, *, num_heads):
    H = num_heads
    xq = x_q_ref[0]                      # (tq, D) fp32
    D = xq.shape[-1]

    # ---- once per batch element: project and cache K/V for both attn blocks
    @pl.when(pl.program_id(1) == 0)
    def _():
        xf = x_full_ref[0].astype(_BF16)                                  # (S, D)
        kv1_s[...] = jnp.dot(xf, wkv1_ref[...],
                             preferred_element_type=jnp.float32).astype(_BF16)
        ef = enc_ref[0].astype(_BF16)                                     # (Se, D)
        kv2_s[...] = jnp.dot(ef, wkv2_ref[...],
                             preferred_element_type=jnp.float32).astype(_BF16)

    # ---- block 1: masked self-attention + add & norm
    q1 = jnp.dot(xq.astype(_BF16), wq1_ref[...],
                 preferred_element_type=jnp.float32)                      # (tq, D)
    bias1 = dec_mask_ref[0] * _NEG_BIG                                    # (tq, S)
    a1 = _mha(q1, kv1_s[:, 0:D], kv1_s[:, D:2 * D], bias1, wo1_ref[...],
              att1_ref, H)
    x1 = _add_layer_norm(a1, xq, ln1_g_ref[...], ln1_b_ref[...])

    # ---- block 2: cross-attention over encoder output + add & norm
    q2 = jnp.dot(x1.astype(_BF16), wq2_ref[...],
                 preferred_element_type=jnp.float32)                      # (tq, D)
    bias2 = enc_mask_ref[0] * _NEG_BIG                                    # (1, Se)
    a2 = _mha(q2, kv2_s[:, 0:D], kv2_s[:, D:2 * D], bias2, wo2_ref[...],
              att2_ref, H)
    x2 = _add_layer_norm(a2, x1, ln2_g_ref[...], ln2_b_ref[...])

    # ---- block 3: position-wise FFN + add & norm
    h = jnp.dot(x2.astype(_BF16), w1_ref[...],
                preferred_element_type=jnp.float32) + b1_ref[...]
    h = jnp.maximum(h, 0.0)
    y = jnp.dot(h.astype(_BF16), w2_ref[...],
                preferred_element_type=jnp.float32) + b2_ref[...]
    y_ref[0] = _add_layer_norm(y, x2, ln3_g_ref[...], ln3_b_ref[...])


def decoder_layer_pallas(x, enc, dec_mask, enc_mask, lp, num_heads):
    """x:[B,S,D] enc:[B,Se,D] dec_mask:[B,S,S] enc_mask:[B,1,Se] (1 = masked)."""
    B, S, D = x.shape
    Se = enc.shape[1]
    H = num_heads
    dff = lp["ffn_w1"].shape[1]

    tq = 128 if S % 128 == 0 else S      # query tile (full S at small sizes)
    nq = S // tq

    def wspec(r, c):
        # Block-invariant weights: single-buffered (no pointless double-buffer).
        return pl.BlockSpec((r, c), lambda b, q: (0, 0),
                            pipeline_mode=pl.Buffered(1))

    y, att1, att2 = pl.pallas_call(
        functools.partial(_decoder_layer_kernel, num_heads=H),
        grid=(B, nq),
        in_specs=[
            pl.BlockSpec((1, tq, D), lambda b, q: (b, q, 0)),    # x (query tile)
            pl.BlockSpec((1, S, D), lambda b, q: (b, 0, 0)),     # x (full, self-attn K/V)
            pl.BlockSpec((1, Se, D), lambda b, q: (b, 0, 0)),    # encoder output
            pl.BlockSpec((1, tq, S), lambda b, q: (b, q, 0)),    # dec combined mask
            pl.BlockSpec((1, 1, Se), lambda b, q: (b, 0, 0)),    # enc padding mask
            wspec(D, D), wspec(D, 2 * D), wspec(D, D),           # block1 Wq/Wkv/Wo
            wspec(1, D), wspec(1, D),                            # LN1
            wspec(D, D), wspec(D, 2 * D), wspec(D, D),           # block2 Wq/Wkv/Wo
            wspec(1, D), wspec(1, D),                            # LN2
            wspec(D, dff), wspec(1, dff), wspec(dff, D), wspec(1, D),   # FFN
            wspec(1, D), wspec(1, D),                            # LN3
        ],
        out_specs=[
            pl.BlockSpec((1, tq, D), lambda b, q: (b, q, 0)),
            pl.BlockSpec((1, H, tq, S), lambda b, q: (b, 0, q, 0)),
            pl.BlockSpec((1, H, tq, Se), lambda b, q: (b, 0, q, 0)),
        ],
        out_shape=[
            jax.ShapeDtypeStruct((B, S, D), jnp.float32),
            jax.ShapeDtypeStruct((B, H, S, S), jnp.float32),
            jax.ShapeDtypeStruct((B, H, S, Se), jnp.float32),
        ],
        scratch_shapes=[
            pltpu.VMEM((S, 2 * D), _BF16),    # cached self-attn K|V
            pltpu.VMEM((Se, 2 * D), _BF16),   # cached cross-attn K|V
        ],
        compiler_params=pltpu.CompilerParams(
            dimension_semantics=("parallel", "arbitrary"),
            vmem_limit_bytes=64 * 1024 * 1024),
    )(x, x, enc, dec_mask, enc_mask,
      lp["wq1"], lp["wkv1"], lp["wo1"], lp["ln1_g"], lp["ln1_b"],
      lp["wq2"], lp["wkv2"], lp["wo2"], lp["ln2_g"], lp["ln2_b"],
      lp["ffn_w1"], lp["ffn_b1"], lp["ffn_w2"], lp["ffn_b2"],
      lp["ln3_g"], lp["ln3_b"])
    return y, att1, att2


# ----------------------------------------------------------------------------
# Parameter initialization + one-time packing
#   (pre-transposed, scale-folded, bf16 weights; fp32 biases / LN params)
# ----------------------------------------------------------------------------
def init_decoder_params(key, num_layers, d_model, num_heads, d_ff,
                        max_seq_len, vocab_size):
    dh = d_model // num_heads
    scale = 1.0 / (dh ** 0.5)
    keys = jax.random.split(key, 2 + num_layers)
    emb = jax.random.normal(keys[0], (vocab_size, d_model), jnp.float32)
    emb = emb.at[0].set(0.0)                       # padding_idx = 0
    pos = jax.random.normal(keys[1], (max_seq_len, d_model), jnp.float32)
    pos = pos.at[0].set(0.0)                       # padding_idx = 0 (as in module)

    def uni(k, shape, fan_in):
        bound = 1.0 / jnp.sqrt(jnp.float32(fan_in))
        return jax.random.uniform(k, shape, jnp.float32, -bound, bound)

    layer_params = []
    for i in range(num_layers):
        lk = jax.random.split(keys[2 + i], 12)
        # Raw PyTorch-shaped weights: nn.Linear stores (out_features, in_features).
        wq1 = uni(lk[0], (d_model, d_model), d_model)
        wk1 = uni(lk[1], (d_model, d_model), d_model)
        wv1 = uni(lk[2], (d_model, d_model), d_model)
        wo1 = uni(lk[3], (d_model, d_model), d_model)
        wq2 = uni(lk[4], (d_model, d_model), d_model)
        wk2 = uni(lk[5], (d_model, d_model), d_model)
        wv2 = uni(lk[6], (d_model, d_model), d_model)
        wo2 = uni(lk[7], (d_model, d_model), d_model)
        w1 = uni(lk[8], (d_ff, d_model), d_model)
        b1 = uni(lk[9], (d_ff,), d_model)
        w2 = uni(lk[10], (d_model, d_ff), d_ff)
        b2 = uni(lk[11], (d_model,), d_ff)

        # Pack once: transpose to (in, out), fold 1/sqrt(dh) into Q, fuse K|V,
        # cast matmul weights to bf16.
        lp = dict(
            wq1=(wq1.T * scale).astype(_BF16),                        # (D, D)
            wkv1=jnp.concatenate([wk1.T, wv1.T], axis=1).astype(_BF16),   # (D, 2D)
            wo1=wo1.T.astype(_BF16),                                  # (D, D)
            ln1_g=jnp.ones((1, d_model), jnp.float32),
            ln1_b=jnp.zeros((1, d_model), jnp.float32),
            wq2=(wq2.T * scale).astype(_BF16),                        # (D, D)
            wkv2=jnp.concatenate([wk2.T, wv2.T], axis=1).astype(_BF16),   # (D, 2D)
            wo2=wo2.T.astype(_BF16),                                  # (D, D)
            ln2_g=jnp.ones((1, d_model), jnp.float32),
            ln2_b=jnp.zeros((1, d_model), jnp.float32),
            ffn_w1=w1.T.astype(_BF16), ffn_b1=b1.reshape(1, d_ff),    # (D,dff),(1,dff)
            ffn_w2=w2.T.astype(_BF16), ffn_b2=b2.reshape(1, d_model), # (dff,D),(1,D)
            ln3_g=jnp.ones((1, d_model), jnp.float32),
            ln3_b=jnp.zeros((1, d_model), jnp.float32),
        )
        layer_params.append(lp)
    return dict(embedding=emb, pos_embedding=pos, layers=layer_params)


# ----------------------------------------------------------------------------
# Decoder forward (dropout = identity / eval mode)
# ----------------------------------------------------------------------------
def _prepare_inputs(params, token_ids, encoder_output, enc_padding_mask,
                    dec_combined_mask):
    B, S = token_ids.shape
    x = params["embedding"][token_ids]                                  # (B,S,D)
    positions = jnp.arange(S)
    x = x + params["pos_embedding"][positions][None, :, :]
    dec_mask = dec_combined_mask[:, 0].astype(jnp.float32)              # (B,S,S)
    enc_mask = enc_padding_mask[:, 0].astype(jnp.float32)               # (B,1,Se)
    return x, dec_mask, enc_mask


def decoder_forward(params, token_ids, encoder_output, enc_padding_mask,
                    dec_combined_mask, *, num_heads):
    x, dec_mask, enc_mask = _prepare_inputs(
        params, token_ids, encoder_output, enc_padding_mask, dec_combined_mask)
    attention = {}
    for i, lp in enumerate(params["layers"]):
        x, att1, att2 = decoder_layer_pallas(
            x, encoder_output, dec_mask, enc_mask, lp, num_heads)
        attention[f"decoder_layer{i + 1}_block1"] = att1
        attention[f"decoder_layer{i + 1}_block2"] = att2
    return x, attention


decoder_forward_jit = jax.jit(decoder_forward, static_argnames=("num_heads",))


# ----------------------------------------------------------------------------
# Pure-JAX reference (same math and same bf16-matmul precision policy)
# ----------------------------------------------------------------------------
def _ref_ln(x, g, b):
    mean = jnp.mean(x, axis=-1, keepdims=True)
    var = jnp.mean(jnp.square(x - mean), axis=-1, keepdims=True)
    return (x - mean) * jax.lax.rsqrt(var + _LN_EPS) * g + b


def _ref_attn(Q, K, V, bias, wo, H):
    B, Sq, D = Q.shape
    Sk = K.shape[1]
    dh = D // H
    Qh = Q.reshape(B, Sq, H, dh).transpose(0, 2, 1, 3).astype(_BF16)
    Kh = K.reshape(B, Sk, H, dh).transpose(0, 2, 1, 3)
    Vh = V.reshape(B, Sk, H, dh).transpose(0, 2, 1, 3)
    s = jnp.einsum('bhqd,bhkd->bhqk', Qh, Kh,
                   preferred_element_type=jnp.float32) + bias[:, None]
    p = jax.nn.softmax(s, axis=-1)
    ctx = jnp.einsum('bhqk,bhkd->bhqd', p.astype(_BF16), Vh,
                     preferred_element_type=jnp.float32)
    merged = ctx.transpose(0, 2, 1, 3).reshape(B, Sq, D).astype(_BF16)
    out = jnp.einsum('bsd,de->bse', merged, wo, preferred_element_type=jnp.float32)
    return out, p


def reference_forward(params, token_ids, encoder_output, enc_padding_mask,
                      dec_combined_mask, num_heads):
    x, dec_mask, enc_mask = _prepare_inputs(
        params, token_ids, encoder_output, enc_padding_mask, dec_combined_mask)
    dec_bias = dec_mask * _NEG_BIG
    enc_bias = enc_mask * _NEG_BIG
    D = x.shape[-1]
    encb = encoder_output.astype(_BF16)
    attention = {}
    for i, lp in enumerate(params["layers"]):
        xb = x.astype(_BF16)
        q1 = jnp.einsum('bsd,de->bse', xb, lp["wq1"],
                        preferred_element_type=jnp.float32)
        kv1 = jnp.einsum('bsd,de->bse', xb, lp["wkv1"],
                         preferred_element_type=jnp.float32).astype(_BF16)
        a1, p1 = _ref_attn(q1, kv1[..., :D], kv1[..., D:], dec_bias,
                           lp["wo1"], num_heads)
        x1 = _ref_ln(a1 + x, lp["ln1_g"], lp["ln1_b"])

        q2 = jnp.einsum('bsd,de->bse', x1.astype(_BF16), lp["wq2"],
                        preferred_element_type=jnp.float32)
        kv2 = jnp.einsum('bsd,de->bse', encb, lp["wkv2"],
                         preferred_element_type=jnp.float32).astype(_BF16)
        a2, p2 = _ref_attn(q2, kv2[..., :D], kv2[..., D:], enc_bias,
                           lp["wo2"], num_heads)
        x2 = _ref_ln(a2 + x1, lp["ln2_g"], lp["ln2_b"])

        h = jnp.einsum('bsd,df->bsf', x2.astype(_BF16), lp["ffn_w1"],
                       preferred_element_type=jnp.float32) + lp["ffn_b1"]
        h = jnp.maximum(h, 0.0)
        y = jnp.einsum('bsf,fd->bsd', h.astype(_BF16), lp["ffn_w2"],
                       preferred_element_type=jnp.float32) + lp["ffn_b2"]
        x = _ref_ln(y + x2, lp["ln3_g"], lp["ln3_b"])
        attention[f"decoder_layer{i + 1}_block1"] = p1
        attention[f"decoder_layer{i + 1}_block2"] = p2
    return x, attention


# ----------------------------------------------------------------------------
# Demo
# ----------------------------------------------------------------------------
if __name__ == "__main__":
    NUM_LAYERS = 2
    D_MODEL = 32
    NUM_HEADS = 4
    D_FF = 64
    MAX_SEQ_LEN = 16
    VOCAB_SIZE = 50
    B, S_DEC, S_ENC = 2, 8, 8

    key = jax.random.PRNGKey(0)
    kp, kt, ke = jax.random.split(key, 3)

    params = init_decoder_params(kp, NUM_LAYERS, D_MODEL, NUM_HEADS, D_FF,
                                 MAX_SEQ_LEN, VOCAB_SIZE)

    token_ids = jax.random.randint(kt, (B, S_DEC), 1, VOCAB_SIZE, dtype=jnp.int32)
    token_ids = token_ids.at[0, -2:].set(0)          # some padding tokens
    encoder_output = jax.random.normal(ke, (B, S_ENC, D_MODEL), jnp.float32)

    # dec_combined_mask: causal mask [B, 1, S_dec, S_dec] (1 = masked)
    causal = jnp.triu(jnp.ones((S_DEC, S_DEC), jnp.float32), k=1)
    dec_combined_mask = jnp.broadcast_to(causal[None, None], (B, 1, S_DEC, S_DEC))

    # enc_padding_mask: [B, 1, 1, S_enc] (1 = padding in encoder input)
    enc_pad = jnp.zeros((B, S_ENC), jnp.float32)
    enc_pad = enc_pad.at[0, -2:].set(1.0)
    enc_padding_mask = enc_pad[:, None, None, :]

    y, attention = decoder_forward_jit(params, token_ids, encoder_output,
                                       enc_padding_mask, dec_combined_mask,
                                       num_heads=NUM_HEADS)
    jax.block_until_ready(y)
    for v in attention.values():
        jax.block_until_ready(v)

    assert y.shape == (B, S_DEC, D_MODEL)
    assert attention["decoder_layer1_block1"].shape == (B, NUM_HEADS, S_DEC, S_DEC)
    assert attention["decoder_layer2_block2"].shape == (B, NUM_HEADS, S_DEC, S_ENC)

    # Numerical check against a pure-JAX reference with the same precision policy.
    y_ref, att_ref = reference_forward(params, token_ids, encoder_output,
                                       enc_padding_mask, dec_combined_mask,
                                       NUM_HEADS)
    assert jnp.allclose(y, y_ref, rtol=1e-2, atol=1e-2), "output mismatch"
    for k in attention:
        assert jnp.allclose(attention[k], att_ref[k], rtol=1e-2, atol=1e-2), k

    print("KERNEL_OK")
</pallas_src>

<mosaic_0001>
module attributes {stable_mosaic.version = 11 : i64} {
  func.func @_decoder_layer_kernel(%arg0: i32, %arg1: i32, %arg2: memref<1x8x32xf32, #tpu.memory_space<vmem>>, %arg3: memref<1x8x32xf32, #tpu.memory_space<vmem>>, %arg4: memref<1x8x32xf32, #tpu.memory_space<vmem>>, %arg5: memref<1x8x8xf32, #tpu.memory_space<vmem>>, %arg6: memref<1x1x8xf32, #tpu.memory_space<vmem>>, %arg7: memref<32x32xbf16, #tpu.memory_space<vmem>>, %arg8: memref<32x64xbf16, #tpu.memory_space<vmem>>, %arg9: memref<32x32xbf16, #tpu.memory_space<vmem>>, %arg10: memref<1x32xf32, #tpu.memory_space<vmem>>, %arg11: memref<1x32xf32, #tpu.memory_space<vmem>>, %arg12: memref<32x32xbf16, #tpu.memory_space<vmem>>, %arg13: memref<32x64xbf16, #tpu.memory_space<vmem>>, %arg14: memref<32x32xbf16, #tpu.memory_space<vmem>>, %arg15: memref<1x32xf32, #tpu.memory_space<vmem>>, %arg16: memref<1x32xf32, #tpu.memory_space<vmem>>, %arg17: memref<32x64xbf16, #tpu.memory_space<vmem>>, %arg18: memref<1x64xf32, #tpu.memory_space<vmem>>, %arg19: memref<64x32xbf16, #tpu.memory_space<vmem>>, %arg20: memref<1x32xf32, #tpu.memory_space<vmem>>, %arg21: memref<1x32xf32, #tpu.memory_space<vmem>>, %arg22: memref<1x32xf32, #tpu.memory_space<vmem>>, %arg23: memref<1x8x32xf32, #tpu.memory_space<vmem>>, %arg24: memref<1x4x8x8xf32, #tpu.memory_space<vmem>>, %arg25: memref<1x4x8x8xf32, #tpu.memory_space<vmem>>, %arg26: memref<8x64xbf16, #tpu.memory_space<vmem>>, %arg27: memref<8x64xbf16, #tpu.memory_space<vmem>>) attributes {dimension_semantics = [#tpu.dimension_semantics<parallel>, #tpu.dimension_semantics<arbitrary>], iteration_bounds = array<i64: 2, 1>, scalar_prefetch = 0 : i64, scratch_operands = 2 : i64, tpu.core_type = #tpu.core_type<tc>, window_params = [{transform_indices = @transform_0, window_bounds = array<i64: 1, 8, 32>}, {transform_indices = @transform_1, window_bounds = array<i64: 1, 8, 32>}, {transform_indices = @transform_2, window_bounds = array<i64: 1, 8, 32>}, {transform_indices = @transform_3, window_bounds = array<i64: 1, 8, 8>}, {transform_indices = @transform_4, window_bounds = array<i64: 1, 1, 8>}, {pipeline_mode = #tpu.pipeline_mode<synchronous>, transform_indices = @transform_5, window_bounds = array<i64: 32, 32>}, {pipeline_mode = #tpu.pipeline_mode<synchronous>, transform_indices = @transform_6, window_bounds = array<i64: 32, 64>}, {pipeline_mode = #tpu.pipeline_mode<synchronous>, transform_indices = @transform_7, window_bounds = array<i64: 32, 32>}, {pipeline_mode = #tpu.pipeline_mode<synchronous>, transform_indices = @transform_8, window_bounds = array<i64: 1, 32>}, {pipeline_mode = #tpu.pipeline_mode<synchronous>, transform_indices = @transform_9, window_bounds = array<i64: 1, 32>}, {pipeline_mode = #tpu.pipeline_mode<synchronous>, transform_indices = @transform_10, window_bounds = array<i64: 32, 32>}, {pipeline_mode = #tpu.pipeline_mode<synchronous>, transform_indices = @transform_11, window_bounds = array<i64: 32, 64>}, {pipeline_mode = #tpu.pipeline_mode<synchronous>, transform_indices = @transform_12, window_bounds = array<i64: 32, 32>}, {pipeline_mode = #tpu.pipeline_mode<synchronous>, transform_indices = @transform_13, window_bounds = array<i64: 1, 32>}, {pipeline_mode = #tpu.pipeline_mode<synchronous>, transform_indices = @transform_14, window_bounds = array<i64: 1, 32>}, {pipeline_mode = #tpu.pipeline_mode<synchronous>, transform_indices = @transform_15, window_bounds = array<i64: 32, 64>}, {pipeline_mode = #tpu.pipeline_mode<synchronous>, transform_indices = @transform_16, window_bounds = array<i64: 1, 64>}, {pipeline_mode = #tpu.pipeline_mode<synchronous>, transform_indices = @transform_17, window_bounds = array<i64: 64, 32>}, {pipeline_mode = #tpu.pipeline_mode<synchronous>, transform_indices = @transform_18, window_bounds = array<i64: 1, 32>}, {pipeline_mode = #tpu.pipeline_mode<synchronous>, transform_indices = @transform_19, window_bounds = array<i64: 1, 32>}, {pipeline_mode = #tpu.pipeline_mode<synchronous>, transform_indices = @transform_20, window_bounds = array<i64: 1, 32>}, {transform_indices = @transform_21, window_bounds = array<i64: 1, 8, 32>}, {transform_indices = @transform_22, window_bounds = array<i64: 1, 4, 8, 8>}, {transform_indices = @transform_23, window_bounds = array<i64: 1, 4, 8, 8>}]} {
    %c0 = arith.constant 0 : index
    %c0_0 = arith.constant 0 : index
    %c0_1 = arith.constant 0 : index
    %0 = vector.load %arg2[%c0, %c0_0, %c0_1] : memref<1x8x32xf32, #tpu.memory_space<vmem>>, vector<1x8x32xf32>
    %1 = vector.shape_cast %0 : vector<1x8x32xf32> to vector<8x32xf32>
    %c0_i32 = arith.constant 0 : i32
    %2 = arith.cmpi eq, %arg1, %c0_i32 : i32
    %3 = arith.extui %2 : i1 to i32
    %c0_i32_2 = arith.constant 0 : i32
    %4 = arith.cmpi ne, %3, %c0_i32_2 : i32
    scf.if %4 {
      %c0_86 = arith.constant 0 : index
      %c0_87 = arith.constant 0 : index
      %c0_88 = arith.constant 0 : index
      %177 = vector.load %arg3[%c0_86, %c0_87, %c0_88] : memref<1x8x32xf32, #tpu.memory_space<vmem>>, vector<1x8x32xf32>
      %178 = vector.shape_cast %177 : vector<1x8x32xf32> to vector<8x32xf32>
      %179 = arith.truncf %178 : vector<8x32xf32> to vector<8x32xbf16>
      %c0_89 = arith.constant 0 : index
      %c0_90 = arith.constant 0 : index
      %180 = vector.load %arg8[%c0_89, %c0_90] : memref<32x64xbf16, #tpu.memory_space<vmem>>, vector<32x64xbf16>
      %cst_91 = arith.constant dense<0.000000e+00> : vector<8x64xf32>
      %181 = tpu.matmul %179, %180, %cst_91 {dimension_numbers = #tpu.dot_dimension_numbers<[1], [0], [0], [1], [0, 0, 1, 1], [], []>} : vector<8x32xbf16>, vector<32x64xbf16>, vector<8x64xf32> -> vector<8x64xf32>
      %182 = arith.truncf %181 : vector<8x64xf32> to vector<8x64xbf16>
      %c0_92 = arith.constant 0 : index
      %c0_93 = arith.constant 0 : index
      %183 = vector.load %arg26[%c0_92, %c0_93] : memref<8x64xbf16, #tpu.memory_space<vmem>>, vector<8x64xbf16>
      tpu.vector_store %arg26[%c0_92, %c0_93], %182 {strides = array<i32>} : memref<8x64xbf16, #tpu.memory_space<vmem>>, vector<8x64xbf16>,
      %c0_94 = arith.constant 0 : index
      %c0_95 = arith.constant 0 : index
      %c0_96 = arith.constant 0 : index
      %184 = vector.load %arg4[%c0_94, %c0_95, %c0_96] : memref<1x8x32xf32, #tpu.memory_space<vmem>>, vector<1x8x32xf32>
      %185 = vector.shape_cast %184 : vector<1x8x32xf32> to vector<8x32xf32>
      %186 = arith.truncf %185 : vector<8x32xf32> to vector<8x32xbf16>
      %c0_97 = arith.constant 0 : index
      %c0_98 = arith.constant 0 : index
      %187 = vector.load %arg13[%c0_97, %c0_98] : memref<32x64xbf16, #tpu.memory_space<vmem>>, vector<32x64xbf16>
      %cst_99 = arith.constant dense<0.000000e+00> : vector<8x64xf32>
      %188 = tpu.matmul %186, %187, %cst_99 {dimension_numbers = #tpu.dot_dimension_numbers<[1], [0], [0], [1], [0, 0, 1, 1], [], []>} : vector<8x32xbf16>, vector<32x64xbf16>, vector<8x64xf32> -> vector<8x64xf32>
      %189 = arith.truncf %188 : vector<8x64xf32> to vector<8x64xbf16>
      %c0_100 = arith.constant 0 : index
      %c0_101 = arith.constant 0 : index
      %190 = vector.load %arg27[%c0_100, %c0_101] : memref<8x64xbf16, #tpu.memory_space<vmem>>, vector<8x64xbf16>
      tpu.vector_store %arg27[%c0_100, %c0_101], %189 {strides = array<i32>} : memref<8x64xbf16, #tpu.memory_space<vmem>>, vector<8x64xbf16>,
    } else {
    }
    %5 = arith.truncf %1 : vector<8x32xf32> to vector<8x32xbf16>
    %c0_3 = arith.constant 0 : index
    %c0_4 = arith.constant 0 : index
    %6 = vector.load %arg7[%c0_3, %c0_4] : memref<32x32xbf16, #tpu.memory_space<vmem>>, vector<32x32xbf16>
    %cst = arith.constant dense<0.000000e+00> : vector<8x32xf32>
    %7 = tpu.matmul %5, %6, %cst {dimension_numbers = #tpu.dot_dimension_numbers<[1], [0], [0], [1], [0, 0, 1, 1], [], []>} : vector<8x32xbf16>, vector<32x32xbf16>, vector<8x32xf32> -> vector<8x32xf32>
    %c0_5 = arith.constant 0 : index
    %c0_6 = arith.constant 0 : index
    %c0_7 = arith.constant 0 : index
    %8 = vector.load %arg5[%c0_5, %c0_6, %c0_7] : memref<1x8x8xf32, #tpu.memory_space<vmem>>, vector<1x8x8xf32>
    %9 = vector.shape_cast %8 : vector<1x8x8xf32> to vector<8x8xf32>
    %cst_8 = arith.constant -1.000000e+30 : f32
    %10 = vector.broadcast %cst_8 : f32 to vector<8x8xf32>
    %11 = arith.mulf %9, %10 : vector<8x8xf32>
    %c0_9 = arith.constant 0 : index
    %c0_10 = arith.constant 0 : index
    %12 = vector.load %arg26[%c0_9, %c0_10] : memref<8x64xbf16, #tpu.memory_space<vmem>>, vector<8x32xbf16>
    %c0_11 = arith.constant 0 : index
    %c32 = arith.constant 32 : index
    %13 = vector.load %arg26[%c0_11, %c32] : memref<8x64xbf16, #tpu.memory_space<vmem>>, vector<8x32xbf16>
    %c0_12 = arith.constant 0 : index
    %c0_13 = arith.constant 0 : index
    %14 = vector.load %arg9[%c0_12, %c0_13] : memref<32x32xbf16, #tpu.memory_space<vmem>>, vector<32x32xbf16>
    %15 = vector.shape_cast %7 : vector<8x32xf32> to vector<8x4x8xf32>
    %16 = tpu.transpose %15, [1, 0, 2] : vector<8x4x8xf32> -> vector<4x8x8xf32>
    %17 = arith.truncf %16 : vector<4x8x8xf32> to vector<4x8x8xbf16>
    %18 = vector.shape_cast %12 : vector<8x32xbf16> to vector<8x4x8xbf16>
    %19 = tpu.transpose %18, [1, 0, 2] : vector<8x4x8xbf16> -> vector<4x8x8xbf16>
    %20 = vector.shape_cast %13 : vector<8x32xbf16> to vector<8x4x8xbf16>
    %21 = tpu.transpose %20, [1, 0, 2] : vector<8x4x8xbf16> -> vector<4x8x8xbf16>
    "tpu.trace_start"() <{level = 10 : i32, message = "hqd,hkd->hqk"}> : () -> ()
    %cst_14 = arith.constant dense<0.000000e+00> : vector<4x8x8xf32>
    %22 = tpu.matmul %17, %19, %cst_14 {dimension_numbers = #tpu.dot_dimension_numbers<[2], [2], [1], [1], [0, 0, 0, 1, 1, 1], [0], [0]>} : vector<4x8x8xbf16>, vector<4x8x8xbf16>, vector<4x8x8xf32> -> vector<4x8x8xf32>
    "tpu.trace_stop"() : () -> ()
    %23 = vector.shape_cast %11 : vector<8x8xf32> to vector<1x8x8xf32>
    %24 = vector.broadcast %23 : vector<1x8x8xf32> to vector<4x8x8xf32>
    %25 = arith.addf %22, %24 : vector<4x8x8xf32>
    %cst_15 = arith.constant dense<0xFF800000> : vector<4x8xf32>
    %26 = vector.multi_reduction <maximumf>, %25, %cst_15 [2] : vector<4x8x8xf32> to vector<4x8xf32>
    %27 = vector.shape_cast %26 : vector<4x8xf32> to vector<4x8x1xf32>
    %28 = vector.broadcast %27 : vector<4x8x1xf32> to vector<4x8x8xf32>
    %29 = arith.subf %25, %28 : vector<4x8x8xf32>
    %30 = math.exp %29 : vector<4x8x8xf32>
    %cst_16 = arith.constant dense<0.000000e+00> : vector<4x8xf32>
    %31 = vector.multi_reduction <add>, %30, %cst_16 [2] : vector<4x8x8xf32> to vector<4x8xf32>
    %32 = vector.shape_cast %31 : vector<4x8xf32> to vector<4x8x1xf32>
    %33 = tpu.reciprocal %32 {approx = true} : vector<4x8x1xf32> -> vector<4x8x1xf32>
    %34 = vector.broadcast %33 : vector<4x8x1xf32> to vector<4x8x8xf32>
    %35 = arith.mulf %30, %34 : vector<4x8x8xf32>
    %c0_17 = arith.constant 0 : index
    %c0_18 = arith.constant 0 : index
    %c0_19 = arith.constant 0 : index
    %c0_20 = arith.constant 0 : index
    %36 = vector.load %arg24[%c0_17, %c0_18, %c0_19, %c0_20] : memref<1x4x8x8xf32, #tpu.memory_space<vmem>>, vector<1x4x8x8xf32>
    %37 = vector.shape_cast %36 : vector<1x4x8x8xf32> to vector<4x8x8xf32>
    %38 = vector.shape_cast %35 : vector<4x8x8xf32> to vector<1x4x8x8xf32>
    tpu.vector_store %arg24[%c0_17, %c0_18, %c0_19, %c0_20], %38 {strides = array<i32>} : memref<1x4x8x8xf32, #tpu.memory_space<vmem>>, vector<1x4x8x8xf32>,
    %39 = arith.truncf %35 : vector<4x8x8xf32> to vector<4x8x8xbf16>
    "tpu.trace_start"() <{level = 10 : i32, message = "hqk,hkd->hqd"}> : () -> ()
    %cst_21 = arith.constant dense<0.000000e+00> : vector<4x8x8xf32>
    %40 = tpu.matmul %39, %21, %cst_21 {dimension_numbers = #tpu.dot_dimension_numbers<[2], [1], [1], [2], [0, 0, 0, 1, 1, 2], [0], [0]>} : vector<4x8x8xbf16>, vector<4x8x8xbf16>, vector<4x8x8xf32> -> vector<4x8x8xf32>
    "tpu.trace_stop"() : () -> ()
    %41 = tpu.transpose %40, [1, 0, 2] : vector<4x8x8xf32> -> vector<8x4x8xf32>
    %42 = vector.shape_cast %41 : vector<8x4x8xf32> to vector<8x32xf32>
    %43 = arith.truncf %42 : vector<8x32xf32> to vector<8x32xbf16>
    %cst_22 = arith.constant dense<0.000000e+00> : vector<8x32xf32>
    %44 = tpu.matmul %43, %14, %cst_22 {dimension_numbers = #tpu.dot_dimension_numbers<[1], [0], [0], [1], [0, 0, 1, 1], [], []>} : vector<8x32xbf16>, vector<32x32xbf16>, vector<8x32xf32> -> vector<8x32xf32>
    %c0_23 = arith.constant 0 : index
    %c0_24 = arith.constant 0 : index
    %45 = vector.load %arg10[%c0_23, %c0_24] : memref<1x32xf32, #tpu.memory_space<vmem>>, vector<1x32xf32>
    %c0_25 = arith.constant 0 : index
    %c0_26 = arith.constant 0 : index
    %46 = vector.load %arg11[%c0_25, %c0_26] : memref<1x32xf32, #tpu.memory_space<vmem>>, vector<1x32xf32>
    %47 = arith.addf %44, %1 : vector<8x32xf32>
    %cst_27 = arith.constant dense<0.000000e+00> : vector<8xf32>
    %48 = vector.multi_reduction <add>, %47, %cst_27 [1] : vector<8x32xf32> to vector<8xf32>
    %49 = vector.shape_cast %48 : vector<8xf32> to vector<8x1xf32>
    %cst_28 = arith.constant 3.200000e+01 : f32
    %50 = vector.broadcast %cst_28 : f32 to vector<8x1xf32>
    %51 = arith.divf %49, %50 : vector<8x1xf32>
    %52 = vector.broadcast %51 : vector<8x1xf32> to vector<8x32xf32>
    %53 = arith.subf %47, %52 : vector<8x32xf32>
    %54 = arith.mulf %53, %53 : vector<8x32xf32>
    %cst_29 = arith.constant dense<0.000000e+00> : vector<8xf32>
    %55 = vector.multi_reduction <add>, %54, %cst_29 [1] : vector<8x32xf32> to vector<8xf32>
    %56 = vector.shape_cast %55 : vector<8xf32> to vector<8x1xf32>
    %cst_30 = arith.constant 3.200000e+01 : f32
    %57 = vector.broadcast %cst_30 : f32 to vector<8x1xf32>
    %58 = arith.divf %56, %57 : vector<8x1xf32>
    %59 = vector.broadcast %51 : vector<8x1xf32> to vector<8x32xf32>
    %60 = arith.subf %47, %59 : vector<8x32xf32>
    %cst_31 = arith.constant 9.99999996E-13 : f32
    %61 = vector.broadcast %cst_31 : f32 to vector<8x1xf32>
    %62 = arith.addf %58, %61 : vector<8x1xf32>
    %63 = math.rsqrt %62 : vector<8x1xf32>
    %64 = vector.broadcast %63 : vector<8x1xf32> to vector<8x32xf32>
    %65 = arith.mulf %60, %64 : vector<8x32xf32>
    %66 = vector.broadcast %45 : vector<1x32xf32> to vector<8x32xf32>
    %67 = arith.mulf %65, %66 : vector<8x32xf32>
    %68 = vector.broadcast %46 : vector<1x32xf32> to vector<8x32xf32>
    %69 = arith.addf %67, %68 : vector<8x32xf32>
    %70 = arith.truncf %69 : vector<8x32xf32> to vector<8x32xbf16>
    %c0_32 = arith.constant 0 : index
    %c0_33 = arith.constant 0 : index
    %71 = vector.load %arg12[%c0_32, %c0_33] : memref<32x32xbf16, #tpu.memory_space<vmem>>, vector<32x32xbf16>
    %cst_34 = arith.constant dense<0.000000e+00> : vector<8x32xf32>
    %72 = tpu.matmul %70, %71, %cst_34 {dimension_numbers = #tpu.dot_dimension_numbers<[1], [0], [0], [1], [0, 0, 1, 1], [], []>} : vector<8x32xbf16>, vector<32x32xbf16>, vector<8x32xf32> -> vector<8x32xf32>
    %c0_35 = arith.constant 0 : index
    %c0_36 = arith.constant 0 : index
    %c0_37 = arith.constant 0 : index
    %73 = vector.load %arg6[%c0_35, %c0_36, %c0_37] : memref<1x1x8xf32, #tpu.memory_space<vmem>>, vector<1x1x8xf32>
    %74 = vector.shape_cast %73 : vector<1x1x8xf32> to vector<1x8xf32>
    %cst_38 = arith.constant -1.000000e+30 : f32
    %75 = vector.broadcast %cst_38 : f32 to vector<1x8xf32>
    %76 = arith.mulf %74, %75 : vector<1x8xf32>
    %c0_39 = arith.constant 0 : index
    %c0_40 = arith.constant 0 : index
    %77 = vector.load %arg27[%c0_39, %c0_40] : memref<8x64xbf16, #tpu.memory_space<vmem>>, vector<8x32xbf16>
    %c0_41 = arith.constant 0 : index
    %c32_42 = arith.constant 32 : index
    %78 = vector.load %arg27[%c0_41, %c32_42] : memref<8x64xbf16, #tpu.memory_space<vmem>>, vector<8x32xbf16>
    %c0_43 = arith.constant 0 : index
    %c0_44 = arith.constant 0 : index
    %79 = vector.load %arg14[%c0_43, %c0_44] : memref<32x32xbf16, #tpu.memory_space<vmem>>, vector<32x32xbf16>
    %80 = vector.shape_cast %72 : vector<8x32xf32> to vector<8x4x8xf32>
    %81 = tpu.transpose %80, [1, 0, 2] : vector<8x4x8xf32> -> vector<4x8x8xf32>
    %82 = arith.truncf %81 : vector<4x8x8xf32> to vector<4x8x8xbf16>
    %83 = vector.shape_cast %77 : vector<8x32xbf16> to vector<8x4x8xbf16>
    %84 = tpu.transpose %83, [1, 0, 2] : vector<8x4x8xbf16> -> vector<4x8x8xbf16>
    %85 = vector.shape_cast %78 : vector<8x32xbf16> to vector<8x4x8xbf16>
    %86 = tpu.transpose %85, [1, 0, 2] : vector<8x4x8xbf16> -> vector<4x8x8xbf16>
    "tpu.trace_start"() <{level = 10 : i32, message = "hqd,hkd->hqk"}> : () -> ()
    %cst_45 = arith.constant dense<0.000000e+00> : vector<4x8x8xf32>
    %87 = tpu.matmul %82, %84, %cst_45 {dimension_numbers = #tpu.dot_dimension_numbers<[2], [2], [1], [1], [0, 0, 0, 1, 1, 1], [0], [0]>} : vector<4x8x8xbf16>, vector<4x8x8xbf16>, vector<4x8x8xf32> -> vector<4x8x8xf32>
    "tpu.trace_stop"() : () -> ()
    %88 = vector.shape_cast %76 : vector<1x8xf32> to vector<1x1x8xf32>
    %89 = vector.broadcast %88 : vector<1x1x8xf32> to vector<4x8x8xf32>
    %90 = arith.addf %87, %89 : vector<4x8x8xf32>
    %cst_46 = arith.constant dense<0xFF800000> : vector<4x8xf32>
    %91 = vector.multi_reduction <maximumf>, %90, %cst_46 [2] : vector<4x8x8xf32> to vector<4x8xf32>
    %92 = vector.shape_cast %91 : vector<4x8xf32> to vector<4x8x1xf32>
    %93 = vector.broadcast %92 : vector<4x8x1xf32> to vector<4x8x8xf32>
    %94 = arith.subf %90, %93 : vector<4x8x8xf32>
    %95 = math.exp %94 : vector<4x8x8xf32>
    %cst_47 = arith.constant dense<0.000000e+00> : vector<4x8xf32>
    %96 = vector.multi_reduction <add>, %95, %cst_47 [2] : vector<4x8x8xf32> to vector<4x8xf32>
    %97 = vector.shape_cast %96 : vector<4x8xf32> to vector<4x8x1xf32>
    %98 = tpu.reciprocal %97 {approx = true} : vector<4x8x1xf32> -> vector<4x8x1xf32>
    %99 = vector.broadcast %98 : vector<4x8x1xf32> to vector<4x8x8xf32>
    %100 = arith.mulf %95, %99 : vector<4x8x8xf32>
    %c0_48 = arith.constant 0 : index
    %c0_49 = arith.constant 0 : index
    %c0_50 = arith.constant 0 : index
    %c0_51 = arith.constant 0 : index
    %101 = vector.load %arg25[%c0_48, %c0_49, %c0_50, %c0_51] : memref<1x4x8x8xf32, #tpu.memory_space<vmem>>, vector<1x4x8x8xf32>
    %102 = vector.shape_cast %101 : vector<1x4x8x8xf32> to vector<4x8x8xf32>
    %103 = vector.shape_cast %100 : vector<4x8x8xf32> to vector<1x4x8x8xf32>
    tpu.vector_store %arg25[%c0_48, %c0_49, %c0_50, %c0_51], %103 {strides = array<i32>} : memref<1x4x8x8xf32, #tpu.memory_space<vmem>>, vector<1x4x8x8xf32>,
    %104 = arith.truncf %100 : vector<4x8x8xf32> to vector<4x8x8xbf16>
    "tpu.trace_start"() <{level = 10 : i32, message = "hqk,hkd->hqd"}> : () -> ()
    %cst_52 = arith.constant dense<0.000000e+00> : vector<4x8x8xf32>
    %105 = tpu.matmul %104, %86, %cst_52 {dimension_numbers = #tpu.dot_dimension_numbers<[2], [1], [1], [2], [0, 0, 0, 1, 1, 2], [0], [0]>} : vector<4x8x8xbf16>, vector<4x8x8xbf16>, vector<4x8x8xf32> -> vector<4x8x8xf32>
    "tpu.trace_stop"() : () -> ()
    %106 = tpu.transpose %105, [1, 0, 2] : vector<4x8x8xf32> -> vector<8x4x8xf32>
    %107 = vector.shape_cast %106 : vector<8x4x8xf32> to vector<8x32xf32>
    %108 = arith.truncf %107 : vector<8x32xf32> to vector<8x32xbf16>
    %cst_53 = arith.constant dense<0.000000e+00> : vector<8x32xf32>
    %109 = tpu.matmul %108, %79, %cst_53 {dimension_numbers = #tpu.dot_dimension_numbers<[1], [0], [0], [1], [0, 0, 1, 1], [], []>} : vector<8x32xbf16>, vector<32x32xbf16>, vector<8x32xf32> -> vector<8x32xf32>
    %c0_54 = arith.constant 0 : index
    %c0_55 = arith.constant 0 : index
    %110 = vector.load %arg15[%c0_54, %c0_55] : memref<1x32xf32, #tpu.memory_space<vmem>>, vector<1x32xf32>
    %c0_56 = arith.constant 0 : index
    %c0_57 = arith.constant 0 : index
    %111 = vector.load %arg16[%c0_56, %c0_57] : memref<1x32xf32, #tpu.memory_space<vmem>>, vector<1x32xf32>
    %112 = arith.addf %109, %69 : vector<8x32xf32>
    %cst_58 = arith.constant dense<0.000000e+00> : vector<8xf32>
    %113 = vector.multi_reduction <add>, %112, %cst_58 [1] : vector<8x32xf32> to vector<8xf32>
    %114 = vector.shape_cast %113 : vector<8xf32> to vector<8x1xf32>
    %cst_59 = arith.constant 3.200000e+01 : f32
    %115 = vector.broadcast %cst_59 : f32 to vector<8x1xf32>
    %116 = arith.divf %114, %115 : vector<8x1xf32>
    %117 = vector.broadcast %116 : vector<8x1xf32> to vector<8x32xf32>
    %118 = arith.subf %112, %117 : vector<8x32xf32>
    %119 = arith.mulf %118, %118 : vector<8x32xf32>
    %cst_60 = arith.constant dense<0.000000e+00> : vector<8xf32>
    %120 = vector.multi_reduction <add>, %119, %cst_60 [1] : vector<8x32xf32> to vector<8xf32>
    %121 = vector.shape_cast %120 : vector<8xf32> to vector<8x1xf32>
    %cst_61 = arith.constant 3.200000e+01 : f32
    %122 = vector.broadcast %cst_61 : f32 to vector<8x1xf32>
    %123 = arith.divf %121, %122 : vector<8x1xf32>
    %124 = vector.broadcast %116 : vector<8x1xf32> to vector<8x32xf32>
    %125 = arith.subf %112, %124 : vector<8x32xf32>
    %cst_62 = arith.constant 9.99999996E-13 : f32
    %126 = vector.broadcast %cst_62 : f32 to vector<8x1xf32>
    %127 = arith.addf %123, %126 : vector<8x1xf32>
    %128 = math.rsqrt %127 : vector<8x1xf32>
    %129 = vector.broadcast %128 : vector<8x1xf32> to vector<8x32xf32>
    %130 = arith.mulf %125, %129 : vector<8x32xf32>
    %131 = vector.broadcast %110 : vector<1x32xf32> to vector<8x32xf32>
    %132 = arith.mulf %130, %131 : vector<8x32xf32>
    %133 = vector.broadcast %111 : vector<1x32xf32> to vector<8x32xf32>
    %134 = arith.addf %132, %133 : vector<8x32xf32>
    %135 = arith.truncf %134 : vector<8x32xf32> to vector<8x32xbf16>
    %c0_63 = arith.constant 0 : index
    %c0_64 = arith.constant 0 : index
    %136 = vector.load %arg17[%c0_63, %c0_64] : memref<32x64xbf16, #tpu.memory_space<vmem>>, vector<32x64xbf16>
    %cst_65 = arith.constant dense<0.000000e+00> : vector<8x64xf32>
    %137 = tpu.matmul %135, %136, %cst_65 {dimension_numbers = #tpu.dot_dimension_numbers<[1], [0], [0], [1], [0, 0, 1, 1], [], []>} : vector<8x32xbf16>, vector<32x64xbf16>, vector<8x64xf32> -> vector<8x64xf32>
    %c0_66 = arith.constant 0 : index
    %c0_67 = arith.constant 0 : index
    %138 = vector.load %arg18[%c0_66, %c0_67] : memref<1x64xf32, #tpu.memory_space<vmem>>, vector<1x64xf32>
    %139 = vector.broadcast %138 : vector<1x64xf32> to vector<8x64xf32>
    %140 = arith.addf %137, %139 : vector<8x64xf32>
    %cst_68 = arith.constant 0.000000e+00 : f32
    %141 = vector.broadcast %cst_68 : f32 to vector<8x64xf32>
    %142 = arith.maximumf %140, %141 : vector<8x64xf32>
    %143 = arith.truncf %142 : vector<8x64xf32> to vector<8x64xbf16>
    %c0_69 = arith.constant 0 : index
    %c0_70 = arith.constant 0 : index
    %144 = vector.load %arg19[%c0_69, %c0_70] : memref<64x32xbf16, #tpu.memory_space<vmem>>, vector<64x32xbf16>
    %cst_71 = arith.constant dense<0.000000e+00> : vector<8x32xf32>
    %145 = tpu.matmul %143, %144, %cst_71 {dimension_numbers = #tpu.dot_dimension_numbers<[1], [0], [0], [1], [0, 0, 1, 1], [], []>} : vector<8x64xbf16>, vector<64x32xbf16>, vector<8x32xf32> -> vector<8x32xf32>
    %c0_72 = arith.constant 0 : index
    %c0_73 = arith.constant 0 : index
    %146 = vector.load %arg20[%c0_72, %c0_73] : memref<1x32xf32, #tpu.memory_space<vmem>>, vector<1x32xf32>
    %147 = vector.broadcast %146 : vector<1x32xf32> to vector<8x32xf32>
    %148 = arith.addf %145, %147 : vector<8x32xf32>
    %c0_74 = arith.constant 0 : index
    %c0_75 = arith.constant 0 : index
    %149 = vector.load %arg21[%c0_74, %c0_75] : memref<1x32xf32, #tpu.memory_space<vmem>>, vector<1x32xf32>
    %c0_76 = arith.constant 0 : index
    %c0_77 = arith.constant 0 : index
    %150 = vector.load %arg22[%c0_76, %c0_77] : memref<1x32xf32, #tpu.memory_space<vmem>>, vector<1x32xf32>
    %151 = arith.addf %148, %134 : vector<8x32xf32>
    %cst_78 = arith.constant dense<0.000000e+00> : vector<8xf32>
    %152 = vector.multi_reduction <add>, %151, %cst_78 [1] : vector<8x32xf32> to vector<8xf32>
    %153 = vector.shape_cast %152 : vector<8xf32> to vector<8x1xf32>
    %cst_79 = arith.constant 3.200000e+01 : f32
    %154 = vector.broadcast %cst_79 : f32 to vector<8x1xf32>
    %155 = arith.divf %153, %154 : vector<8x1xf32>
    %156 = vector.broadcast %155 : vector<8x1xf32> to vector<8x32xf32>
    %157 = arith.subf %151, %156 : vector<8x32xf32>
    %158 = arith.mulf %157, %157 : vector<8x32xf32>
    %cst_80 = arith.constant dense<0.000000e+00> : vector<8xf32>
    %159 = vector.multi_reduction <add>, %158, %cst_80 [1] : vector<8x32xf32> to vector<8xf32>
    %160 = vector.shape_cast %159 : vector<8xf32> to vector<8x1xf32>
    %cst_81 = arith.constant 3.200000e+01 : f32
    %161 = vector.broadcast %cst_81 : f32 to vector<8x1xf32>
    %162 = arith.divf %160, %161 : vector<8x1xf32>
    %163 = vector.broadcast %155 : vector<8x1xf32> to vector<8x32xf32>
    %164 = arith.subf %151, %163 : vector<8x32xf32>
    %cst_82 = arith.constant 9.99999996E-13 : f32
    %165 = vector.broadcast %cst_82 : f32 to vector<8x1xf32>
    %166 = arith.addf %162, %165 : vector<8x1xf32>
    %167 = math.rsqrt %166 : vector<8x1xf32>
    %168 = vector.broadcast %167 : vector<8x1xf32> to vector<8x32xf32>
    %169 = arith.mulf %164, %168 : vector<8x32xf32>
    %170 = vector.broadcast %149 : vector<1x32xf32> to vector<8x32xf32>
    %171 = arith.mulf %169, %170 : vector<8x32xf32>
    %172 = vector.broadcast %150 : vector<1x32xf32> to vector<8x32xf32>
    %173 = arith.addf %171, %172 : vector<8x32xf32>
    %c0_83 = arith.constant 0 : index
    %c0_84 = arith.constant 0 : index
    %c0_85 = arith.constant 0 : index
    %174 = vector.load %arg23[%c0_83, %c0_84, %c0_85] : memref<1x8x32xf32, #tpu.memory_space<vmem>>, vector<1x8x32xf32>
    %175 = vector.shape_cast %174 : vector<1x8x32xf32> to vector<8x32xf32>
    %176 = vector.shape_cast %173 : vector<8x32xf32> to vector<1x8x32xf32>
    tpu.vector_store %arg23[%c0_83, %c0_84, %c0_85], %176 {strides = array<i32>} : memref<1x8x32xf32, #tpu.memory_space<vmem>>, vector<1x8x32xf32>,
    return
  }
  func.func @transform_0(%arg0: i32, %arg1: i32) -> (i32, i32, i32) {
    %c0_i32 = arith.constant 0 : i32
    %c0_i32_0 = arith.constant 0 : i32
    return %arg0, %arg1, %c0_i32 : i32, i32, i32
  }
  func.func @transform_1(%arg0: i32, %arg1: i32) -> (i32, i32, i32) {
    %c0_i32 = arith.constant 0 : i32
    %c0_i32_0 = arith.constant 0 : i32
    %c0_i32_1 = arith.constant 0 : i32
    return %arg0, %c0_i32, %c0_i32_0 : i32, i32, i32
  }
  func.func @transform_2(%arg0: i32, %arg1: i32) -> (i32, i32, i32) {
    %c0_i32 = arith.constant 0 : i32
    %c0_i32_0 = arith.constant 0 : i32
    %c0_i32_1 = arith.constant 0 : i32
    return %arg0, %c0_i32, %c0_i32_0 : i32, i32, i32
  }
  func.func @transform_3(%arg0: i32, %arg1: i32) -> (i32, i32, i32) {
    %c0_i32 = arith.constant 0 : i32
    %c0_i32_0 = arith.constant 0 : i32
    return %arg0, %arg1, %c0_i32 : i32, i32, i32
  }
  func.func @transform_4(%arg0: i32, %arg1: i32) -> (i32, i32, i32) {
    %c0_i32 = arith.constant 0 : i32
    %c0_i32_0 = arith.constant 0 : i32
    %c0_i32_1 = arith.constant 0 : i32
    return %arg0, %c0_i32, %c0_i32_0 : i32, i32, i32
  }
  func.func @transform_5(%arg0: i32, %arg1: i32) -> (i32, i32) {
    %c0_i32 = arith.constant 0 : i32
    %c0_i32_0 = arith.constant 0 : i32
    %c0_i32_1 = arith.constant 0 : i32
    return %c0_i32, %c0_i32_0 : i32, i32
  }
  func.func @transform_6(%arg0: i32, %arg1: i32) -> (i32, i32) {
    %c0_i32 = arith.constant 0 : i32
    %c0_i32_0 = arith.constant 0 : i32
    %c0_i32_1 = arith.constant 0 : i32
    return %c0_i32, %c0_i32_0 : i32, i32
  }
  func.func @transform_7(%arg0: i32, %arg1: i32) -> (i32, i32) {
    %c0_i32 = arith.constant 0 : i32
    %c0_i32_0 = arith.constant 0 : i32
    %c0_i32_1 = arith.constant 0 : i32
    return %c0_i32, %c0_i32_0 : i32, i32
  }
  func.func @transform_8(%arg0: i32, %arg1: i32) -> (i32, i32) {
    %c0_i32 = arith.constant 0 : i32
    %c0_i32_0 = arith.constant 0 : i32
    %c0_i32_1 = arith.constant 0 : i32
    return %c0_i32, %c0_i32_0 : i32, i32
  }
  func.func @transform_9(%arg0: i32, %arg1: i32) -> (i32, i32) {
    %c0_i32 = arith.constant 0 : i32
    %c0_i32_0 = arith.constant 0 : i32
    %c0_i32_1 = arith.constant 0 : i32
    return %c0_i32, %c0_i32_0 : i32, i32
  }
  func.func @transform_10(%arg0: i32, %arg1: i32) -> (i32, i32) {
    %c0_i32 = arith.constant 0 : i32
    %c0_i32_0 = arith.constant 0 : i32
    %c0_i32_1 = arith.constant 0 : i32
    return %c0_i32, %c0_i32_0 : i32, i32
  }
  func.func @transform_11(%arg0: i32, %arg1: i32) -> (i32, i32) {
    %c0_i32 = arith.constant 0 : i32
    %c0_i32_0 = arith.constant 0 : i32
    %c0_i32_1 = arith.constant 0 : i32
    return %c0_i32, %c0_i32_0 : i32, i32
  }
  func.func @transform_12(%arg0: i32, %arg1: i32) -> (i32, i32) {
    %c0_i32 = arith.constant 0 : i32
    %c0_i32_0 = arith.constant 0 : i32
    %c0_i32_1 = arith.constant 0 : i32
    return %c0_i32, %c0_i32_0 : i32, i32
  }
  func.func @transform_13(%arg0: i32, %arg1: i32) -> (i32, i32) {
    %c0_i32 = arith.constant 0 : i32
    %c0_i32_0 = arith.constant 0 : i32
    %c0_i32_1 = arith.constant 0 : i32
    return %c0_i32, %c0_i32_0 : i32, i32
  }
  func.func @transform_14(%arg0: i32, %arg1: i32) -> (i32, i32) {
    %c0_i32 = arith.constant 0 : i32
    %c0_i32_0 = arith.constant 0 : i32
    %c0_i32_1 = arith.constant 0 : i32
    return %c0_i32, %c0_i32_0 : i32, i32
  }
  func.func @transform_15(%arg0: i32, %arg1: i32) -> (i32, i32) {
    %c0_i32 = arith.constant 0 : i32
    %c0_i32_0 = arith.constant 0 : i32
    %c0_i32_1 = arith.constant 0 : i32
    return %c0_i32, %c0_i32_0 : i32, i32
  }
  func.func @transform_16(%arg0: i32, %arg1: i32) -> (i32, i32) {
    %c0_i32 = arith.constant 0 : i32
    %c0_i32_0 = arith.constant 0 : i32
    %c0_i32_1 = arith.constant 0 : i32
    return %c0_i32, %c0_i32_0 : i32, i32
  }
  func.func @transform_17(%arg0: i32, %arg1: i32) -> (i32, i32) {
    %c0_i32 = arith.constant 0 : i32
    %c0_i32_0 = arith.constant 0 : i32
    %c0_i32_1 = arith.constant 0 : i32
    return %c0_i32, %c0_i32_0 : i32, i32
  }
  func.func @transform_18(%arg0: i32, %arg1: i32) -> (i32, i32) {
    %c0_i32 = arith.constant 0 : i32
    %c0_i32_0 = arith.constant 0 : i32
    %c0_i32_1 = arith.constant 0 : i32
    return %c0_i32, %c0_i32_0 : i32, i32
  }
  func.func @transform_19(%arg0: i32, %arg1: i32) -> (i32, i32) {
    %c0_i32 = arith.constant 0 : i32
    %c0_i32_0 = arith.constant 0 : i32
    %c0_i32_1 = arith.constant 0 : i32
    return %c0_i32, %c0_i32_0 : i32, i32
  }
  func.func @transform_20(%arg0: i32, %arg1: i32) -> (i32, i32) {
    %c0_i32 = arith.constant 0 : i32
    %c0_i32_0 = arith.constant 0 : i32
    %c0_i32_1 = arith.constant 0 : i32
    return %c0_i32, %c0_i32_0 : i32, i32
  }
  func.func @transform_21(%arg0: i32, %arg1: i32) -> (i32, i32, i32) {
    %c0_i32 = arith.constant 0 : i32
    %c0_i32_0 = arith.constant 0 : i32
    return %arg0, %arg1, %c0_i32 : i32, i32, i32
  }
  func.func @transform_22(%arg0: i32, %arg1: i32) -> (i32, i32, i32, i32) {
    %c0_i32 = arith.constant 0 : i32
    %c0_i32_0 = arith.constant 0 : i32
    %c0_i32_1 = arith.constant 0 : i32
    return %arg0, %c0_i32, %arg1, %c0_i32_0 : i32, i32, i32, i32
  }
  func.func @transform_23(%arg0: i32, %arg1: i32) -> (i32, i32, i32, i32) {
    %c0_i32 = arith.constant 0 : i32
    %c0_i32_0 = arith.constant 0 : i32
    %c0_i32_1 = arith.constant 0 : i32
    return %arg0, %c0_i32, %arg1, %c0_i32_0 : i32, i32, i32, i32
  }
}

module attributes {stable_mosaic.version = 11 : i64} {
  func.func @_decoder_layer_kernel(%arg0: i32, %arg1: i32, %arg2: memref<1x8x32xf32, #tpu.memory_space<vmem>>, %arg3: memref<1x8x32xf32, #tpu.memory_space<vmem>>, %arg4: memref<1x8x32xf32, #tpu.memory_space<vmem>>, %arg5: memref<1x8x8xf32, #tpu.memory_space<vmem>>, %arg6: memref<1x1x8xf32, #tpu.memory_space<vmem>>, %arg7: memref<32x32xbf16, #tpu.memory_space<vmem>>, %arg8: memref<32x64xbf16, #tpu.memory_space<vmem>>, %arg9: memref<32x32xbf16, #tpu.memory_space<vmem>>, %arg10: memref<1x32xf32, #tpu.memory_space<vmem>>, %arg11: memref<1x32xf32, #tpu.memory_space<vmem>>, %arg12: memref<32x32xbf16, #tpu.memory_space<vmem>>, %arg13: memref<32x64xbf16, #tpu.memory_space<vmem>>, %arg14: memref<32x32xbf16, #tpu.memory_space<vmem>>, %arg15: memref<1x32xf32, #tpu.memory_space<vmem>>, %arg16: memref<1x32xf32, #tpu.memory_space<vmem>>, %arg17: memref<32x64xbf16, #tpu.memory_space<vmem>>, %arg18: memref<1x64xf32, #tpu.memory_space<vmem>>, %arg19: memref<64x32xbf16, #tpu.memory_space<vmem>>, %arg20: memref<1x32xf32, #tpu.memory_space<vmem>>, %arg21: memref<1x32xf32, #tpu.memory_space<vmem>>, %arg22: memref<1x32xf32, #tpu.memory_space<vmem>>, %arg23: memref<1x8x32xf32, #tpu.memory_space<vmem>>, %arg24: memref<1x4x8x8xf32, #tpu.memory_space<vmem>>, %arg25: memref<1x4x8x8xf32, #tpu.memory_space<vmem>>, %arg26: memref<8x64xbf16, #tpu.memory_space<vmem>>, %arg27: memref<8x64xbf16, #tpu.memory_space<vmem>>) attributes {dimension_semantics = [#tpu.dimension_semantics<parallel>, #tpu.dimension_semantics<arbitrary>], iteration_bounds = array<i64: 2, 1>, scalar_prefetch = 0 : i64, scratch_operands = 2 : i64, tpu.core_type = #tpu.core_type<tc>, window_params = [{transform_indices = @transform_0, window_bounds = array<i64: 1, 8, 32>}, {transform_indices = @transform_1, window_bounds = array<i64: 1, 8, 32>}, {transform_indices = @transform_2, window_bounds = array<i64: 1, 8, 32>}, {transform_indices = @transform_3, window_bounds = array<i64: 1, 8, 8>}, {transform_indices = @transform_4, window_bounds = array<i64: 1, 1, 8>}, {pipeline_mode = #tpu.pipeline_mode<synchronous>, transform_indices = @transform_5, window_bounds = array<i64: 32, 32>}, {pipeline_mode = #tpu.pipeline_mode<synchronous>, transform_indices = @transform_6, window_bounds = array<i64: 32, 64>}, {pipeline_mode = #tpu.pipeline_mode<synchronous>, transform_indices = @transform_7, window_bounds = array<i64: 32, 32>}, {pipeline_mode = #tpu.pipeline_mode<synchronous>, transform_indices = @transform_8, window_bounds = array<i64: 1, 32>}, {pipeline_mode = #tpu.pipeline_mode<synchronous>, transform_indices = @transform_9, window_bounds = array<i64: 1, 32>}, {pipeline_mode = #tpu.pipeline_mode<synchronous>, transform_indices = @transform_10, window_bounds = array<i64: 32, 32>}, {pipeline_mode = #tpu.pipeline_mode<synchronous>, transform_indices = @transform_11, window_bounds = array<i64: 32, 64>}, {pipeline_mode = #tpu.pipeline_mode<synchronous>, transform_indices = @transform_12, window_bounds = array<i64: 32, 32>}, {pipeline_mode = #tpu.pipeline_mode<synchronous>, transform_indices = @transform_13, window_bounds = array<i64: 1, 32>}, {pipeline_mode = #tpu.pipeline_mode<synchronous>, transform_indices = @transform_14, window_bounds = array<i64: 1, 32>}, {pipeline_mode = #tpu.pipeline_mode<synchronous>, transform_indices = @transform_15, window_bounds = array<i64: 32, 64>}, {pipeline_mode = #tpu.pipeline_mode<synchronous>, transform_indices = @transform_16, window_bounds = array<i64: 1, 64>}, {pipeline_mode = #tpu.pipeline_mode<synchronous>, transform_indices = @transform_17, window_bounds = array<i64: 64, 32>}, {pipeline_mode = #tpu.pipeline_mode<synchronous>, transform_indices = @transform_18, window_bounds = array<i64: 1, 32>}, {pipeline_mode = #tpu.pipeline_mode<synchronous>, transform_indices = @transform_19, window_bounds = array<i64: 1, 32>}, {pipeline_mode = #tpu.pipeline_mode<synchronous>, transform_indices = @transform_20, window_bounds = array<i64: 1, 32>}, {transform_indices = @transform_21, window_bounds = array<i64: 1, 8, 32>}, {transform_indices = @transform_22, window_bounds = array<i64: 1, 4, 8, 8>}, {transform_indices = @transform_23, window_bounds = array<i64: 1, 4, 8, 8>}]} {
    %c0 = arith.constant 0 : index
    %c0_0 = arith.constant 0 : index
    %c0_1 = arith.constant 0 : index
    %0 = vector.load %arg2[%c0, %c0_0, %c0_1] : memref<1x8x32xf32, #tpu.memory_space<vmem>>, vector<1x8x32xf32>
    %1 = vector.shape_cast %0 : vector<1x8x32xf32> to vector<8x32xf32>
    %c0_i32 = arith.constant 0 : i32
    %2 = arith.cmpi eq, %arg1, %c0_i32 : i32
    %3 = arith.extui %2 : i1 to i32
    %c0_i32_2 = arith.constant 0 : i32
    %4 = arith.cmpi ne, %3, %c0_i32_2 : i32
    scf.if %4 {
      %c0_86 = arith.constant 0 : index
      %c0_87 = arith.constant 0 : index
      %c0_88 = arith.constant 0 : index
      %177 = vector.load %arg3[%c0_86, %c0_87, %c0_88] : memref<1x8x32xf32, #tpu.memory_space<vmem>>, vector<1x8x32xf32>
      %178 = vector.shape_cast %177 : vector<1x8x32xf32> to vector<8x32xf32>
      %179 = arith.truncf %178 : vector<8x32xf32> to vector<8x32xbf16>
      %c0_89 = arith.constant 0 : index
      %c0_90 = arith.constant 0 : index
      %180 = vector.load %arg8[%c0_89, %c0_90] : memref<32x64xbf16, #tpu.memory_space<vmem>>, vector<32x64xbf16>
      %cst_91 = arith.constant dense<0.000000e+00> : vector<8x64xf32>
      %181 = tpu.matmul %179, %180, %cst_91 {dimension_numbers = #tpu.dot_dimension_numbers<[1], [0], [0], [1], [0, 0, 1, 1], [], []>} : vector<8x32xbf16>, vector<32x64xbf16>, vector<8x64xf32> -> vector<8x64xf32>
      %182 = arith.truncf %181 : vector<8x64xf32> to vector<8x64xbf16>
      %c0_92 = arith.constant 0 : index
      %c0_93 = arith.constant 0 : index
      %183 = vector.load %arg26[%c0_92, %c0_93] : memref<8x64xbf16, #tpu.memory_space<vmem>>, vector<8x64xbf16>
      tpu.vector_store %arg26[%c0_92, %c0_93], %182 {strides = array<i32>} : memref<8x64xbf16, #tpu.memory_space<vmem>>, vector<8x64xbf16>,
      %c0_94 = arith.constant 0 : index
      %c0_95 = arith.constant 0 : index
      %c0_96 = arith.constant 0 : index
      %184 = vector.load %arg4[%c0_94, %c0_95, %c0_96] : memref<1x8x32xf32, #tpu.memory_space<vmem>>, vector<1x8x32xf32>
      %185 = vector.shape_cast %184 : vector<1x8x32xf32> to vector<8x32xf32>
      %186 = arith.truncf %185 : vector<8x32xf32> to vector<8x32xbf16>
      %c0_97 = arith.constant 0 : index
      %c0_98 = arith.constant 0 : index
      %187 = vector.load %arg13[%c0_97, %c0_98] : memref<32x64xbf16, #tpu.memory_space<vmem>>, vector<32x64xbf16>
      %cst_99 = arith.constant dense<0.000000e+00> : vector<8x64xf32>
      %188 = tpu.matmul %186, %187, %cst_99 {dimension_numbers = #tpu.dot_dimension_numbers<[1], [0], [0], [1], [0, 0, 1, 1], [], []>} : vector<8x32xbf16>, vector<32x64xbf16>, vector<8x64xf32> -> vector<8x64xf32>
      %189 = arith.truncf %188 : vector<8x64xf32> to vector<8x64xbf16>
      %c0_100 = arith.constant 0 : index
      %c0_101 = arith.constant 0 : index
      %190 = vector.load %arg27[%c0_100, %c0_101] : memref<8x64xbf16, #tpu.memory_space<vmem>>, vector<8x64xbf16>
      tpu.vector_store %arg27[%c0_100, %c0_101], %189 {strides = array<i32>} : memref<8x64xbf16, #tpu.memory_space<vmem>>, vector<8x64xbf16>,
    } else {
    }
    %5 = arith.truncf %1 : vector<8x32xf32> to vector<8x32xbf16>
    %c0_3 = arith.constant 0 : index
    %c0_4 = arith.constant 0 : index
    %6 = vector.load %arg7[%c0_3, %c0_4] : memref<32x32xbf16, #tpu.memory_space<vmem>>, vector<32x32xbf16>
    %cst = arith.constant dense<0.000000e+00> : vector<8x32xf32>
    %7 = tpu.matmul %5, %6, %cst {dimension_numbers = #tpu.dot_dimension_numbers<[1], [0], [0], [1], [0, 0, 1, 1], [], []>} : vector<8x32xbf16>, vector<32x32xbf16>, vector<8x32xf32> -> vector<8x32xf32>
    %c0_5 = arith.constant 0 : index
    %c0_6 = arith.constant 0 : index
    %c0_7 = arith.constant 0 : index
    %8 = vector.load %arg5[%c0_5, %c0_6, %c0_7] : memref<1x8x8xf32, #tpu.memory_space<vmem>>, vector<1x8x8xf32>
    %9 = vector.shape_cast %8 : vector<1x8x8xf32> to vector<8x8xf32>
    %cst_8 = arith.constant -1.000000e+30 : f32
    %10 = vector.broadcast %cst_8 : f32 to vector<8x8xf32>
    %11 = arith.mulf %9, %10 : vector<8x8xf32>
    %c0_9 = arith.constant 0 : index
    %c0_10 = arith.constant 0 : index
    %12 = vector.load %arg26[%c0_9, %c0_10] : memref<8x64xbf16, #tpu.memory_space<vmem>>, vector<8x32xbf16>
    %c0_11 = arith.constant 0 : index
    %c32 = arith.constant 32 : index
    %13 = vector.load %arg26[%c0_11, %c32] : memref<8x64xbf16, #tpu.memory_space<vmem>>, vector<8x32xbf16>
    %c0_12 = arith.constant 0 : index
    %c0_13 = arith.constant 0 : index
    %14 = vector.load %arg9[%c0_12, %c0_13] : memref<32x32xbf16, #tpu.memory_space<vmem>>, vector<32x32xbf16>
    %15 = vector.shape_cast %7 : vector<8x32xf32> to vector<8x4x8xf32>
    %16 = tpu.transpose %15, [1, 0, 2] : vector<8x4x8xf32> -> vector<4x8x8xf32>
    %17 = arith.truncf %16 : vector<4x8x8xf32> to vector<4x8x8xbf16>
    %18 = vector.shape_cast %12 : vector<8x32xbf16> to vector<8x4x8xbf16>
    %19 = tpu.transpose %18, [1, 0, 2] : vector<8x4x8xbf16> -> vector<4x8x8xbf16>
    %20 = vector.shape_cast %13 : vector<8x32xbf16> to vector<8x4x8xbf16>
    %21 = tpu.transpose %20, [1, 0, 2] : vector<8x4x8xbf16> -> vector<4x8x8xbf16>
    "tpu.trace_start"() <{level = 10 : i32, message = "hqd,hkd->hqk"}> : () -> ()
    %cst_14 = arith.constant dense<0.000000e+00> : vector<4x8x8xf32>
    %22 = tpu.matmul %17, %19, %cst_14 {dimension_numbers = #tpu.dot_dimension_numbers<[2], [2], [1], [1], [0, 0, 0, 1, 1, 1], [0], [0]>} : vector<4x8x8xbf16>, vector<4x8x8xbf16>, vector<4x8x8xf32> -> vector<4x8x8xf32>
    "tpu.trace_stop"() : () -> ()
    %23 = vector.shape_cast %11 : vector<8x8xf32> to vector<1x8x8xf32>
    %24 = vector.broadcast %23 : vector<1x8x8xf32> to vector<4x8x8xf32>
    %25 = arith.addf %22, %24 : vector<4x8x8xf32>
    %cst_15 = arith.constant dense<0xFF800000> : vector<4x8xf32>
    %26 = vector.multi_reduction <maximumf>, %25, %cst_15 [2] : vector<4x8x8xf32> to vector<4x8xf32>
    %27 = vector.shape_cast %26 : vector<4x8xf32> to vector<4x8x1xf32>
    %28 = vector.broadcast %27 : vector<4x8x1xf32> to vector<4x8x8xf32>
    %29 = arith.subf %25, %28 : vector<4x8x8xf32>
    %30 = math.exp %29 : vector<4x8x8xf32>
    %cst_16 = arith.constant dense<0.000000e+00> : vector<4x8xf32>
    %31 = vector.multi_reduction <add>, %30, %cst_16 [2] : vector<4x8x8xf32> to vector<4x8xf32>
    %32 = vector.shape_cast %31 : vector<4x8xf32> to vector<4x8x1xf32>
    %33 = tpu.reciprocal %32 {approx = true} : vector<4x8x1xf32> -> vector<4x8x1xf32>
    %34 = vector.broadcast %33 : vector<4x8x1xf32> to vector<4x8x8xf32>
    %35 = arith.mulf %30, %34 : vector<4x8x8xf32>
    %c0_17 = arith.constant 0 : index
    %c0_18 = arith.constant 0 : index
    %c0_19 = arith.constant 0 : index
    %c0_20 = arith.constant 0 : index
    %36 = vector.load %arg24[%c0_17, %c0_18, %c0_19, %c0_20] : memref<1x4x8x8xf32, #tpu.memory_space<vmem>>, vector<1x4x8x8xf32>
    %37 = vector.shape_cast %36 : vector<1x4x8x8xf32> to vector<4x8x8xf32>
    %38 = vector.shape_cast %35 : vector<4x8x8xf32> to vector<1x4x8x8xf32>
    tpu.vector_store %arg24[%c0_17, %c0_18, %c0_19, %c0_20], %38 {strides = array<i32>} : memref<1x4x8x8xf32, #tpu.memory_space<vmem>>, vector<1x4x8x8xf32>,
    %39 = arith.truncf %35 : vector<4x8x8xf32> to vector<4x8x8xbf16>
    "tpu.trace_start"() <{level = 10 : i32, message = "hqk,hkd->hqd"}> : () -> ()
    %cst_21 = arith.constant dense<0.000000e+00> : vector<4x8x8xf32>
    %40 = tpu.matmul %39, %21, %cst_21 {dimension_numbers = #tpu.dot_dimension_numbers<[2], [1], [1], [2], [0, 0, 0, 1, 1, 2], [0], [0]>} : vector<4x8x8xbf16>, vector<4x8x8xbf16>, vector<4x8x8xf32> -> vector<4x8x8xf32>
    "tpu.trace_stop"() : () -> ()
    %41 = tpu.transpose %40, [1, 0, 2] : vector<4x8x8xf32> -> vector<8x4x8xf32>
    %42 = vector.shape_cast %41 : vector<8x4x8xf32> to vector<8x32xf32>
    %43 = arith.truncf %42 : vector<8x32xf32> to vector<8x32xbf16>
    %cst_22 = arith.constant dense<0.000000e+00> : vector<8x32xf32>
    %44 = tpu.matmul %43, %14, %cst_22 {dimension_numbers = #tpu.dot_dimension_numbers<[1], [0], [0], [1], [0, 0, 1, 1], [], []>} : vector<8x32xbf16>, vector<32x32xbf16>, vector<8x32xf32> -> vector<8x32xf32>
    %c0_23 = arith.constant 0 : index
    %c0_24 = arith.constant 0 : index
    %45 = vector.load %arg10[%c0_23, %c0_24] : memref<1x32xf32, #tpu.memory_space<vmem>>, vector<1x32xf32>
    %c0_25 = arith.constant 0 : index
    %c0_26 = arith.constant 0 : index
    %46 = vector.load %arg11[%c0_25, %c0_26] : memref<1x32xf32, #tpu.memory_space<vmem>>, vector<1x32xf32>
    %47 = arith.addf %44, %1 : vector<8x32xf32>
    %cst_27 = arith.constant dense<0.000000e+00> : vector<8xf32>
    %48 = vector.multi_reduction <add>, %47, %cst_27 [1] : vector<8x32xf32> to vector<8xf32>
    %49 = vector.shape_cast %48 : vector<8xf32> to vector<8x1xf32>
    %cst_28 = arith.constant 3.200000e+01 : f32
    %50 = vector.broadcast %cst_28 : f32 to vector<8x1xf32>
    %51 = arith.divf %49, %50 : vector<8x1xf32>
    %52 = vector.broadcast %51 : vector<8x1xf32> to vector<8x32xf32>
    %53 = arith.subf %47, %52 : vector<8x32xf32>
    %54 = arith.mulf %53, %53 : vector<8x32xf32>
    %cst_29 = arith.constant dense<0.000000e+00> : vector<8xf32>
    %55 = vector.multi_reduction <add>, %54, %cst_29 [1] : vector<8x32xf32> to vector<8xf32>
    %56 = vector.shape_cast %55 : vector<8xf32> to vector<8x1xf32>
    %cst_30 = arith.constant 3.200000e+01 : f32
    %57 = vector.broadcast %cst_30 : f32 to vector<8x1xf32>
    %58 = arith.divf %56, %57 : vector<8x1xf32>
    %59 = vector.broadcast %51 : vector<8x1xf32> to vector<8x32xf32>
    %60 = arith.subf %47, %59 : vector<8x32xf32>
    %cst_31 = arith.constant 9.99999996E-13 : f32
    %61 = vector.broadcast %cst_31 : f32 to vector<8x1xf32>
    %62 = arith.addf %58, %61 : vector<8x1xf32>
    %63 = math.rsqrt %62 : vector<8x1xf32>
    %64 = vector.broadcast %63 : vector<8x1xf32> to vector<8x32xf32>
    %65 = arith.mulf %60, %64 : vector<8x32xf32>
    %66 = vector.broadcast %45 : vector<1x32xf32> to vector<8x32xf32>
    %67 = arith.mulf %65, %66 : vector<8x32xf32>
    %68 = vector.broadcast %46 : vector<1x32xf32> to vector<8x32xf32>
    %69 = arith.addf %67, %68 : vector<8x32xf32>
    %70 = arith.truncf %69 : vector<8x32xf32> to vector<8x32xbf16>
    %c0_32 = arith.constant 0 : index
    %c0_33 = arith.constant 0 : index
    %71 = vector.load %arg12[%c0_32, %c0_33] : memref<32x32xbf16, #tpu.memory_space<vmem>>, vector<32x32xbf16>
    %cst_34 = arith.constant dense<0.000000e+00> : vector<8x32xf32>
    %72 = tpu.matmul %70, %71, %cst_34 {dimension_numbers = #tpu.dot_dimension_numbers<[1], [0], [0], [1], [0, 0, 1, 1], [], []>} : vector<8x32xbf16>, vector<32x32xbf16>, vector<8x32xf32> -> vector<8x32xf32>
    %c0_35 = arith.constant 0 : index
    %c0_36 = arith.constant 0 : index
    %c0_37 = arith.constant 0 : index
    %73 = vector.load %arg6[%c0_35, %c0_36, %c0_37] : memref<1x1x8xf32, #tpu.memory_space<vmem>>, vector<1x1x8xf32>
    %74 = vector.shape_cast %73 : vector<1x1x8xf32> to vector<1x8xf32>
    %cst_38 = arith.constant -1.000000e+30 : f32
    %75 = vector.broadcast %cst_38 : f32 to vector<1x8xf32>
    %76 = arith.mulf %74, %75 : vector<1x8xf32>
    %c0_39 = arith.constant 0 : index
    %c0_40 = arith.constant 0 : index
    %77 = vector.load %arg27[%c0_39, %c0_40] : memref<8x64xbf16, #tpu.memory_space<vmem>>, vector<8x32xbf16>
    %c0_41 = arith.constant 0 : index
    %c32_42 = arith.constant 32 : index
    %78 = vector.load %arg27[%c0_41, %c32_42] : memref<8x64xbf16, #tpu.memory_space<vmem>>, vector<8x32xbf16>
    %c0_43 = arith.constant 0 : index
    %c0_44 = arith.constant 0 : index
    %79 = vector.load %arg14[%c0_43, %c0_44] : memref<32x32xbf16, #tpu.memory_space<vmem>>, vector<32x32xbf16>
    %80 = vector.shape_cast %72 : vector<8x32xf32> to vector<8x4x8xf32>
    %81 = tpu.transpose %80, [1, 0, 2] : vector<8x4x8xf32> -> vector<4x8x8xf32>
    %82 = arith.truncf %81 : vector<4x8x8xf32> to vector<4x8x8xbf16>
    %83 = vector.shape_cast %77 : vector<8x32xbf16> to vector<8x4x8xbf16>
    %84 = tpu.transpose %83, [1, 0, 2] : vector<8x4x8xbf16> -> vector<4x8x8xbf16>
    %85 = vector.shape_cast %78 : vector<8x32xbf16> to vector<8x4x8xbf16>
    %86 = tpu.transpose %85, [1, 0, 2] : vector<8x4x8xbf16> -> vector<4x8x8xbf16>
    "tpu.trace_start"() <{level = 10 : i32, message = "hqd,hkd->hqk"}> : () -> ()
    %cst_45 = arith.constant dense<0.000000e+00> : vector<4x8x8xf32>
    %87 = tpu.matmul %82, %84, %cst_45 {dimension_numbers = #tpu.dot_dimension_numbers<[2], [2], [1], [1], [0, 0, 0, 1, 1, 1], [0], [0]>} : vector<4x8x8xbf16>, vector<4x8x8xbf16>, vector<4x8x8xf32> -> vector<4x8x8xf32>
    "tpu.trace_stop"() : () -> ()
    %88 = vector.shape_cast %76 : vector<1x8xf32> to vector<1x1x8xf32>
    %89 = vector.broadcast %88 : vector<1x1x8xf32> to vector<4x8x8xf32>
    %90 = arith.addf %87, %89 : vector<4x8x8xf32>
    %cst_46 = arith.constant dense<0xFF800000> : vector<4x8xf32>
    %91 = vector.multi_reduction <maximumf>, %90, %cst_46 [2] : vector<4x8x8xf32> to vector<4x8xf32>
    %92 = vector.shape_cast %91 : vector<4x8xf32> to vector<4x8x1xf32>
    %93 = vector.broadcast %92 : vector<4x8x1xf32> to vector<4x8x8xf32>
    %94 = arith.subf %90, %93 : vector<4x8x8xf32>
    %95 = math.exp %94 : vector<4x8x8xf32>
    %cst_47 = arith.constant dense<0.000000e+00> : vector<4x8xf32>
    %96 = vector.multi_reduction <add>, %95, %cst_47 [2] : vector<4x8x8xf32> to vector<4x8xf32>
    %97 = vector.shape_cast %96 : vector<4x8xf32> to vector<4x8x1xf32>
    %98 = tpu.reciprocal %97 {approx = true} : vector<4x8x1xf32> -> vector<4x8x1xf32>
    %99 = vector.broadcast %98 : vector<4x8x1xf32> to vector<4x8x8xf32>
    %100 = arith.mulf %95, %99 : vector<4x8x8xf32>
    %c0_48 = arith.constant 0 : index
    %c0_49 = arith.constant 0 : index
    %c0_50 = arith.constant 0 : index
    %c0_51 = arith.constant 0 : index
    %101 = vector.load %arg25[%c0_48, %c0_49, %c0_50, %c0_51] : memref<1x4x8x8xf32, #tpu.memory_space<vmem>>, vector<1x4x8x8xf32>
    %102 = vector.shape_cast %101 : vector<1x4x8x8xf32> to vector<4x8x8xf32>
    %103 = vector.shape_cast %100 : vector<4x8x8xf32> to vector<1x4x8x8xf32>
    tpu.vector_store %arg25[%c0_48, %c0_49, %c0_50, %c0_51], %103 {strides = array<i32>} : memref<1x4x8x8xf32, #tpu.memory_space<vmem>>, vector<1x4x8x8xf32>,
    %104 = arith.truncf %100 : vector<4x8x8xf32> to vector<4x8x8xbf16>
    "tpu.trace_start"() <{level = 10 : i32, message = "hqk,hkd->hqd"}> : () -> ()
    %cst_52 = arith.constant dense<0.000000e+00> : vector<4x8x8xf32>
    %105 = tpu.matmul %104, %86, %cst_52 {dimension_numbers = #tpu.dot_dimension_numbers<[2], [1], [1], [2], [0, 0, 0, 1, 1, 2], [0], [0]>} : vector<4x8x8xbf16>, vector<4x8x8xbf16>, vector<4x8x8xf32> -> vector<4x8x8xf32>
    "tpu.trace_stop"() : () -> ()
    %106 = tpu.transpose %105, [1, 0, 2] : vector<4x8x8xf32> -> vector<8x4x8xf32>
    %107 = vector.shape_cast %106 : vector<8x4x8xf32> to vector<8x32xf32>
    %108 = arith.truncf %107 : vector<8x32xf32> to vector<8x32xbf16>
    %cst_53 = arith.constant dense<0.000000e+00> : vector<8x32xf32>
    %109 = tpu.matmul %108, %79, %cst_53 {dimension_numbers = #tpu.dot_dimension_numbers<[1], [0], [0], [1], [0, 0, 1, 1], [], []>} : vector<8x32xbf16>, vector<32x32xbf16>, vector<8x32xf32> -> vector<8x32xf32>
    %c0_54 = arith.constant 0 : index
    %c0_55 = arith.constant 0 : index
    %110 = vector.load %arg15[%c0_54, %c0_55] : memref<1x32xf32, #tpu.memory_space<vmem>>, vector<1x32xf32>
    %c0_56 = arith.constant 0 : index
    %c0_57 = arith.constant 0 : index
    %111 = vector.load %arg16[%c0_56, %c0_57] : memref<1x32xf32, #tpu.memory_space<vmem>>, vector<1x32xf32>
    %112 = arith.addf %109, %69 : vector<8x32xf32>
    %cst_58 = arith.constant dense<0.000000e+00> : vector<8xf32>
    %113 = vector.multi_reduction <add>, %112, %cst_58 [1] : vector<8x32xf32> to vector<8xf32>
    %114 = vector.shape_cast %113 : vector<8xf32> to vector<8x1xf32>
    %cst_59 = arith.constant 3.200000e+01 : f32
    %115 = vector.broadcast %cst_59 : f32 to vector<8x1xf32>
    %116 = arith.divf %114, %115 : vector<8x1xf32>
    %117 = vector.broadcast %116 : vector<8x1xf32> to vector<8x32xf32>
    %118 = arith.subf %112, %117 : vector<8x32xf32>
    %119 = arith.mulf %118, %118 : vector<8x32xf32>
    %cst_60 = arith.constant dense<0.000000e+00> : vector<8xf32>
    %120 = vector.multi_reduction <add>, %119, %cst_60 [1] : vector<8x32xf32> to vector<8xf32>
    %121 = vector.shape_cast %120 : vector<8xf32> to vector<8x1xf32>
    %cst_61 = arith.constant 3.200000e+01 : f32
    %122 = vector.broadcast %cst_61 : f32 to vector<8x1xf32>
    %123 = arith.divf %121, %122 : vector<8x1xf32>
    %124 = vector.broadcast %116 : vector<8x1xf32> to vector<8x32xf32>
    %125 = arith.subf %112, %124 : vector<8x32xf32>
    %cst_62 = arith.constant 9.99999996E-13 : f32
    %126 = vector.broadcast %cst_62 : f32 to vector<8x1xf32>
    %127 = arith.addf %123, %126 : vector<8x1xf32>
    %128 = math.rsqrt %127 : vector<8x1xf32>
    %129 = vector.broadcast %128 : vector<8x1xf32> to vector<8x32xf32>
    %130 = arith.mulf %125, %129 : vector<8x32xf32>
    %131 = vector.broadcast %110 : vector<1x32xf32> to vector<8x32xf32>
    %132 = arith.mulf %130, %131 : vector<8x32xf32>
    %133 = vector.broadcast %111 : vector<1x32xf32> to vector<8x32xf32>
    %134 = arith.addf %132, %133 : vector<8x32xf32>
    %135 = arith.truncf %134 : vector<8x32xf32> to vector<8x32xbf16>
    %c0_63 = arith.constant 0 : index
    %c0_64 = arith.constant 0 : index
    %136 = vector.load %arg17[%c0_63, %c0_64] : memref<32x64xbf16, #tpu.memory_space<vmem>>, vector<32x64xbf16>
    %cst_65 = arith.constant dense<0.000000e+00> : vector<8x64xf32>
    %137 = tpu.matmul %135, %136, %cst_65 {dimension_numbers = #tpu.dot_dimension_numbers<[1], [0], [0], [1], [0, 0, 1, 1], [], []>} : vector<8x32xbf16>, vector<32x64xbf16>, vector<8x64xf32> -> vector<8x64xf32>
    %c0_66 = arith.constant 0 : index
    %c0_67 = arith.constant 0 : index
    %138 = vector.load %arg18[%c0_66, %c0_67] : memref<1x64xf32, #tpu.memory_space<vmem>>, vector<1x64xf32>
    %139 = vector.broadcast %138 : vector<1x64xf32> to vector<8x64xf32>
    %140 = arith.addf %137, %139 : vector<8x64xf32>
    %cst_68 = arith.constant 0.000000e+00 : f32
    %141 = vector.broadcast %cst_68 : f32 to vector<8x64xf32>
    %142 = arith.maximumf %140, %141 : vector<8x64xf32>
    %143 = arith.truncf %142 : vector<8x64xf32> to vector<8x64xbf16>
    %c0_69 = arith.constant 0 : index
    %c0_70 = arith.constant 0 : index
    %144 = vector.load %arg19[%c0_69, %c0_70] : memref<64x32xbf16, #tpu.memory_space<vmem>>, vector<64x32xbf16>
    %cst_71 = arith.constant dense<0.000000e+00> : vector<8x32xf32>
    %145 = tpu.matmul %143, %144, %cst_71 {dimension_numbers = #tpu.dot_dimension_numbers<[1], [0], [0], [1], [0, 0, 1, 1], [], []>} : vector<8x64xbf16>, vector<64x32xbf16>, vector<8x32xf32> -> vector<8x32xf32>
    %c0_72 = arith.constant 0 : index
    %c0_73 = arith.constant 0 : index
    %146 = vector.load %arg20[%c0_72, %c0_73] : memref<1x32xf32, #tpu.memory_space<vmem>>, vector<1x32xf32>
    %147 = vector.broadcast %146 : vector<1x32xf32> to vector<8x32xf32>
    %148 = arith.addf %145, %147 : vector<8x32xf32>
    %c0_74 = arith.constant 0 : index
    %c0_75 = arith.constant 0 : index
    %149 = vector.load %arg21[%c0_74, %c0_75] : memref<1x32xf32, #tpu.memory_space<vmem>>, vector<1x32xf32>
    %c0_76 = arith.constant 0 : index
    %c0_77 = arith.constant 0 : index
    %150 = vector.load %arg22[%c0_76, %c0_77] : memref<1x32xf32, #tpu.memory_space<vmem>>, vector<1x32xf32>
    %151 = arith.addf %148, %134 : vector<8x32xf32>
    %cst_78 = arith.constant dense<0.000000e+00> : vector<8xf32>
    %152 = vector.multi_reduction <add>, %151, %cst_78 [1] : vector<8x32xf32> to vector<8xf32>
    %153 = vector.shape_cast %152 : vector<8xf32> to vector<8x1xf32>
    %cst_79 = arith.constant 3.200000e+01 : f32
    %154 = vector.broadcast %cst_79 : f32 to vector<8x1xf32>
    %155 = arith.divf %153, %154 : vector<8x1xf32>
    %156 = vector.broadcast %155 : vector<8x1xf32> to vector<8x32xf32>
    %157 = arith.subf %151, %156 : vector<8x32xf32>
    %158 = arith.mulf %157, %157 : vector<8x32xf32>
    %cst_80 = arith.constant dense<0.000000e+00> : vector<8xf32>
    %159 = vector.multi_reduction <add>, %158, %cst_80 [1] : vector<8x32xf32> to vector<8xf32>
    %160 = vector.shape_cast %159 : vector<8xf32> to vector<8x1xf32>
    %cst_81 = arith.constant 3.200000e+01 : f32
    %161 = vector.broadcast %cst_81 : f32 to vector<8x1xf32>
    %162 = arith.divf %160, %161 : vector<8x1xf32>
    %163 = vector.broadcast %155 : vector<8x1xf32> to vector<8x32xf32>
    %164 = arith.subf %151, %163 : vector<8x32xf32>
    %cst_82 = arith.constant 9.99999996E-13 : f32
    %165 = vector.broadcast %cst_82 : f32 to vector<8x1xf32>
    %166 = arith.addf %162, %165 : vector<8x1xf32>
    %167 = math.rsqrt %166 : vector<8x1xf32>
    %168 = vector.broadcast %167 : vector<8x1xf32> to vector<8x32xf32>
    %169 = arith.mulf %164, %168 : vector<8x32xf32>
    %170 = vector.broadcast %149 : vector<1x32xf32> to vector<8x32xf32>
    %171 = arith.mulf %169, %170 : vector<8x32xf32>
    %172 = vector.broadcast %150 : vector<1x32xf32> to vector<8x32xf32>
    %173 = arith.addf %171, %172 : vector<8x32xf32>
    %c0_83 = arith.constant 0 : index
    %c0_84 = arith.constant 0 : index
    %c0_85 = arith.constant 0 : index
    %174 = vector.load %arg23[%c0_83, %c0_84, %c0_85] : memref<1x8x32xf32, #tpu.memory_space<vmem>>, vector<1x8x32xf32>
    %175 = vector.shape_cast %174 : vector<1x8x32xf32> to vector<8x32xf32>
    %176 = vector.shape_cast %173 : vector<8x32xf32> to vector<1x8x32xf32>
    tpu.vector_store %arg23[%c0_83, %c0_84, %c0_85], %176 {strides = array<i32>} : memref<1x8x32xf32, #tpu.memory_space<vmem>>, vector<1x8x32xf32>,
    return
  }
  func.func @transform_0(%arg0: i32, %arg1: i32) -> (i32, i32, i32) {
    %c0_i32 = arith.constant 0 : i32
    %c0_i32_0 = arith.constant 0 : i32
    return %arg0, %arg1, %c0_i32 : i32, i32, i32
  }
  func.func @transform_1(%arg0: i32, %arg1: i32) -> (i32, i32, i32) {
    %c0_i32 = arith.constant 0 : i32
    %c0_i32_0 = arith.constant 0 : i32
    %c0_i32_1 = arith.constant 0 : i32
    return %arg0, %c0_i32, %c0_i32_0 : i32, i32, i32
  }
  func.func @transform_2(%arg0: i32, %arg1: i32) -> (i32, i32, i32) {
    %c0_i32 = arith.constant 0 : i32
    %c0_i32_0 = arith.constant 0 : i32
    %c0_i32_1 = arith.constant 0 : i32
    return %arg0, %c0_i32, %c0_i32_0 : i32, i32, i32
  }
  func.func @transform_3(%arg0: i32, %arg1: i32) -> (i32, i32, i32) {
    %c0_i32 = arith.constant 0 : i32
    %c0_i32_0 = arith.constant 0 : i32
    return %arg0, %arg1, %c0_i32 : i32, i32, i32
  }
  func.func @transform_4(%arg0: i32, %arg1: i32) -> (i32, i32, i32) {
    %c0_i32 = arith.constant 0 : i32
    %c0_i32_0 = arith.constant 0 : i32
    %c0_i32_1 = arith.constant 0 : i32
    return %arg0, %c0_i32, %c0_i32_0 : i32, i32, i32
  }
  func.func @transform_5(%arg0: i32, %arg1: i32) -> (i32, i32) {
    %c0_i32 = arith.constant 0 : i32
    %c0_i32_0 = arith.constant 0 : i32
    %c0_i32_1 = arith.constant 0 : i32
    return %c0_i32, %c0_i32_0 : i32, i32
  }
  func.func @transform_6(%arg0: i32, %arg1: i32) -> (i32, i32) {
    %c0_i32 = arith.constant 0 : i32
    %c0_i32_0 = arith.constant 0 : i32
    %c0_i32_1 = arith.constant 0 : i32
    return %c0_i32, %c0_i32_0 : i32, i32
  }
  func.func @transform_7(%arg0: i32, %arg1: i32) -> (i32, i32) {
    %c0_i32 = arith.constant 0 : i32
    %c0_i32_0 = arith.constant 0 : i32
    %c0_i32_1 = arith.constant 0 : i32
    return %c0_i32, %c0_i32_0 : i32, i32
  }
  func.func @transform_8(%arg0: i32, %arg1: i32) -> (i32, i32) {
    %c0_i32 = arith.constant 0 : i32
    %c0_i32_0 = arith.constant 0 : i32
    %c0_i32_1 = arith.constant 0 : i32
    return %c0_i32, %c0_i32_0 : i32, i32
  }
  func.func @transform_9(%arg0: i32, %arg1: i32) -> (i32, i32) {
    %c0_i32 = arith.constant 0 : i32
    %c0_i32_0 = arith.constant 0 : i32
    %c0_i32_1 = arith.constant 0 : i32
    return %c0_i32, %c0_i32_0 : i32, i32
  }
  func.func @transform_10(%arg0: i32, %arg1: i32) -> (i32, i32) {
    %c0_i32 = arith.constant 0 : i32
    %c0_i32_0 = arith.constant 0 : i32
    %c0_i32_1 = arith.constant 0 : i32
    return %c0_i32, %c0_i32_0 : i32, i32
  }
  func.func @transform_11(%arg0: i32, %arg1: i32) -> (i32, i32) {
    %c0_i32 = arith.constant 0 : i32
    %c0_i32_0 = arith.constant 0 : i32
    %c0_i32_1 = arith.constant 0 : i32
    return %c0_i32, %c0_i32_0 : i32, i32
  }
  func.func @transform_12(%arg0: i32, %arg1: i32) -> (i32, i32) {
    %c0_i32 = arith.constant 0 : i32
    %c0_i32_0 = arith.constant 0 : i32
    %c0_i32_1 = arith.constant 0 : i32
    return %c0_i32, %c0_i32_0 : i32, i32
  }
  func.func @transform_13(%arg0: i32, %arg1: i32) -> (i32, i32) {
    %c0_i32 = arith.constant 0 : i32
    %c0_i32_0 = arith.constant 0 : i32
    %c0_i32_1 = arith.constant 0 : i32
    return %c0_i32, %c0_i32_0 : i32, i32
  }
  func.func @transform_14(%arg0: i32, %arg1: i32) -> (i32, i32) {
    %c0_i32 = arith.constant 0 : i32
    %c0_i32_0 = arith.constant 0 : i32
    %c0_i32_1 = arith.constant 0 : i32
    return %c0_i32, %c0_i32_0 : i32, i32
  }
  func.func @transform_15(%arg0: i32, %arg1: i32) -> (i32, i32) {
    %c0_i32 = arith.constant 0 : i32
    %c0_i32_0 = arith.constant 0 : i32
    %c0_i32_1 = arith.constant 0 : i32
    return %c0_i32, %c0_i32_0 : i32, i32
  }
  func.func @transform_16(%arg0: i32, %arg1: i32) -> (i32, i32) {
    %c0_i32 = arith.constant 0 : i32
    %c0_i32_0 = arith.constant 0 : i32
    %c0_i32_1 = arith.constant 0 : i32
    return %c0_i32, %c0_i32_0 : i32, i32
  }
  func.func @transform_17(%arg0: i32, %arg1: i32) -> (i32, i32) {
    %c0_i32 = arith.constant 0 : i32
    %c0_i32_0 = arith.constant 0 : i32
    %c0_i32_1 = arith.constant 0 : i32
    return %c0_i32, %c0_i32_0 : i32, i32
  }
  func.func @transform_18(%arg0: i32, %arg1: i32) -> (i32, i32) {
    %c0_i32 = arith.constant 0 : i32
    %c0_i32_0 = arith.constant 0 : i32
    %c0_i32_1 = arith.constant 0 : i32
    return %c0_i32, %c0_i32_0 : i32, i32
  }
  func.func @transform_19(%arg0: i32, %arg1: i32) -> (i32, i32) {
    %c0_i32 = arith.constant 0 : i32
    %c0_i32_0 = arith.constant 0 : i32
    %c0_i32_1 = arith.constant 0 : i32
    return %c0_i32, %c0_i32_0 : i32, i32
  }
  func.func @transform_20(%arg0: i32, %arg1: i32) -> (i32, i32) {
    %c0_i32 = arith.constant 0 : i32
    %c0_i32_0 = arith.constant 0 : i32
    %c0_i32_1 = arith.constant 0 : i32
    return %c0_i32, %c0_i32_0 : i32, i32
  }
  func.func @transform_21(%arg0: i32, %arg1: i32) -> (i32, i32, i32) {
    %c0_i32 = arith.constant 0 : i32
    %c0_i32_0 = arith.constant 0 : i32
    return %arg0, %arg1, %c0_i32 : i32, i32, i32
  }
  func.func @transform_22(%arg0: i32, %arg1: i32) -> (i32, i32, i32, i32) {
    %c0_i32 = arith.constant 0 : i32
    %c0_i32_0 = arith.constant 0 : i32
    %c0_i32_1 = arith.constant 0 : i32
    return %arg0, %c0_i32, %arg1, %c0_i32_0 : i32, i32, i32, i32
  }
  func.func @transform_23(%arg0: i32, %arg1: i32) -> (i32, i32, i32, i32) {
    %c0_i32 = arith.constant 0 : i32
    %c0_i32_0 = arith.constant 0 : i32
    %c0_i32_1 = arith.constant 0 : i32
    return %arg0, %c0_i32, %arg1, %c0_i32_0 : i32, i32, i32, i32
  }
}

</mosaic_0001>

<bundles_post_ra>
// kernel: decoder_forward.3
= control target key start
LH: loop header
LB: loop body
LE: loop exit
PB: predicated region body
PF: predicated region fallthrough
CT: control target
= control target key end

     0   :  { %s5172_s0 = inlined_call_operand.vmem [shape: f32[2,8,32], index: 0, kind: input, shape index: {}, may-alias: {0,1}]   ;;  %s5173_s1 = inlined_call_operand.vmem [shape: f32[2,8,32], index: 1, kind: input, shape index: {}, may-alias: {0,1}]   ;;  %s5174_s2 = inlined_call_operand.vmem [shape: f32[2,8,32], index: 2, kind: input, shape index: {}]   ;;  %s5175_s3 = inlined_call_operand.vmem [shape: f32[2,8,8], index: 3, kind: input, shape index: {}]   ;;  %s5176_s4 = inlined_call_operand.vmem [shape: f32[2,1,8], index: 4, kind: input, shape index: {}]   ;;  %s5177_s5 = inlined_call_operand.vmem [shape: bf16[32,32], index: 5, kind: input, shape index: {}]   ;;  %s5178_s6 = inlined_call_operand.vmem [shape: bf16[32,64], index: 6, kind: input, shape index: {}]   ;;  %s5179_s7 = inlined_call_operand.vmem [shape: bf16[32,32], index: 7, kind: input, shape index: {}]   ;;  %s5180_s8 = inlined_call_operand.vmem [shape: f32[1,32], index: 8, kind: input, shape index: {}]   ;;  %s5181_s9 = inlined_call_operand.vmem [shape: f32[1,32], index: 9, kind: input, shape index: {}]   ;;  %s5182_s10 = inlined_call_operand.vmem [shape: bf16[32,32], index: 10, kind: input, shape index: {}]   ;;  %s5183_s11 = inlined_call_operand.vmem [shape: bf16[32,64], index: 11, kind: input, shape index: {}]   ;;  %s5184_s12 = inlined_call_operand.vmem [shape: bf16[32,32], index: 12, kind: input, shape index: {}]   ;;  %s5185_s13 = inlined_call_operand.vmem [shape: f32[1,32], index: 13, kind: input, shape index: {}]   ;;  %s5186_s14 = inlined_call_operand.vmem [shape: f32[1,32], index: 14, kind: input, shape index: {}]   ;;  %s5187_s15 = inlined_call_operand.vmem [shape: bf16[32,64], index: 15, kind: input, shape index: {}]   ;;  %s5188_s16 = inlined_call_operand.vmem [shape: f32[1,64], index: 16, kind: input, shape index: {}]   ;;  %s5189_s17 = inlined_call_operand.vmem [shape: bf16[64,32], index: 17, kind: input, shape index: {}]   ;;  %s5190_s18 = inlined_call_operand.vmem [shape: f32[1,32], index: 18, kind: input, shape index: {}]   ;;  %s5191_s19 = inlined_call_operand.vmem [shape: f32[1,32], index: 19, kind: input, shape index: {}]   ;;  %s5192_s20 = inlined_call_operand.vmem [shape: f32[1,32], index: 20, kind: input, shape index: {}]   ;;  %s5193_s21 = inlined_call_operand.hbm [shape: f32[2,8,32], index: 21, kind: output, shape index: {0}]   ;;  %s5194_s22 = inlined_call_operand.hbm [shape: f32[2,4,8,8], index: 22, kind: output, shape index: {1}]   ;;  %s5195_s23 = inlined_call_operand.hbm [shape: f32[2,4,8,8], index: 23, kind: output, shape index: {2}]  }
   0x1   :  { %5213 = sst [smem:[#allocation17_spill]] %s5172_s0 }
   0x2   :  { %5214 = sst [smem:[#allocation18_spill]] %s5173_s1 }
   0x3   :  { %5215 = sst [smem:[#allocation19_spill]] %s5174_s2 }
   0x4   :  { %5216 = sst [smem:[#allocation20_spill]] %s5175_s3 }
   0x5   :  { %5217 = sst [smem:[#allocation21_spill]] %s5176_s4 }
   0x6   :  { %5218 = sst [smem:[#allocation22_spill]] %s5177_s5 }
   0x7   :  { %5219 = sst [smem:[#allocation23_spill]] %s5178_s6 }
   0x8   :  { %5220 = sst [smem:[#allocation24_spill]] %s5179_s7 }
   0x9   :  { %5221 = sst [smem:[#allocation25_spill]] %s5180_s8 }
   0xa   :  { %5222 = sst [smem:[#allocation26_spill]] %s5181_s9 }
   0xb   :  { %5223 = sst [smem:[#allocation27_spill]] %s5182_s10 }
   0xc   :  { %5224 = sst [smem:[#allocation28_spill]] %s5183_s11 }
   0xd   :  { %5225 = sst [smem:[#allocation29_spill]] %s5184_s12 }
   0xe   :  { %5226 = sst [smem:[#allocation30_spill]] %s5191_s19 }
   0xf   :  { %5227 = sst [smem:[#allocation31_spill]] %s5192_s20 }
  0x10   :  { %5228 = sst [smem:[#allocation32_spill]] %s5193_s21 }
  0x11   :  { %5229 = sst [smem:[#allocation33_spill]] %s5195_s23 }
  0x12   :  { %29 = vsyncpa [#allocation5], 0 }
  0x13   :  { %31 = vsyncpa [#allocation5 + $0x1], 0 }
  0x14   :  { %32 = vsyncpa [#allocation7], 0 }
  0x15   :  { %34 = vsyncpa [#allocation7 + $0x1], 0  ;;  %s4461_s4 = smov 0   ;;  %s4463_s30 = smov 0  }
  0x16   :  { %s4465_s24 = smov 0   ;;  %s4467_s25 = smov 0  }
  0x17   :  { %s4469_s5 = smov 0   ;;  %s4471_s1 = smov 0  }
  0x18 LB: > { %5230 = sst [smem:[#allocation11_spill]] %s4303_s4  ;;  %s5199_s26 = sadd.s32 4294967295, %s4323_s1   ;;  %s4323_s1 = sphi %s4471_s1, %s40_s1   ;;  %s4319_s5 = sphi %s4469_s5, %s5268_s5   ;;  %s4315_s25 = sphi %s4467_s25, %s5267_s25   ;;  %s4311_s24 = sphi %s4465_s24, %s5266_s24   ;;  %s4307_s30 = sphi %s4463_s30, %s5270_s30   ;;  %s4303_s4 = sphi %s4461_s4, %s5269_s4  }
  0x19   : > { %5231 = sst [smem:[#allocation12_spill]] %s4311_s24  ;;  %s5202_s2 = sadd.s32 4294967294, %s4323_s1  }
  0x1a   : > { %5232 = sst [smem:[#allocation13_spill]] %s4319_s5  ;;  %s52_s6 = sadd.s32 1, %s4319_s5 }
  0x1b   : > { %s531_s27 = sadd.s32 1, %s4311_s24  ;;  %p54_p0 = scmp.ge.s32.totalorder %s52_s6, 2 }
  0x1c   : > { %p541_p1 = scmp.ne.s32.totalorder %s4311_s24, %s4307_s30  ;;  %p542_p2 = scmp.eq.s32.totalorder %s5199_s26, 1 }
  0x1d   : > { %p547_p3 = scmp.ne.s32.totalorder %s4307_s30, %s4303_s4  ;;  %s5272_s6 = smov (%p54_p0, %s52_s6), 0 }
  0x1e   : > { %5233 = sst [smem:[#allocation14_spill]] %s5272_s6  ;;  %p4503_p4 = por %p542_p2, %p541_p1 }
  0x1f   : > { %p548_p5 = scmp.eq.s32.totalorder %s5202_s2, 1  ;;  %s526_s28 = ssub.s32 %s4319_s5, %s5272_s6 }
  0x20   : > { %p3749_p6 = scmp.ge.s32.totalorder %s4323_s1, 1  ;;  %p529_p7 = scmp.eq.s32.totalorder %s526_s28, 0 }
  0x21   : > { %p4512_p8 = por %p548_p5, %p547_p3  ;;  %p710_p9 = scmp.lt.s32.totalorder %s4323_s1, 3 }
  0x22   : > { %s4518_s3 = scalar_select %p529_p7, %s4311_s24, %s531_s27  }
  0x23   : > { %s5235_s29 = scalar_select %p4512_p8, 1, 0 }
  0x24   : > { %5237 = sst [smem:[#allocation16_spill]] %s4518_s3  ;;  %p711_p10 = pnand %p3749_p6, %p710_p9 }
  0x25   : > { %5236 = sst [smem:[#allocation15_spill]] %s5235_s29  ;;  %p804_p11 = scmp.lt.s32.totalorder (!%p711_p10), %s4315_s25, 1 }
  0x26   : > { %714 = sbr.rel (%p711_p10) target bundleno = 4256 (0x10a0), region = 104  ;;  %s5238_s4 = sld [smem:[#allocation23_spill]] (!%p711_p10) }
  0x27   : > { %s5240_s0 = sld [smem:[#allocation18_spill]] (!%p711_p10)  ;;  %s4327_s23 = smov (!%p711_p10), 104  }
  0x28   : > { %s5241_s5 = sld [smem:[#allocation17_spill]] (!%p711_p10)  ;;  %s4328_s24 = smov (!%p711_p10), 120  }
  0x29   : > { %s5242_s20 = sld [smem:[#allocation22_spill]] (!%p711_p10)  ;;  %s4703_s6 = sand.u32 (!%p711_p10), 1, %s4307_s30  }
  0x2a   : > { %s5243_s11 = sld [smem:[#allocation28_spill]] (!%p711_p10)  ;;  %s3751_s29 = sshll.u32 (!%p711_p10), %s4703_s6, 5 }
  0x2b   : > { %v4325_v1 = vmov 0.0   ;;  %vm4326_vm0 = vmmov 0   ;;  %vm853_vm1 = vcmask 261120   ;;  %vm898_vm2 = vcmask 519168   ;;  %s5244_s27 = sld [smem:[#allocation19_spill]] }
  0x2c   : > { %s5239_s21 = smov %s5238_s4  ;;  %v4135_v0 = vld [vmem:[%s5238_s4 + $0x8] sm:$0xff]   ;;  %3893 = vmatprep.subr.bf16.mxu0 %v4325_v1  ;;  %3901 = vmatprep.subr.bf16.mxu1 %v4325_v1  ;;  %v4330_v23 = vmov 1983009808   ;;  %v1046_v25 = vlaneseq  ;;  %v4331_v28 = vmov 1934713408   ;;  %vm1480_vm3 = vcmask 64512  }
  0x2d   : > { %3894 = vmatpush3.bf16.msra.mxu0 %v4135_v0  ;;  %v4136_v2 = vld [vmem:[%s5239_s21] sm:$0xff]   ;;  %3897 = vmatprep.mubr.msk.bf16.mxu0 %vm4326_vm0, %v4325_v1  ;;  %s4535_s4 = scalar_select %p804_p11, %s4315_s25, 1  ;;  %v1044_v24 = vunpack.c.l.s4 %v4330_v23  ;;  %v1076_v29 = vunpack.c.l.s4 %v4331_v28  ;;  %vm1720_vm4 = vcmask 1043456   ;;  %vm2051_vm5 = vcmask 130048  }
  0x2e   : > { %3895 = vmatprep.subr.bf16.mxu0 %v4325_v1  ;;  %3905 = vmatprep.mubr.msk.bf16.mxu1 %vm4326_vm0, %v4325_v1  ;;  %v4599_v27 = vshrl.u32 %v1046_v25, 7  ;;  %s5245_s21 = sld [smem:[#allocation20_spill]]  ;;  %vm2053_vm6 = vcmask 195584   ;;  %vm3427_vm7 = vcmask 523264  }
  0x2f   : > { %s4538_s26 = sshll.u32 %s4535_s4, 3  ;;  %v4137_v4 = vld [vmem:[%s5242_s20 + $0x8] sm:$0xff]   ;;  %v4138_v6 = vld [vmem:[%s5242_s20] sm:$0xff]   ;;  %v1045_v26 = vunpack.c.0.s8 %v1044_v24  ;;  %v1077_v36 = vunpack.c.0.s8 %v1076_v29  ;;  %s5247_s10 = sld [smem:[#allocation27_spill]] }
  0x30   : > { %s814_s28 = scalar_lea.vmem %s5240_s0, %s4538_s26  ;;  %s810_s3 = scalar_lea.vmem %s5241_s5, %s4538_s26  ;;  %v4139_v15 = vld [vmem:[%s5243_s11 + $0x8] sm:$0xff]   ;;  %v4140_v19 = vld [vmem:[%s5243_s11] sm:$0xff]  }
  0x31   : > { %3896 = vmatpush3.bf16.msra.mxu0 %v4136_v2  ;;  %v835_v3 = vld [vmem:[%s814_s28] sm:$0xff]  ;;  %3902 = vmatpush3.bf16.msra.mxu1 %v4139_v15  ;;  %s818_s2 = scalar_lea.vmem %s5244_s27, %s4538_s26  ;;  %s4329_s0 = smov 112   ;;  %v4608_v34 = vsub.s32 %v1045_v26, %v4599_v27  ;;  %v4620_v44 = vsub.s32 %v1077_v36, %v4599_v27 }
  0x32   : > { %3909 = vmatprep.subr.bf16.mxu0 %v4325_v1  ;;  %v836_v5 = vpack.c.bf16 %v835_v3, %v835_v3  ;;  %v4555_v7 = vld [vmem:[%s810_s3] sm:$0xff]  ;;  %3903 = vmatprep.subr.bf16.mxu1 %v4325_v1  ;;  %s4716_s3 = scalar_lea.vmem [#allocation6], %s3751_s29  ;;  %s5246_s28 = sld [smem:[#allocation24_spill]] }
  0x33   : > { %v963_v8 = vpack.c.bf16 %v4555_v7, %v4555_v7  ;;  %v900_v21 = vld [vmem:[%s818_s2] sm:$0xff]  ;;  %s5210_s27 = smov 8   ;;  %s5209_s2 = smov 24  }
  0x34   : > { %3898 = vmatmul.mubr.msk.bf16.vlgmr.msra.gmra.mxu0 %vm853_vm1, %v836_v5  ;;  %v901_v22 = vpack.c.bf16 %v900_v21, %v900_v21  ;;  %s825_s5 = scalar_lea.vmem %s5245_s21, %s4538_s26  ;;  %s4333_s26 = smov 96  }
  0x35   : > { %3910 = vmatpush3.bf16.msra.mxu0 %v4137_v4  ;;  %3913 = vmatprep.mubr.msk.bf16.mxu0 %vm4326_vm0, %v4325_v1  ;;  %s5248_s8 = sld [smem:[#allocation25_spill]]  ;;  %s5252_s21 = smov 8  }
  0x36   : > { %3911 = vmatprep.subr.bf16.mxu0 %v4325_v1  ;;  %3904 = vmatpush3.bf16.msra.mxu1 %v4140_v19  ;;  %s5249_s9 = sld [smem:[#allocation26_spill]] }
  0x37   : > { %3917 = vmatprep.subr.bf16.mxu1 %v4325_v1  ;;  %s5251_s12 = sld [smem:[#allocation29_spill]] }
  0x39   : > { %3912 = vmatpush3.bf16.msra.mxu0 %v4138_v6  ;;  %3906 = vmatmul.mubr.msk.bf16.vlgmr.msra.gmra.mxu1 %vm853_vm1, %v901_v22 }
  0x3a   : > { %3923 = vmatprep.subr.bf16.mxu0 %v4325_v1  ;;  %3919 = vmatprep.mubr.msk.bf16.mxu1 %vm4326_vm0, %v4325_v1 }
  0x3c   : > { %3914 = vmatmul.mubr.msk.bf16.vlgmr.msra.gmra.mxu0 %vm853_vm1, %v963_v8 }
  0x3d   : > { %3925 = vmatprep.mubr.msk.bf16.mxu0 %vm4326_vm0, %v4325_v1 }
  0xf4   : > { %v891_v9 = vpop.f32.mrf.mxu0 }
  0xf5   : > { %v897_v10 = vpack.c.bf16 %v891_v9, %v891_v9 }
  0xf6   : > { %v3899_v11 = vpop.f32.mrf.mxu0 }
  0xf7   : > { %899 = vst.msk [vmem:[#allocation2] sm:$0xf] %vm898_vm2, %v897_v10 }
  0xf8   : > { %v894_v12 = vpop.f32.mrf.mxu0 }
  0xfa   : > { %v3900_v13 = vpop.f32.mrf.mxu0 }
  0xfc   : > { %v4568_v14 = vpop.f32.mrf.mxu0 }
  0xfe   : > { %v4573_v16 = vld [vmem:[#allocation2] sm:$0xf]  ;;  %v3915_v17 = vpop.f32.mrf.mxu0 }
  0xff   : > { %1186 = vrot.lane.b32.xlu1 %v4573_v16, %s4327_s23  ;;  %1182 = vrot.lane.b32.xlu0 %v4573_v16, %s4328_s24  ;;  %v1191_v33 = vshrl.u32 %v4573_v16, 16 }
 0x100   : > { %v1021_v18 = vpop.f32.mrf.mxu0 }
 0x102   : > { %v3916_v20 = vpop.f32.mrf.mxu0 }
 0x103   : > { %1184 = vrot.lane.b32.xlu0 %v4573_v16, %s4329_s0  ;;  %1032 = vrot.lane.b32.xlu1 %v4568_v14, %s4328_s24 }
 0x107   : > { %1035 = vrot.lane.b32.xlu0 %v4568_v14, %s4329_s0  ;;  %1038 = vrot.lane.b32.xlu1 %v4568_v14, %s4327_s23 }
 0x171   : > { %v4601_v30 = vpop.permute.xlu1 %1186  ;;  %v4603_v31 = vpop.permute.xlu0 %1182 }
 0x172   : > { %v1192_v32 = vshrl.u32 %v4603_v31, 16  ;;  %v1190_v35 = vpack.i.b16 %v4603_v31, %v4573_v16  ;;  %v1198_v40 = vshrl.u32 %v4601_v30, 16 }
 0x174   : > { %v1193_v37 = vpack.i.b16 %v1192_v32, %v1191_v33  ;;  %v1207_v43 = vrot.slane %v1190_v35, %v4608_v34 }
 0x175   : > { %v4612_v38 = vpop.permute.xlu0 %1184  ;;  %v1033_v39 = vpop.permute.xlu1 %1032 }
 0x176   : > { %v1196_v41 = vpack.i.b16 %v4601_v30, %v4612_v38  ;;  %v1197_v42 = vshrl.u32 %v4612_v38, 16  ;;  %v1241_v47 = vrot.slane %v1193_v37, %v4608_v34 }
 0x178   : > { %v1199_v45 = vpack.i.b16 %v1198_v40, %v1197_v42  ;;  %v1215_v46 = vrot.slane %v1196_v41, %v4608_v34 }
 0x179   : > { %v1036_v48 = vpop.permute.xlu0 %1035  ;;  %v1039_v49 = vpop.permute.xlu1 %1038 }
 0x17a   : > { %v1216_v50 = vcombine.low %v1207_v43, %v1215_v46  ;;  %v1217_v51 = vcombine.high %v1207_v43, %v1215_v46  ;;  %v1249_v52 = vrot.slane %v1199_v45, %v4608_v34  ;;  %v1041_v53 = vcombine.low %v4568_v14, %v1036_v48 }
 0x17b   : > { %v1042_v54 = vcombine.high %v4568_v14, %v1036_v48  ;;  %v1057_v55 = vcombine.low %v1033_v39, %v1039_v49  ;;  %v1058_v56 = vcombine.high %v1033_v39, %v1039_v49  ;;  %v4332_v45 = vmov 0  }
 0x17c   : > { %v1224_v57 = vrot.slane %v1216_v50, %v4620_v44  ;;  %v1231_v58 = vrot.slane %v1217_v51, %v4620_v44  ;;  %v1250_v59 = vcombine.low %v1241_v47, %v1249_v52  ;;  %v1251_v60 = vcombine.high %v1241_v47, %v1249_v52 }
 0x17d   : > { %v1049_v61 = vrot.slane %v1041_v53, %v4608_v34  ;;  %v1056_v62 = vrot.slane %v1042_v54, %v4608_v34  ;;  %v1065_v63 = vrot.slane %v1057_v55, %v4608_v34  ;;  %v1072_v0 = vrot.slane %v1058_v56, %v4608_v34 }
 0x17e   : > { %v1258_v2 = vrot.slane %v1250_v59, %v4620_v44  ;;  %v1265_v3 = vrot.slane %v1251_v60, %v4620_v44  ;;  %v1268_v4 = vcombine.low %v1224_v57, %v1231_v58  ;;  %v3768_v5 = vcombine.high %v1224_v57, %v1231_v58 }
 0x17f   : > { %v1073_v6 = vcombine.low %v1049_v61, %v1065_v63  ;;  %v1074_v8 = vcombine.high %v1049_v61, %v1065_v63  ;;  %v1089_v9 = vcombine.low %v1056_v62, %v1072_v0  ;;  %v1090_v10 = vcombine.high %v1056_v62, %v1072_v0 }
 0x180   : > { %v1275_v11 = vrot.slane %v1268_v4, %v4608_v34  ;;  %v1283_v12 = vrot.slane %v3768_v5, %v4608_v34  ;;  %v1293_v13 = vcombine.low %v1258_v2, %v1265_v3  ;;  %v3769_v14 = vcombine.high %v1258_v2, %v1265_v3 }
 0x181   : > { %v1081_v15 = vrot.slane %v1073_v6, %v4620_v44  ;;  %v1088_v17 = vrot.slane %v1074_v8, %v4620_v44  ;;  %v1097_v18 = vrot.slane %v1089_v9, %v4620_v44  ;;  %v1104_v19 = vrot.slane %v1090_v10, %v4620_v44  ;;  %v955_v9 = vpop.f32.mrf.mxu1 }
 0x182   : > { %v1284_v20 = vcombine.low %v1275_v11, %v1283_v12  ;;  %v1300_v21 = vrot.slane %v1293_v13, %v4608_v34  ;;  %v1308_v22 = vrot.slane %v3769_v14, %v4608_v34  ;;  %v961_v10 = vpack.c.bf16 %v955_v9, %v955_v9  ;;  %v1024_v14 = vld [vmem:[%s825_s5] sm:$0xff]  ;;  %s4334_s5 = smov 16  }
 0x183   : > { %v1109_v23 = vcombine.low %v1081_v15, %v1088_v17  ;;  %v3766_v24 = vcombine.high %v1081_v15, %v1088_v17  ;;  %v1125_v25 = vcombine.low %v1097_v18, %v1104_v19  ;;  %v3767_v26 = vcombine.high %v1097_v18, %v1104_v19  ;;  %v3907_v11 = vpop.f32.mrf.mxu1 }
 0x184   : > { %v1291_v28 = vrot.slane %v1284_v20, %v4620_v44  ;;  %v1309_v29 = vcombine.low %v1300_v21, %v1308_v22  ;;  %962 = vst.msk [vmem:[#allocation3] sm:$0xf] %vm898_vm2, %v961_v10  ;;  %v1025_v15 = vmul.f32 -1e+30, %v1024_v14 }
 0x185   : > { %v1116_v32 = vrot.slane %v1109_v23, %v4608_v34  ;;  %v1124_v33 = vrot.slane %v3766_v24, %v4608_v34  ;;  %v1132_v35 = vrot.slane %v1125_v25, %v4608_v34  ;;  %v1140_v36 = vrot.slane %v3767_v26, %v4608_v34  ;;  %v958_v12 = vpop.f32.mrf.mxu1 }
 0x186   : > { %v1316_v37 = vrot.slane %v1309_v29, %v4620_v44  ;;  %v1321_v42 = vshrl.u32 %v1291_v28, 16  ;;  %v1292_v51 = vcombine.high %v1291_v28, %v4332_v45 }
 0x187   : > { %v1141_v39 = vcombine.low %v1116_v32, %v1124_v33  ;;  %v1157_v40 = vcombine.low %v1132_v35, %v1140_v36  ;;  %v1142_v52 = vcombine.high %v1116_v32, %v1124_v33  ;;  %v1158_v53 = vcombine.high %v1132_v35, %v1140_v36  ;;  %v3908_v13 = vpop.f32.mrf.mxu1 }
 0x188   : > { %v1320_v41 = vpack.i.b16 %v1316_v37, %v1291_v28  ;;  %v1322_v43 = vshrl.u32 %v1316_v37, 16  ;;  %v1317_v46 = vcombine.high %v1316_v37, %v4332_v45  ;;  %v1327_v59 = vshrl.u32 %v1292_v51, 16 }
 0x189   : > { %v1149_v47 = vrot.slane %v1141_v39, %v4620_v44  ;;  %v1165_v48 = vrot.slane %v1157_v40, %v4620_v44  ;;  %v1156_v62 = vrot.slane %v1142_v52, %v4620_v44  ;;  %v1172_v63 = vrot.slane %v1158_v53, %v4620_v44 }
 0x18a   : > { %v1485_v49 = vsel %vm1480_vm3, %v1320_v41, 0  ;;  %v1323_v50 = vpack.i.b16 %v1322_v43, %v1321_v42  ;;  %v1328_v56 = vshrl.u32 %v1317_v46, 16  ;;  %v1326_v57 = vpack.i.b16 %v1317_v46, %v1292_v51 }
 0x18b   : > { %3918 = vmatpush3.bf16.xpose.msra.mxu1 %v1485_v49  ;;  %v1173_v55 = vcombine.low %v1149_v47, %v1165_v48  ;;  %v1174_v58 = vcombine.high %v1149_v47, %v1165_v48  ;;  %v1175_v4 = vcombine.low %v1156_v62, %v1172_v63  ;;  %v1176_v5 = vcombine.high %v1156_v62, %v1172_v63 }
 0x18c   : > { %v1531_v54 = vsel %vm1480_vm3, %v1323_v50, 0  ;;  %3929 = vmatprep.subr.bf16.mxu1 %v4325_v1  ;;  %v1329_v61 = vpack.i.b16 %v1328_v56, %v1327_v59  ;;  %v1577_v0 = vsel %vm1480_vm3, %v1326_v57, 0 }
 0x18d   : > { %3924 = vmatpush3.bf16.xpose.msra.mxu0 %v1531_v54  ;;  %v1177_v60 = vpack.c.bf16 %v1173_v55, %v1173_v55  ;;  %v1178_v2 = vpack.c.bf16 %v1174_v58, %v1174_v58  ;;  %v1179_v6 = vpack.c.bf16 %v1175_v4, %v1175_v4  ;;  %v1180_v8 = vpack.c.bf16 %v1176_v5, %v1176_v5 }
 0x18e   : > { %3935 = vmatprep.subr.bf16.mxu0 %v4325_v1  ;;  %v1623_v3 = vsel %vm1480_vm3, %v1329_v61, 0 }
 0x192   : > { %3920 = vmatmul.mubr.msk.bf16.vlgmr.msra.gmra.mxu1 %vm1480_vm3, %v1177_v60 }
 0x193   : > { %3930 = vmatpush3.bf16.xpose.msra.mxu1 %v1577_v0  ;;  %3931 = vmatprep.mubr.msk.bf16.mxu1 %vm4326_vm0, %v4325_v1 }
 0x194   : > { %3926 = vmatmul.mubr.msk.bf16.vlgmr.msra.gmra.mxu0 %vm1480_vm3, %v1178_v2  ;;  %3941 = vmatprep.subr.bf16.mxu1 %v4325_v1 }
 0x195   : > { %3936 = vmatpush3.bf16.xpose.msra.mxu0 %v1623_v3  ;;  %3937 = vmatprep.mubr.msk.bf16.mxu0 %vm4326_vm0, %v4325_v1 }
 0x196   : > { %3947 = vmatprep.subr.bf16.mxu0 %v4325_v1 }
 0x19a   : > { %3932 = vmatmul.mubr.msk.bf16.vlgmr.msra.gmra.mxu1 %vm1480_vm3, %v1179_v6 }
 0x19b   : > { %3943 = vmatprep.mubr.msk.bf16.mxu1 %vm4326_vm0, %v4325_v1 }
 0x19c   : > { %3938 = vmatmul.mubr.msk.bf16.vlgmr.msra.gmra.mxu0 %vm1480_vm3, %v1180_v8 }
 0x19d   : > { %3949 = vmatprep.mubr.msk.bf16.mxu0 %vm4326_vm0, %v4325_v1 }
 0x252   : > { %v1521_v17 = vpop.f32.mrf.mxu1 }
 0x253   : > { %v1522_v18 = vadd.f32 %v1521_v17, %v1025_v15 }
 0x254   : > { %v3921_v19 = vpop.f32.mrf.mxu1  ;;  %v1567_v20 = vpop.f32.mrf.mxu0 }
 0x255   : > { %v1568_v21 = vadd.f32 %v1567_v20, %v1025_v15  ;;  %v1665_v22 = vsel %vm1480_vm3, %v1522_v18, -inf }
 0x256   : > { %1666 = vmax.xlane.f32.xlu0 %v1665_v22  ;;  %v1524_v23 = vpop.f32.mrf.mxu1  ;;  %v3927_v24 = vpop.f32.mrf.mxu0 }
 0x257   : > { %v1668_v25 = vsel %vm1480_vm3, %v1568_v21, -inf }
 0x258   : > { %v3922_v26 = vpop.f32.mrf.mxu1  ;;  %1669 = vmax.xlane.f32.xlu1 %v1668_v25  ;;  %v1570_v28 = vpop.f32.mrf.mxu0 }
 0x25a   : > { %v3928_v29 = vpop.f32.mrf.mxu0  ;;  %v1613_v32 = vpop.f32.mrf.mxu1 }
 0x25b   : > { %v1614_v33 = vadd.f32 %v1613_v32, %v1025_v15 }
 0x25c   : > { %v3933_v35 = vpop.f32.mrf.mxu1  ;;  %v1659_v36 = vpop.f32.mrf.mxu0 }
 0x25d   : > { %v1660_v37 = vadd.f32 %v1659_v36, %v1025_v15  ;;  %v1671_v39 = vsel %vm1480_vm3, %v1614_v33, -inf }
 0x25e   : > { %1672 = vmax.xlane.f32.xlu0 %v1671_v39  ;;  %v1616_v40 = vpop.f32.mrf.mxu1  ;;  %v3939_v41 = vpop.f32.mrf.mxu0 }
 0x25f   : > { %v1674_v46 = vsel %vm1480_vm3, %v1660_v37, -inf }
 0x260   : > { %v3934_v42 = vpop.f32.mrf.mxu1  ;;  %v1662_v43 = vpop.f32.mrf.mxu0 }
 0x262   : > { %1675 = vmax.xlane.f32.xlu0 %v1674_v46  ;;  %v3940_v47 = vpop.f32.mrf.mxu0 }
 0x269   : > { %1330 = vrot.lane.b32.xlu1 %v4573_v16, %s4333_s26 }
 0x2df   : > { %v1667_v48 = vpop.xlane.xlu0 %1666 }
 0x2e0   : > { %v1677_v49 = vsub.f32 %v1522_v18, %v1667_v48 }
 0x2e1   : > { %v1670_v50 = vpop.xlane.xlu1 %1669 }
 0x2e2   : > { %v1681_v51 = vmul.f32 1.442695, %v1677_v49  ;;  %v1678_v52 = vsub.f32 %v1568_v21, %v1670_v50 }
 0x2e4   : > { %4153 = vpow2.f32 %v1681_v51  ;;  %v1683_v53 = vmul.f32 1.442695, %v1678_v52 }
 0x2e6   : > { %4155 = vpow2.f32 %v1683_v53 }
 0x2e7   : > { %v1673_v16 = vpop.xlane.xlu0 %1672 }
 0x2e8   : > { %v1679_v59 = vsub.f32 %v1614_v33, %v1673_v16 }
 0x2ea   : > { %v1685_v61 = vmul.f32 1.442695, %v1679_v59 }
 0x2eb   : > { %v1676_v58 = vpop.xlane.xlu0 %1675 }
 0x2ec   : > { %v1680_v60 = vsub.f32 %v1660_v37, %v1676_v58  ;;  %4157 = vpow2.f32 %v1685_v61 }
 0x2ee   : > { %v1687_v62 = vmul.f32 1.442695, %v1680_v60 }
 0x2f0   : > { %4159 = vpow2.f32 %v1687_v62 }
 0x2f1   : > { %v4154_v54 = vpop.eup %4153 }
 0x2f2   : > { %v1689_v55 = vsel %vm1480_vm3, %v4154_v54, 0.0 }
 0x2f3   : > { %v4156_v56 = vpop.eup %4155  ;;  %1690 = vadd.xlane.f32.xlu1 %v1689_v55 }
 0x2f4   : > { %v1692_v57 = vsel %vm1480_vm3, %v4156_v56, 0.0 }
 0x2f5   : > { %1693 = vadd.xlane.f32.xlu0 %v1692_v57 }
 0x2f9   : > { %v4694_v63 = vpop.eup %4157 }
 0x2fd   : > { %v4696_v0 = vpop.eup %4159 }
 0x304   : > { %1334 = vrot.lane.b32.xlu1 %v4612_v38, %s4333_s26  ;;  %v1695_v38 = vsel %vm1480_vm3, %v4694_v63, 0.0 }
 0x308   : > { %1336 = vrot.lane.b32.xlu1 %v4601_v30, %s4333_s26  ;;  %v1698_v30 = vsel %vm1480_vm3, %v4696_v0, 0.0 }
 0x30b   : > { %1332 = vrot.lane.b32.xlu0 %v4603_v31, %s4333_s26  ;;  %v1331_v31 = vpop.permute.xlu1 %1330 }
 0x30c   : > { %v1341_v6 = vshrl.u32 %v1331_v31, 16 }
 0x32a   : > { %1696 = vadd.xlane.f32.xlu0 %v1695_v38 }
 0x32c   : > { %1699 = vadd.xlane.f32.xlu1 %v1698_v30 }
 0x37c   : > { %v1691_v2 = vpop.xlane.xlu1 %1690 }
 0x37d   : > { %4161 = vrcp.f32 %v1691_v2 }
 0x37e   : > { %v1694_v3 = vpop.xlane.xlu0 %1693 }
 0x37f   : > { %4163 = vrcp.f32 %v1694_v3 }
 0x380   : > { %v1335_v4 = vpop.permute.xlu1 %1334 }
 0x381   : > { %v1347_v11 = vshrl.u32 %v1335_v4, 16 }
 0x382   : > { %v1333_v5 = vpop.permute.xlu0 %1332 }
 0x383   : > { %v1340_v8 = vpack.i.b16 %v1333_v5, %v1331_v31  ;;  %v1342_v9 = vshrl.u32 %v1333_v5, 16 }
 0x384   : > { %v1337_v10 = vpop.permute.xlu1 %1336 }
 0x385   : > { %v1343_v12 = vpack.i.b16 %v1342_v9, %v1341_v6  ;;  %v1346_v13 = vpack.i.b16 %v1337_v10, %v1335_v4  ;;  %v1348_v14 = vshrl.u32 %v1337_v10, 16  ;;  %v1357_v15 = vrot.slane %v1340_v8, %v4608_v34 }
 0x387   : > { %v1349_v17 = vpack.i.b16 %v1348_v14, %v1347_v11  ;;  %v1365_v18 = vrot.slane %v1346_v13, %v4608_v34  ;;  %v1391_v19 = vrot.slane %v1343_v12, %v4608_v34 }
 0x389   : > { %v1366_v20 = vcombine.low %v1357_v15, %v1365_v18  ;;  %v1367_v21 = vcombine.high %v1357_v15, %v1365_v18  ;;  %v1399_v22 = vrot.slane %v1349_v17, %v4608_v34 }
 0x38a   : > { %v4162_v23 = vpop.eup %4161 }
 0x38b   : > { %v1374_v24 = vrot.slane %v1366_v20, %v4620_v44  ;;  %v1381_v25 = vrot.slane %v1367_v21, %v4620_v44  ;;  %v1400_v26 = vcombine.low %v1391_v19, %v1399_v22  ;;  %v1401_v28 = vcombine.high %v1391_v19, %v1399_v22 }
 0x38c   : > { %v4164_v29 = vpop.eup %4163  ;;  %v1705_v32 = vmul.f32 %v4162_v23, %v4154_v54 }
 0x38d   : > { %v1408_v33 = vrot.slane %v1400_v26, %v4620_v44  ;;  %v1415_v35 = vrot.slane %v1401_v28, %v4620_v44  ;;  %v1418_v36 = vcombine.low %v1374_v24, %v1381_v25  ;;  %v3770_v37 = vcombine.high %v1374_v24, %v1381_v25 }
 0x38e   : > { %1709 = vst.msk [vmem:[%s4716_s3] sm:$0xff] %vm1480_vm3, %v1705_v32  ;;  %v1706_v39 = vmul.f32 %v4164_v29, %v4156_v56  ;;  %v1713_v62 = vpack.c.bf16 %v1705_v32, %v1705_v32 }
 0x38f   : > { %v1425_v40 = vrot.slane %v1418_v36, %v4608_v34  ;;  %v1433_v41 = vrot.slane %v3770_v37, %v4608_v34  ;;  %v1443_v42 = vcombine.low %v1408_v33, %v1415_v35  ;;  %v3771_v43 = vcombine.high %v1408_v33, %v1415_v35 }
 0x390   : > { %1710 = vst.msk [vmem:[%s4716_s3 + $0x8] sm:$0xff] %vm1480_vm3, %v1706_v39  ;;  %v1714_v31 = vpack.c.bf16 %v1706_v39, %v1706_v39 }
 0x391   : > { %v1450_v46 = vrot.slane %v1443_v42, %v4608_v34  ;;  %v1458_v47 = vrot.slane %v3771_v43, %v4608_v34  ;;  %v1434_v48 = vcombine.low %v1425_v40, %v1433_v41  ;;  %v4141_v43 = vld [vmem:[%s5246_s28 + $0x8] sm:$0xff]  }
 0x393   : > { %v1441_v49 = vrot.slane %v1434_v48, %v4620_v44  ;;  %v1459_v50 = vcombine.low %v1450_v46, %v1458_v47 }
 0x395   : > { %v1466_v51 = vrot.slane %v1459_v50, %v4620_v44  ;;  %v1442_v52 = vcombine.high %v1441_v49, %v4332_v45  ;;  %v1471_v54 = vshrl.u32 %v1441_v49, 16 }
 0x397   : > { %v1470_v53 = vpack.i.b16 %v1466_v51, %v1441_v49  ;;  %v1472_v55 = vshrl.u32 %v1466_v51, 16  ;;  %v1467_v56 = vcombine.high %v1466_v51, %v4332_v45  ;;  %v1477_v57 = vshrl.u32 %v1442_v52, 16 }
 0x399   : > { %v1722_v16 = vsel %vm1720_vm4, %v1470_v53, 0  ;;  %v1473_v58 = vpack.i.b16 %v1472_v55, %v1471_v54  ;;  %v1476_v59 = vpack.i.b16 %v1467_v56, %v1442_v52  ;;  %v1478_v60 = vshrl.u32 %v1467_v56, 16  ;;  %v4142_v55 = vld [vmem:[%s5246_s28] sm:$0xff]  }
 0x39a   : > { %3942 = vmatpush3.bf16.msra.mxu1 %v1722_v16 }
 0x39b   : > { %v1768_v61 = vsel %vm1720_vm4, %v1473_v58, 0  ;;  %3953 = vmatprep.subr.bf16.mxu1 %v4325_v1  ;;  %v1479_v38 = vpack.i.b16 %v1478_v60, %v1477_v57  ;;  %v1814_v30 = vsel %vm1720_vm4, %v1476_v59, 0 }
 0x39c   : > { %3948 = vmatpush3.bf16.msra.mxu0 %v1768_v61 }
 0x39d   : > { %3944 = vmatmul.mubr.msk.bf16.vlgmr.msra.gmra.mxu1 %vm1480_vm3, %v1713_v62  ;;  %3959 = vmatprep.subr.bf16.mxu0 %v4325_v1  ;;  %v1860_v2 = vsel %vm1720_vm4, %v1479_v38, 0 }
 0x39e   : > { %3954 = vmatpush3.bf16.msra.mxu1 %v1814_v30  ;;  %3955 = vmatprep.mubr.msk.bf16.mxu1 %vm4326_vm0, %v4325_v1 }
 0x39f   : > { %3950 = vmatmul.mubr.msk.bf16.vlgmr.msra.gmra.mxu0 %vm1480_vm3, %v1714_v31  ;;  %3965 = vmatprep.subr.bf16.mxu1 %v4325_v1 }
 0x3a0   : > { %3960 = vmatpush3.bf16.msra.mxu0 %v1860_v2  ;;  %3961 = vmatprep.mubr.msk.bf16.mxu0 %vm4326_vm0, %v4325_v1 }
 0x3a1   : > { %3973 = vmatprep.subr.bf16.mxu0 %v4325_v1 }
 0x3b3   : > { %v1697_v3 = vpop.xlane.xlu0 %1696 }
 0x3b4   : > { %4165 = vrcp.f32 %v1697_v3 }
 0x3b5   : > { %v1700_v4 = vpop.xlane.xlu1 %1699 }
 0x3b6   : > { %4167 = vrcp.f32 %v1700_v4 }
 0x3c1   : > { %v4166_v5 = vpop.eup %4165 }
 0x3c2   : > { %v1707_v6 = vmul.f32 %v4166_v5, %v4694_v63 }
 0x3c3   : > { %v4168_v8 = vpop.eup %4167 }
 0x3c4   : > { %1711 = vst.msk [vmem:[%s4716_s3 + $0x10] sm:$0xff] %vm1480_vm3, %v1707_v6  ;;  %v1715_v9 = vpack.c.bf16 %v1707_v6, %v1707_v6  ;;  %v1708_v10 = vmul.f32 %v4168_v8, %v4696_v0 }
 0x3c6   : > { %3956 = vmatmul.mubr.msk.bf16.vlgmr.msra.gmra.mxu1 %vm1480_vm3, %v1715_v9  ;;  %1712 = vst.msk [vmem:[%s4716_s3 + $0x18] sm:$0xff] %vm1480_vm3, %v1708_v10  ;;  %v1716_v11 = vpack.c.bf16 %v1708_v10, %v1708_v10 }
 0x3c7   : > { %3969 = vmatprep.mubr.msk.bf16.mxu1 %vm4326_vm0, %v4325_v1  ;;  %3966 = vmatpush3.bf16.msra.mxu1 %v4141_v43 }
 0x3c8   : > { %3962 = vmatmul.mubr.msk.bf16.vlgmr.msra.gmra.mxu0 %vm1480_vm3, %v1716_v11  ;;  %3967 = vmatprep.subr.bf16.mxu1 %v4325_v1 }
 0x3c9   : > { %3977 = vmatprep.mubr.msk.bf16.mxu0 %vm4326_vm0, %v4325_v1 }
 0x3cb   : > { %3968 = vmatpush3.bf16.msra.mxu1 %v4142_v55 }
 0x3cc   : > { %3981 = vmatprep.subr.bf16.mxu1 %v4325_v1 }
 0x45d   : > { %v1758_v63 = vpop.f32.mrf.mxu1 }
 0x45f   : > { %v3945_v12 = vpop.f32.mrf.mxu1  ;;  %v1804_v13 = vpop.f32.mrf.mxu0 }
 0x461   : > { %v1761_v14 = vpop.f32.mrf.mxu1  ;;  %v3951_v15 = vpop.f32.mrf.mxu0 }
 0x463   : > { %v3946_v17 = vpop.f32.mrf.mxu1  ;;  %v1807_v0 = vpop.f32.mrf.mxu0 }
 0x465   : > { %v3952_v18 = vpop.f32.mrf.mxu0 }
 0x486   : > { %v1850_v19 = vpop.f32.mrf.mxu1 }
 0x487   : > { %v1902_v20 = vcombine.low %v1758_v63, %v1850_v19  ;;  %v1903_v21 = vcombine.high %v1758_v63, %v1850_v19 }
 0x488   : > { %v3957_v22 = vpop.f32.mrf.mxu1  ;;  %v1896_v23 = vpop.f32.mrf.mxu0 }
 0x489   : > { %v1918_v24 = vcombine.low %v1804_v13, %v1896_v23  ;;  %v1919_v25 = vcombine.high %v1804_v13, %v1896_v23  ;;  %v1910_v29 = vrot.slane %v1902_v20, %v4608_v34  ;;  %v1917_v32 = vrot.slane %v1903_v21, %v4608_v34  ;;  %v4791_v20 = vld [vmem:[#allocation3] sm:$0xf] }
 0x48a   : > { %v1853_v26 = vpop.f32.mrf.mxu1  ;;  %v3963_v28 = vpop.f32.mrf.mxu0 }
 0x48b   : > { %v1926_v33 = vrot.slane %v1918_v24, %v4608_v34  ;;  %v1933_v35 = vrot.slane %v1919_v25, %v4608_v34  ;;  %v4143_v25 = vld [vmem:[%s5247_s10 + $0x8] sm:$0xff]   ;;  %v4144_v26 = vld [vmem:[%s5247_s10] sm:$0xff]  }
 0x48c   : > { %v3958_v36 = vpop.f32.mrf.mxu1  ;;  %v1899_v37 = vpop.f32.mrf.mxu0  ;;  %3974 = vmatpush3.bf16.msra.mxu0 %v4143_v25 }
 0x48d   : > { %v1934_v39 = vcombine.low %v1910_v29, %v1926_v33  ;;  %v1935_v40 = vcombine.high %v1910_v29, %v1926_v33  ;;  %v1950_v41 = vcombine.low %v1917_v32, %v1933_v35  ;;  %v1951_v42 = vcombine.high %v1917_v32, %v1933_v35  ;;  %3975 = vmatprep.subr.bf16.mxu0 %v4325_v1 }
 0x48e   : > { %v3964_v46 = vpop.f32.mrf.mxu0 }
 0x48f   : > { %v1942_v47 = vrot.slane %v1934_v39, %v4620_v44  ;;  %v1949_v48 = vrot.slane %v1935_v40, %v4620_v44  ;;  %v1958_v49 = vrot.slane %v1950_v41, %v4620_v44  ;;  %v1965_v50 = vrot.slane %v1951_v42, %v4620_v44 }
 0x490   : > { %3976 = vmatpush3.bf16.msra.mxu0 %v4144_v26  ;;  %v2368_v40 = vshrl.u32 %v4791_v20, 16 }
 0x491   : > { %v1970_v51 = vcombine.low %v1942_v47, %v1949_v48  ;;  %v3780_v52 = vcombine.high %v1942_v47, %v1949_v48  ;;  %v1986_v53 = vcombine.low %v1958_v49, %v1965_v50  ;;  %v3781_v54 = vcombine.high %v1958_v49, %v1965_v50  ;;  %3987 = vmatprep.subr.bf16.mxu0 %v4325_v1 }
 0x493   : > { %v1977_v56 = vrot.slane %v1970_v51, %v4608_v34  ;;  %v1985_v57 = vrot.slane %v3780_v52, %v4608_v34  ;;  %v1993_v16 = vrot.slane %v1986_v53, %v4608_v34  ;;  %v2001_v58 = vrot.slane %v3781_v54, %v4608_v34 }
 0x495   : > { %v2003_v59 = vcombine.high %v1977_v56, %v1985_v57  ;;  %v2019_v60 = vcombine.high %v1993_v16, %v2001_v58  ;;  %v2002_v61 = vcombine.low %v1977_v56, %v1985_v57  ;;  %v2018_v62 = vcombine.low %v1993_v16, %v2001_v58 }
 0x497   : > { %v2017_v38 = vrot.slane %v2003_v59, %v4620_v44  ;;  %v2033_v30 = vrot.slane %v2019_v60, %v4620_v44  ;;  %v2010_v31 = vrot.slane %v2002_v61, %v4620_v44  ;;  %v2026_v2 = vrot.slane %v2018_v62, %v4620_v44 }
 0x499   : > { %v2036_v3 = vcombine.low %v2017_v38, %v2033_v30  ;;  %v2035_v4 = vcombine.high %v2010_v31, %v2026_v2  ;;  %v2034_v5 = vcombine.low %v2010_v31, %v2026_v2  ;;  %v2037_v6 = vcombine.high %v2017_v38, %v2033_v30 }
 0x49b   : > { %2043 = vrot.lane.b32.xlu1 %v2036_v3, %s4334_s5  ;;  %2039 = vrot.lane.b32.xlu0 %v2035_v4, %s5210_s27 }
 0x49f   : > { %2047 = vrot.lane.b32.xlu0 %v2037_v6, %s5209_s2 }
 0x50d   : > { %v2040_v8 = vpop.permute.xlu0 %2039  ;;  %v2044_v9 = vpop.permute.xlu1 %2043 }
 0x50e   : > { %v2050_v10 = vsel %vm1480_vm3, %v2034_v5, %v2040_v8  ;;  %v3785_v5 = vld [vmem:[%s5248_s8] ss:$0 sm:$0xff] }
 0x50f   : > { %v2052_v63 = vsel %vm2051_vm5, %v2050_v10, %v2044_v9  ;;  %v3786_v10 = vld [vmem:[%s5249_s9] ss:$0 sm:$0xff] }
 0x511   : > { %v2048_v11 = vpop.permute.xlu0 %2047 }
 0x512   : > { %v2054_v12 = vsel %vm2053_vm6, %v2052_v63, %v2048_v11 }
 0x513   : > { %v2055_v13 = vpack.c.bf16 %v2054_v12, %v2054_v12 }
 0x515   : > { %3970 = vmatmul.mubr.msk.bf16.vlgmr.msra.gmra.mxu1 %vm853_vm1, %v2055_v13 }
 0x516   : > { %3983 = vmatprep.mubr.msk.bf16.mxu1 %vm4326_vm0, %v4325_v1 }
 0x5d5   : > { %v2107_v14 = vpop.f32.mrf.mxu1 }
 0x5d6   : > { %v2108_v15 = vadd.f32 %v2107_v14, %v4555_v7 }
 0x5d7   : > { %v3971_v17 = vpop.f32.mrf.mxu1 }
 0x5d8   : > { %v2113_v0 = vsel %vm853_vm1, %v2108_v15, 0.0 }
 0x5d9   : > { %2114 = vadd.xlane.f32.xlu1 %v2113_v0  ;;  %v2110_v18 = vpop.f32.mrf.mxu1 }
 0x5db   : > { %v3972_v19 = vpop.f32.mrf.mxu1 }
 0x5ea   : > { %2361 = vrot.lane.b32.xlu1 %v4791_v20, %s4329_s0 }
 0x5ee   : > { %2363 = vrot.lane.b32.xlu1 %v4791_v20, %s4327_s23 }
 0x662   : > { %v2115_v21 = vpop.xlane.xlu1 %2114 }
 0x663   : > { %v2117_v22 = vmul.f32 0.03125, %v2115_v21 }
 0x665   : > { %v2118_v23 = vsub.f32 %v2108_v15, %v2117_v22 }
 0x666   : > { %v4808_v28 = vpop.permute.xlu1 %2361 }
 0x667   : > { %v2119_v24 = vmul.f32 %v2118_v23, %v2118_v23  ;;  %v2374_v36 = vshrl.u32 %v4808_v28, 16 }
 0x669   : > { %v2120_v7 = vsel %vm853_vm1, %v2119_v24, 0.0 }
 0x66a   : > { %2121 = vadd.xlane.f32.xlu0 %v2120_v7  ;;  %v4810_v29 = vpop.permute.xlu1 %2363 }
 0x66b   : > { %v2375_v33 = vshrl.u32 %v4810_v29, 16  ;;  %v2373_v37 = vpack.i.b16 %v4810_v29, %v4808_v28 }
 0x66d   : > { %v2376_v42 = vpack.i.b16 %v2375_v33, %v2374_v36  ;;  %v2392_v47 = vrot.slane %v2373_v37, %v4608_v34 }
 0x66f   : > { %v2426_v50 = vrot.slane %v2376_v42, %v4608_v34 }
 0x680   : > { %2359 = vrot.lane.b32.xlu0 %v4791_v20, %s4328_s24 }
 0x6f3   : > { %v2122_v32 = vpop.xlane.xlu0 %2121 }
 0x6f4   : > { %v2123_v35 = vmul.f32 0.03125, %v2122_v32 }
 0x6f6   : > { %v2124_v39 = vadd.f32 1e-12, %v2123_v35 }
 0x6f7   : > { %v4817_v41 = vpop.permute.xlu0 %2359 }
 0x6f8   : > { %4169 = vrsqrt.f32 %v2124_v39  ;;  %v2367_v43 = vpack.i.b16 %v4817_v41, %v4791_v20  ;;  %v2369_v46 = vshrl.u32 %v4817_v41, 16 }
 0x6fa   : > { %v2370_v48 = vpack.i.b16 %v2369_v46, %v2368_v40  ;;  %v2384_v49 = vrot.slane %v2367_v43, %v4608_v34 }
 0x6fc   : > { %v2393_v51 = vcombine.low %v2384_v49, %v2392_v47  ;;  %v2394_v52 = vcombine.high %v2384_v49, %v2392_v47  ;;  %v2418_v53 = vrot.slane %v2370_v48, %v4608_v34 }
 0x6fe   : > { %v2401_v54 = vrot.slane %v2393_v51, %v4620_v44  ;;  %v2408_v55 = vrot.slane %v2394_v52, %v4620_v44  ;;  %v2427_v56 = vcombine.low %v2418_v53, %v2426_v50  ;;  %v2428_v57 = vcombine.high %v2418_v53, %v2426_v50 }
 0x700   : > { %v2435_v16 = vrot.slane %v2427_v56, %v4620_v44  ;;  %v2442_v58 = vrot.slane %v2428_v57, %v4620_v44  ;;  %v2445_v59 = vcombine.low %v2401_v54, %v2408_v55  ;;  %v3792_v60 = vcombine.high %v2401_v54, %v2408_v55 }
 0x702   : > { %v2452_v61 = vrot.slane %v2445_v59, %v4608_v34  ;;  %v2460_v62 = vrot.slane %v3792_v60, %v4608_v34  ;;  %v2470_v38 = vcombine.low %v2435_v16, %v2442_v58  ;;  %v3793_v30 = vcombine.high %v2435_v16, %v2442_v58 }
 0x704   : > { %v2461_v31 = vcombine.low %v2452_v61, %v2460_v62  ;;  %v2477_v2 = vrot.slane %v2470_v38, %v4608_v34  ;;  %v2485_v3 = vrot.slane %v3793_v30, %v4608_v34 }
 0x705   : > { %v4170_v4 = vpop.eup %4169 }
 0x706   : > { %v2126_v6 = vmul.f32 %v4170_v4, %v2118_v23  ;;  %v2468_v8 = vrot.slane %v2461_v31, %v4620_v44  ;;  %v2486_v9 = vcombine.low %v2477_v2, %v2485_v3 }
 0x708   : > { %v2493_v11 = vrot.slane %v2486_v9, %v4620_v44  ;;  %v2133_v63 = vmul.f32 %v3785_v5, %v2126_v6  ;;  %v2498_v12 = vshrl.u32 %v2468_v8, 16  ;;  %v4843_v13 = vcombine.high %v2468_v8, %v4332_v45 }
 0x70a   : > { %v2497_v14 = vpack.i.b16 %v2493_v11, %v2468_v8  ;;  %v4845_v15 = vadd.f32 %v3786_v10, %v2133_v63  ;;  %v2499_v17 = vshrl.u32 %v2493_v11, 16  ;;  %v4848_v0 = vcombine.high %v2493_v11, %v4332_v45 }
 0x70b   : > { %v2504_v23 = vshrl.u32 %v4843_v13, 16 }
 0x70c   : > { %v2667_v18 = vsel %vm1480_vm3, %v2497_v14, 0  ;;  %v2141_v19 = vpack.c.bf16 %v4845_v15, %v4845_v15  ;;  %v2500_v21 = vpack.i.b16 %v2499_v17, %v2498_v12  ;;  %v2503_v22 = vpack.i.b16 %v4848_v0, %v4843_v13 }
 0x70d   : > { %3982 = vmatpush3.bf16.xpose.msra.mxu1 %v2667_v18  ;;  %v2505_v24 = vshrl.u32 %v4848_v0, 16 }
 0x70e   : > { %3978 = vmatmul.mubr.msk.bf16.vlgmr.msra.gmra.mxu0 %vm853_vm1, %v2141_v19  ;;  %v2713_v7 = vsel %vm1480_vm3, %v2500_v21, 0  ;;  %3993 = vmatprep.subr.bf16.mxu1 %v4325_v1  ;;  %v2759_v14 = vsel %vm1480_vm3, %v2503_v22, 0 }
 0x70f   : > { %3988 = vmatpush3.bf16.xpose.msra.mxu0 %v2713_v7  ;;  %3989 = vmatprep.mubr.msk.bf16.mxu0 %vm4326_vm0, %v4325_v1  ;;  %v2506_v25 = vpack.i.b16 %v2505_v24, %v2504_v23  ;;  %v2660_v24 = vsub.s32 0, %v4599_v27 }
 0x710   : > { %3999 = vmatprep.subr.bf16.mxu0 %v4325_v1 }
 0x711   : > { %v2805_v17 = vsel %vm1480_vm3, %v2506_v25, 0 }
 0x7ce   : > { %v2195_v26 = vpop.f32.mrf.mxu0 }
 0x7cf   : > { %2212 = vrot.lane.b32.xlu1 %v2195_v26, %s4329_s0  ;;  %2209 = vrot.lane.b32.xlu0 %v2195_v26, %s4328_s24  ;;  %s5250_s0 = sld [smem:[#allocation21_spill]] }
 0x7d0   : > { %v3979_v32 = vpop.f32.mrf.mxu0 }
 0x7d2   : > { %v2198_v33 = vpop.f32.mrf.mxu0 }
 0x7d3   : > { %2215 = vrot.lane.b32.xlu0 %v2195_v26, %s4327_s23  ;;  %s5253_s23 = smov 24  }
 0x7d4   : > { %v3980_v35 = vpop.f32.mrf.mxu0 }
 0x7d5   : > { %s828_s27 = scalar_lea.vmem %s5250_s0, %s4535_s4  ;;  %s4937_s4 = scalar_lea.vmem [#allocation8], %s3751_s29 }
 0x7d6   : > { %v2201_v22 = vld [vmem:[%s828_s27] sm:$0x1]  ;;  %s5254_s0 = sadd.s32 4294967295, %s4323_s1  }
 0x7d7   : > { %v2202_v23 = vmul.f32 -1e+30, %v2201_v22  ;;  %s5054_s27 = sand.u32 1, %s5254_s0   ;;  %s4337_s0 = smov [#allocation6]  }
 0x7d8   : > { %s4195_s8 = sshll.u32 %s4337_s0, 4  ;;  %s4196_s8 = int_to_ptr.vmem [resolvable:$false] %s4195_s8 }
 0x7d9   : > { %v2661_v7 = vrot.slane %v2202_v23, %v2660_v24  ;;  %s4197_s9 = scalar_lea.vmem %s4196_s8, 1024 }
 0x841   : > { %v2213_v36 = vpop.permute.xlu1 %2212  ;;  %v2210_v37 = vpop.permute.xlu0 %2209 }
 0x842   : > { %v2218_v39 = vcombine.low %v2195_v26, %v2213_v36  ;;  %v2219_v40 = vcombine.high %v2195_v26, %v2213_v36 }
 0x844   : > { %v2226_v47 = vrot.slane %v2218_v39, %v4608_v34  ;;  %v2233_v48 = vrot.slane %v2219_v40, %v4608_v34 }
 0x845   : > { %v2216_v42 = vpop.permute.xlu0 %2215 }
 0x846   : > { %v2234_v43 = vcombine.low %v2210_v37, %v2216_v42  ;;  %v2235_v46 = vcombine.high %v2210_v37, %v2216_v42 }
 0x848   : > { %v2242_v49 = vrot.slane %v2234_v43, %v4608_v34  ;;  %v2249_v50 = vrot.slane %v2235_v46, %v4608_v34 }
 0x84a   : > { %v2250_v51 = vcombine.low %v2226_v47, %v2242_v49  ;;  %v2251_v52 = vcombine.high %v2226_v47, %v2242_v49  ;;  %v2266_v53 = vcombine.low %v2233_v48, %v2249_v50  ;;  %v2267_v54 = vcombine.high %v2233_v48, %v2249_v50 }
 0x84c   : > { %v2258_v55 = vrot.slane %v2250_v51, %v4620_v44  ;;  %v2265_v56 = vrot.slane %v2251_v52, %v4620_v44  ;;  %v2274_v57 = vrot.slane %v2266_v53, %v4620_v44  ;;  %v2281_v16 = vrot.slane %v2267_v54, %v4620_v44 }
 0x84e   : > { %v2286_v58 = vcombine.low %v2258_v55, %v2265_v56  ;;  %v3790_v59 = vcombine.high %v2258_v55, %v2265_v56  ;;  %v2302_v60 = vcombine.low %v2274_v57, %v2281_v16  ;;  %v3791_v61 = vcombine.high %v2274_v57, %v2281_v16 }
 0x850   : > { %v2293_v62 = vrot.slane %v2286_v58, %v4608_v34  ;;  %v2301_v38 = vrot.slane %v3790_v59, %v4608_v34  ;;  %v2309_v30 = vrot.slane %v2302_v60, %v4608_v34  ;;  %v2317_v31 = vrot.slane %v3791_v61, %v4608_v34 }
 0x852   : > { %v2318_v2 = vcombine.low %v2293_v62, %v2301_v38  ;;  %v2334_v3 = vcombine.low %v2309_v30, %v2317_v31  ;;  %v2319_v4 = vcombine.high %v2293_v62, %v2301_v38  ;;  %v2335_v5 = vcombine.high %v2309_v30, %v2317_v31 }
 0x854   : > { %v2326_v6 = vrot.slane %v2318_v2, %v4620_v44  ;;  %v2342_v8 = vrot.slane %v2334_v3, %v4620_v44  ;;  %v2333_v12 = vrot.slane %v2319_v4, %v4620_v44  ;;  %v2349_v13 = vrot.slane %v2335_v5, %v4620_v44 }
 0x856   : > { %v2350_v9 = vcombine.low %v2326_v6, %v2342_v8  ;;  %v2351_v10 = vcombine.high %v2326_v6, %v2342_v8  ;;  %v2352_v0 = vcombine.low %v2333_v12, %v2349_v13  ;;  %v2353_v18 = vcombine.high %v2333_v12, %v2349_v13 }
 0x858   : > { %v2354_v11 = vpack.c.bf16 %v2350_v9, %v2350_v9  ;;  %v2355_v63 = vpack.c.bf16 %v2351_v10, %v2351_v10  ;;  %v2356_v19 = vpack.c.bf16 %v2352_v0, %v2352_v0  ;;  %v2357_v21 = vpack.c.bf16 %v2353_v18, %v2353_v18 }
 0x85a   : > { %3984 = vmatmul.mubr.msk.bf16.vlgmr.msra.gmra.mxu1 %vm1480_vm3, %v2354_v11  ;;  %3990 = vmatmul.mubr.msk.bf16.vlgmr.msra.gmra.mxu0 %vm1480_vm3, %v2355_v63 }
 0x85b   : > { %3994 = vmatpush3.bf16.xpose.msra.mxu1 %v2759_v14  ;;  %4000 = vmatpush3.bf16.xpose.msra.mxu0 %v2805_v17 }
 0x85c   : > { %3995 = vmatprep.mubr.msk.bf16.mxu1 %vm4326_vm0, %v4325_v1  ;;  %4001 = vmatprep.mubr.msk.bf16.mxu0 %vm4326_vm0, %v4325_v1 }
 0x85d   : > { %4005 = vmatprep.subr.bf16.mxu1 %v4325_v1  ;;  %4011 = vmatprep.subr.bf16.mxu0 %v4325_v1 }
 0x862   : > { %3996 = vmatmul.mubr.msk.bf16.vlgmr.msra.gmra.mxu1 %vm1480_vm3, %v2356_v19  ;;  %4002 = vmatmul.mubr.msk.bf16.vlgmr.msra.gmra.mxu0 %vm1480_vm3, %v2357_v21 }
 0x863   : > { %4007 = vmatprep.mubr.msk.bf16.mxu1 %vm4326_vm0, %v4325_v1  ;;  %4013 = vmatprep.mubr.msk.bf16.mxu0 %vm4326_vm0, %v4325_v1 }
 0x91a   : > { %v2703_v25 = vpop.f32.mrf.mxu1  ;;  %v2749_v26 = vpop.f32.mrf.mxu0 }
 0x91b   : > { %v2704_v32 = vadd.f32 %v2703_v25, %v2661_v7  ;;  %v2750_v33 = vadd.f32 %v2749_v26, %v2661_v7 }
 0x91c   : > { %v3985_v35 = vpop.f32.mrf.mxu1  ;;  %v3991_v36 = vpop.f32.mrf.mxu0 }
 0x91d   : > { %v2847_v37 = vsel %vm1480_vm3, %v2704_v32, -inf  ;;  %v2850_v39 = vsel %vm1480_vm3, %v2750_v33, -inf }
 0x91e   : > { %2848 = vmax.xlane.f32.xlu1 %v2847_v37  ;;  %v2706_v40 = vpop.f32.mrf.mxu1  ;;  %2851 = vmax.xlane.f32.xlu0 %v2850_v39  ;;  %v2752_v42 = vpop.f32.mrf.mxu0 }
 0x920   : > { %v3986_v43 = vpop.f32.mrf.mxu1  ;;  %v3992_v46 = vpop.f32.mrf.mxu0 }
 0x922   : > { %v2795_v47 = vpop.f32.mrf.mxu1  ;;  %v2841_v48 = vpop.f32.mrf.mxu0 }
 0x923   : > { %v2796_v27 = vadd.f32 %v2795_v47, %v2661_v7  ;;  %v2842_v49 = vadd.f32 %v2841_v48, %v2661_v7 }
 0x924   : > { %v3997_v50 = vpop.f32.mrf.mxu1  ;;  %v4003_v51 = vpop.f32.mrf.mxu0 }
 0x925   : > { %v2853_v52 = vsel %vm1480_vm3, %v2796_v27, -inf  ;;  %v2856_v53 = vsel %vm1480_vm3, %v2842_v49, -inf }
 0x926   : > { %v2798_v54 = vpop.f32.mrf.mxu1  ;;  %2854 = vmax.xlane.f32.xlu0 %v2853_v52  ;;  %2857 = vmax.xlane.f32.xlu1 %v2856_v53  ;;  %v2844_v55 = vpop.f32.mrf.mxu0 }
 0x928   : > { %v3998_v56 = vpop.f32.mrf.mxu1  ;;  %v4004_v57 = vpop.f32.mrf.mxu0 }
 0x937   : > { %2509 = vrot.lane.b32.xlu1 %v4817_v41, %s4333_s26 }
 0x93c   : > { %2507 = vrot.lane.b32.xlu0 %v4791_v20, %s4333_s26 }
 0x9a7   : > { %v2849_v16 = vpop.xlane.xlu1 %2848  ;;  %v2852_v58 = vpop.xlane.xlu0 %2851 }
 0x9a8   : > { %v2859_v59 = vsub.f32 %v2704_v32, %v2849_v16  ;;  %v2860_v60 = vsub.f32 %v2750_v33, %v2852_v58 }
 0x9aa   : > { %v2863_v61 = vmul.f32 1.442695, %v2859_v59  ;;  %v2865_v62 = vmul.f32 1.442695, %v2860_v60 }
 0x9ac   : > { %4171 = vpow2.f32 %v2863_v61 }
 0x9ad   : > { %4173 = vpow2.f32 %v2865_v62 }
 0x9af   : > { %v2858_v20 = vpop.xlane.xlu1 %2857  ;;  %v2855_v41 = vpop.xlane.xlu0 %2854 }
 0x9b0   : > { %v2862_v3 = vsub.f32 %v2842_v49, %v2858_v20  ;;  %v2861_v4 = vsub.f32 %v2796_v27, %v2855_v41 }
 0x9b2   : > { %v2869_v5 = vmul.f32 1.442695, %v2862_v3  ;;  %v2867_v6 = vmul.f32 1.442695, %v2861_v4 }
 0x9b3   : > { %v2510_v11 = vpop.permute.xlu1 %2509 }
 0x9b4   : > { %4175 = vpow2.f32 %v2869_v5  ;;  %v2519_v14 = vshrl.u32 %v2510_v11, 16 }
 0x9b5   : > { %4177 = vpow2.f32 %v2867_v6 }
 0x9b9   : > { %v4172_v38 = vpop.eup %4171 }
 0x9ba   : > { %v4174_v30 = vpop.eup %4173  ;;  %v2871_v31 = vsel %vm1480_vm3, %v4172_v38, 0.0 }
 0x9bb   : > { %2872 = vadd.xlane.f32.xlu0 %v2871_v31  ;;  %v2874_v2 = vsel %vm1480_vm3, %v4174_v30, 0.0 }
 0x9bc   : > { %2875 = vadd.xlane.f32.xlu1 %v2874_v2 }
 0x9c1   : > { %v4917_v8 = vpop.eup %4175 }
 0x9c2   : > { %v4919_v9 = vpop.eup %4177  ;;  %v2880_v10 = vsel %vm1480_vm3, %v4917_v8, 0.0 }
 0x9cd   : > { %2511 = vrot.lane.b32.xlu1 %v4808_v28, %s4333_s26  ;;  %v2877_v28 = vsel %vm1480_vm3, %v4919_v9, 0.0 }
 0x9d1   : > { %2513 = vrot.lane.b32.xlu0 %v4810_v29, %s4333_s26  ;;  %v2508_v29 = vpop.permute.xlu0 %2507  ;;  %s5212_s26 = sshll.u32 %s4315_s25, 9 }
 0x9d2   : > { %v2518_v13 = vshrl.u32 %v2508_v29, 16  ;;  %v2517_v17 = vpack.i.b16 %v2510_v11, %v2508_v29  ;;  %s5062_s19 = scalar_lea.hbm %s5194_s22, %s5212_s26 }
 0x9d4   : > { %v2520_v21 = vpack.i.b16 %v2519_v14, %v2518_v13  ;;  %v2534_v24 = vrot.slane %v2517_v17, %v4608_v34 }
 0x9d6   : > { %v2568_v26 = vrot.slane %v2520_v21, %v4608_v34 }
 0x9f0   : > { %2881 = vadd.xlane.f32.xlu0 %v2880_v10 }
 0x9f1   : > { %2878 = vadd.xlane.f32.xlu1 %v2877_v28 }
 0xa44   : > { %v2873_v63 = vpop.xlane.xlu0 %2872 }
 0xa45   : > { %4179 = vrcp.f32 %v2873_v63  ;;  %v2876_v12 = vpop.xlane.xlu1 %2875 }
 0xa46   : > { %4181 = vrcp.f32 %v2876_v12 }
 0xa48   : > { %v2514_v0 = vpop.permute.xlu0 %2513 }
 0xa49   : > { %v2525_v18 = vshrl.u32 %v2514_v0, 16  ;;  %v2512_v19 = vpop.permute.xlu1 %2511 }
 0xa4a   : > { %v2523_v22 = vpack.i.b16 %v2514_v0, %v2512_v19  ;;  %v2524_v23 = vshrl.u32 %v2512_v19, 16 }
 0xa4c   : > { %v2526_v7 = vpack.i.b16 %v2525_v18, %v2524_v23  ;;  %v2542_v25 = vrot.slane %v2523_v22, %v4608_v34 }
 0xa4e   : > { %v2543_v32 = vcombine.low %v2534_v24, %v2542_v25  ;;  %v2544_v33 = vcombine.high %v2534_v24, %v2542_v25  ;;  %v2576_v35 = vrot.slane %v2526_v7, %v4608_v34 }
 0xa50   : > { %v2551_v36 = vrot.slane %v2543_v32, %v4620_v44  ;;  %v2558_v37 = vrot.slane %v2544_v33, %v4620_v44  ;;  %v2577_v39 = vcombine.low %v2568_v26, %v2576_v35  ;;  %v2578_v40 = vcombine.high %v2568_v26, %v2576_v35 }
 0xa52   : > { %v4180_v42 = vpop.eup %4179  ;;  %v2585_v43 = vrot.slane %v2577_v39, %v4620_v44  ;;  %v2592_v46 = vrot.slane %v2578_v40, %v4620_v44  ;;  %v2595_v47 = vcombine.low %v2551_v36, %v2558_v37  ;;  %v3794_v48 = vcombine.high %v2551_v36, %v2558_v37 }
 0xa53   : > { %v4182_v27 = vpop.eup %4181  ;;  %v2887_v49 = vmul.f32 %v4180_v42, %v4172_v38 }
 0xa54   : > { %v2602_v50 = vrot.slane %v2595_v47, %v4608_v34  ;;  %v2610_v51 = vrot.slane %v3794_v48, %v4608_v34  ;;  %v2620_v52 = vcombine.low %v2585_v43, %v2592_v46  ;;  %v3795_v53 = vcombine.high %v2585_v43, %v2592_v46 }
 0xa55   : > { %2891 = vst.msk [vmem:[%s4937_s4] sm:$0xff] %vm1480_vm3, %v2887_v49  ;;  %v2888_v54 = vmul.f32 %v4182_v27, %v4174_v30  ;;  %v2895_v5 = vpack.c.bf16 %v2887_v49, %v2887_v49 }
 0xa56   : > { %v2627_v55 = vrot.slane %v2620_v52, %v4608_v34  ;;  %v2635_v56 = vrot.slane %v3795_v53, %v4608_v34  ;;  %v2611_v57 = vcombine.low %v2602_v50, %v2610_v51  ;;  %v4145_v52 = vld [vmem:[%s5251_s12 + $0x8] sm:$0xff]  }
 0xa57   : > { %2892 = vst.msk [vmem:[%s4937_s4 + $0x8] sm:$0xff] %vm1480_vm3, %v2888_v54  ;;  %v2896_v28 = vpack.c.bf16 %v2888_v54, %v2888_v54 }
 0xa58   : > { %v2618_v16 = vrot.slane %v2611_v57, %v4620_v44  ;;  %v2636_v58 = vcombine.low %v2627_v55, %v2635_v56 }
 0xa5a   : > { %v2643_v59 = vrot.slane %v2636_v58, %v4620_v44  ;;  %v2619_v60 = vcombine.high %v2618_v16, %v4332_v45  ;;  %v2648_v62 = vshrl.u32 %v2618_v16, 16 }
 0xa5c   : > { %v2647_v61 = vpack.i.b16 %v2643_v59, %v2618_v16  ;;  %v2649_v38 = vshrl.u32 %v2643_v59, 16  ;;  %v2644_v31 = vcombine.high %v2643_v59, %v4332_v45  ;;  %v2654_v30 = vshrl.u32 %v2619_v60, 16 }
 0xa5e   : > { %v2903_v2 = vsel %vm1720_vm4, %v2647_v61, 0  ;;  %v2650_v20 = vpack.i.b16 %v2649_v38, %v2648_v62  ;;  %v2653_v41 = vpack.i.b16 %v2644_v31, %v2619_v60  ;;  %v2655_v3 = vshrl.u32 %v2644_v31, 16  ;;  %v4146_v61 = vld [vmem:[%s5251_s12] sm:$0xff]  }
 0xa5f   : > { %4006 = vmatpush3.bf16.msra.mxu1 %v2903_v2 }
 0xa60   : > { %v2949_v4 = vsel %vm1720_vm4, %v2650_v20, 0  ;;  %4017 = vmatprep.subr.bf16.mxu1 %v4325_v1  ;;  %v2656_v6 = vpack.i.b16 %v2655_v3, %v2654_v30  ;;  %v2995_v10 = vsel %vm1720_vm4, %v2653_v41, 0 }
 0xa61   : > { %4012 = vmatpush3.bf16.msra.mxu0 %v2949_v4 }
 0xa62   : > { %4008 = vmatmul.mubr.msk.bf16.vlgmr.msra.gmra.mxu1 %vm1480_vm3, %v2895_v5  ;;  %4023 = vmatprep.subr.bf16.mxu0 %v4325_v1  ;;  %v3041_v45 = vsel %vm1720_vm4, %v2656_v6, 0 }
 0xa63   : > { %4018 = vmatpush3.bf16.msra.mxu1 %v2995_v10  ;;  %4019 = vmatprep.mubr.msk.bf16.mxu1 %vm4326_vm0, %v4325_v1 }
 0xa64   : > { %4014 = vmatmul.mubr.msk.bf16.vlgmr.msra.gmra.mxu0 %vm1480_vm3, %v2896_v28  ;;  %4029 = vmatprep.subr.bf16.mxu1 %v4325_v1 }
 0xa65   : > { %4024 = vmatpush3.bf16.msra.mxu0 %v3041_v45  ;;  %4025 = vmatprep.mubr.msk.bf16.mxu0 %vm4326_vm0, %v4325_v1 }
 0xa66   : > { %4037 = vmatprep.subr.bf16.mxu0 %v4325_v1 }
 0xa79   : > { %v2882_v29 = vpop.xlane.xlu0 %2881 }
 0xa7a   : > { %4183 = vrcp.f32 %v2882_v29  ;;  %v2879_v11 = vpop.xlane.xlu1 %2878 }
 0xa7b   : > { %4185 = vrcp.f32 %v2879_v11 }
 0xa87   : > { %v4184_v63 = vpop.eup %4183 }
 0xa88   : > { %v4186_v12 = vpop.eup %4185  ;;  %v2890_v13 = vmul.f32 %v4184_v63, %v4917_v8 }
 0xa89   : > { %v2889_v14 = vmul.f32 %v4186_v12, %v4919_v9 }
 0xa8a   : > { %2894 = vst.msk [vmem:[%s4937_s4 + $0x18] sm:$0xff] %vm1480_vm3, %v2890_v13  ;;  %v2898_v17 = vpack.c.bf16 %v2890_v13, %v2890_v13 }
 0xa8b   : > { %2893 = vst.msk [vmem:[%s4937_s4 + $0x10] sm:$0xff] %vm1480_vm3, %v2889_v14  ;;  %v2897_v0 = vpack.c.bf16 %v2889_v14, %v2889_v14 }
 0xa8c   : > { %4026 = vmatmul.mubr.msk.bf16.vlgmr.msra.gmra.mxu0 %vm1480_vm3, %v2898_v17 }
 0xa8d   : > { %4020 = vmatmul.mubr.msk.bf16.vlgmr.msra.gmra.mxu1 %vm1480_vm3, %v2897_v0  ;;  %4041 = vmatprep.mubr.msk.bf16.mxu0 %vm4326_vm0, %v4325_v1 }
 0xa8e   : > { %4033 = vmatprep.mubr.msk.bf16.mxu1 %vm4326_vm0, %v4325_v1  ;;  %4030 = vmatpush3.bf16.msra.mxu1 %v4145_v52 }
 0xa8f   : > { %4031 = vmatprep.subr.bf16.mxu1 %v4325_v1 }
 0xa92   : > { %4032 = vmatpush3.bf16.msra.mxu1 %v4146_v61 }
 0xa93   : > { %4045 = vmatprep.subr.bf16.mxu1 %v4325_v1 }
 0xb22   : > { %v2939_v18 = vpop.f32.mrf.mxu1 }
 0xb24   : > { %v4009_v8 = vpop.f32.mrf.mxu1  ;;  %v2985_v19 = vpop.f32.mrf.mxu0 }
 0xb26   : > { %v2942_v9 = vpop.f32.mrf.mxu1  ;;  %v4015_v21 = vpop.f32.mrf.mxu0 }
 0xb28   : > { %v4010_v22 = vpop.f32.mrf.mxu1  ;;  %v2988_v23 = vpop.f32.mrf.mxu0 }
 0xb2a   : > { %v4016_v24 = vpop.f32.mrf.mxu0 }
 0xb4c   : > { %v3077_v7 = vpop.f32.mrf.mxu0 }
 0xb4d   : > { %v3031_v25 = vpop.f32.mrf.mxu1  ;;  %v3099_v26 = vcombine.low %v2985_v19, %v3077_v7  ;;  %v3100_v32 = vcombine.high %v2985_v19, %v3077_v7 }
 0xb4e   : > { %v3083_v33 = vcombine.low %v2939_v18, %v3031_v25  ;;  %v3084_v35 = vcombine.high %v2939_v18, %v3031_v25  ;;  %v4027_v36 = vpop.f32.mrf.mxu0 }
 0xb4f   : > { %v3107_v37 = vrot.slane %v3099_v26, %v4608_v34  ;;  %v3114_v39 = vrot.slane %v3100_v32, %v4608_v34  ;;  %v4021_v40 = vpop.f32.mrf.mxu1  ;;  %v4147_v26 = vld [vmem:[%s5187_s15 + $0x8] sm:$0xff]   ;;  %v4149_v32 = vld [vmem:[%s5189_s17 + $0x18] sm:$0xff]  }
 0xb50   : > { %v3091_v42 = vrot.slane %v3083_v33, %v4608_v34  ;;  %v3098_v43 = vrot.slane %v3084_v35, %v4608_v34  ;;  %v3080_v46 = vpop.f32.mrf.mxu0  ;;  %4038 = vmatpush3.bf16.msra.mxu0 %v4147_v26  ;;  %v4150_v33 = vld [vmem:[%s5189_s17 + $0x10] sm:$0xff]   ;;  %v3809_v40 = vld [vmem:[%s5185_s13] ss:$0 sm:$0xff] }
 0xb51   : > { %v3034_v47 = vpop.f32.mrf.mxu1  ;;  %4039 = vmatprep.subr.bf16.mxu0 %v4325_v1 }
 0xb52   : > { %v3115_v48 = vcombine.low %v3091_v42, %v3107_v37  ;;  %v3116_v27 = vcombine.high %v3091_v42, %v3107_v37  ;;  %v3131_v49 = vcombine.low %v3098_v43, %v3114_v39  ;;  %v3132_v50 = vcombine.high %v3098_v43, %v3114_v39  ;;  %v4028_v51 = vpop.f32.mrf.mxu0  ;;  %v3810_v43 = vld [vmem:[%s5186_s14] ss:$0 sm:$0xff] }
 0xb53   : > { %v4022_v53 = vpop.f32.mrf.mxu1 }
 0xb54   : > { %v3123_v54 = vrot.slane %v3115_v48, %v4620_v44  ;;  %v3130_v55 = vrot.slane %v3116_v27, %v4620_v44  ;;  %v3139_v56 = vrot.slane %v3131_v49, %v4620_v44  ;;  %v3146_v57 = vrot.slane %v3132_v50, %v4620_v44  ;;  %v4151_v27 = vld [vmem:[%s5189_s17 + $0x8] sm:$0xff]   ;;  %v4152_v49 = vld [vmem:[%s5189_s17] sm:$0xff]  }
 0xb55   : > { %v3811_v50 = vld [vmem:[%s5188_s16] ss:$0 sm:$0xff] }
 0xb56   : > { %v3151_v16 = vcombine.low %v3123_v54, %v3130_v55  ;;  %v3804_v58 = vcombine.high %v3123_v54, %v3130_v55  ;;  %v3167_v59 = vcombine.low %v3139_v56, %v3146_v57  ;;  %v3805_v60 = vcombine.high %v3139_v56, %v3146_v57 }
 0xb58   : > { %v3158_v62 = vrot.slane %v3151_v16, %v4608_v34  ;;  %v3166_v38 = vrot.slane %v3804_v58, %v4608_v34  ;;  %v3174_v31 = vrot.slane %v3167_v59, %v4608_v34  ;;  %v3182_v30 = vrot.slane %v3805_v60, %v4608_v34 }
 0xb5a   : > { %v3184_v2 = vcombine.high %v3158_v62, %v3166_v38  ;;  %v3200_v20 = vcombine.high %v3174_v31, %v3182_v30  ;;  %v3183_v41 = vcombine.low %v3158_v62, %v3166_v38  ;;  %v3199_v3 = vcombine.low %v3174_v31, %v3182_v30 }
 0xb5c   : > { %v3198_v4 = vrot.slane %v3184_v2, %v4620_v44  ;;  %v3214_v5 = vrot.slane %v3200_v20, %v4620_v44  ;;  %v3191_v6 = vrot.slane %v3183_v41, %v4620_v44  ;;  %v3207_v10 = vrot.slane %v3199_v3, %v4620_v44 }
 0xb5e   : > { %v3217_v28 = vcombine.low %v3198_v4, %v3214_v5  ;;  %v3216_v45 = vcombine.high %v3191_v6, %v3207_v10  ;;  %v3215_v29 = vcombine.low %v3191_v6, %v3207_v10  ;;  %v3218_v34 = vcombine.high %v3198_v4, %v3214_v5 }
 0xb60   : > { %3224 = vrot.lane.b32.xlu1 %v3217_v28, %s4334_s5  ;;  %3220 = vrot.lane.b32.xlu0 %v3216_v45, %s5252_s21 }
 0xb64   : > { %3228 = vrot.lane.b32.xlu1 %v3218_v34, %s5253_s23  ;;  %s3541_s23 = sshll.u32 %s4716_s3, 4  ;;  %s5065_s23 = int_to_ptr.vmem [resolvable:$true] %s3541_s23 }
 0xb65   : > { %s4191_s24 = scalar_lea.vmem %s5065_s23, 512  ;;  %p4198_p1 = scmp.lt.s32.totalorder %s5065_s23, %s4196_s8 }
 0xb66   : > { %p4192_p12 = scmp.ne.s32.totalorder %s5065_s23, %s4191_s24  ;;  %p4199_p2 = scmp.lt.s32.totalorder %s4197_s9, %s4191_s24 }
 0xb68   : > { %p4193_p13 = pnand %p4192_p12, %p4503_p4  ;;  %p4200_p3 = por %p4199_p2, %p4198_p1 }
 0xb6a   : > { %p4194_p0 = pneg %p4193_p13 }
 0xb6c   : > { %p4201_p5 = pnand %p4200_p3, %p4194_p0 }
 0xbd2   : > { %v3225_v11 = vpop.permute.xlu1 %3224  ;;  %v3221_v63 = vpop.permute.xlu0 %3220 }
 0xbd3   : > { %v3231_v12 = vsel %vm1480_vm3, %v3215_v29, %v3221_v63 }
 0xbd4   : > { %v3232_v14 = vsel %vm2051_vm5, %v3231_v12, %v3225_v11 }
 0xbd6   : > { %v3229_v13 = vpop.permute.xlu1 %3228 }
 0xbd7   : > { %v3233_v17 = vsel %vm2053_vm6, %v3232_v14, %v3229_v13 }
 0xbd8   : > { %v3234_v44 = vpack.c.bf16 %v3233_v17, %v3233_v17 }
 0xbda   : > { %4034 = vmatmul.mubr.msk.bf16.vlgmr.msra.gmra.mxu1 %vm853_vm1, %v3234_v44 }
 0xbdb   : > { %4053 = vmatprep.mubr.msk.bf16.mxu1 %vm4326_vm0, %v4325_v1  ;;  %4046 = vmatpush3.bf16.msra.mxu1 %v4149_v32 }
 0xbdc   : > { %4047 = vmatprep.subr.bf16.mxu1 %v4325_v1 }
 0xbdf   : > { %4048 = vmatpush3.bf16.msra.mxu1 %v4150_v33 }
 0xbe0   : > { %4049 = vmatprep.subr.bf16.mxu1 %v4325_v1 }
 0xbe3   : > { %4050 = vmatpush3.bf16.msra.mxu1 %v4151_v27 }
 0xbe4   : > { %4051 = vmatprep.subr.bf16.mxu1 %v4325_v1  ;;  %v3815_v1 = vld [vmem:[%s5190_s18] ss:$0 sm:$0xff] }
 0xbe7   : > { %4052 = vmatpush3.bf16.msra.mxu1 %v4152_v49 }
 0xc9a   : > { %v3286_v0 = vpop.f32.mrf.mxu1 }
 0xc9b   : > { %v3287_v18 = vadd.f32 %v3286_v0, %v4845_v15  ;;  %v4148_v15 = vld [vmem:[%s5187_s15] sm:$0xff]  }
 0xc9c   : > { %v4035_v8 = vpop.f32.mrf.mxu1  ;;  %4040 = vmatpush3.bf16.msra.mxu0 %v4148_v15 }
 0xc9d   : > { %v3292_v19 = vsel %vm853_vm1, %v3287_v18, 0.0 }
 0xc9e   : > { %3293 = vadd.xlane.f32.xlu0 %v3292_v19  ;;  %v3289_v9 = vpop.f32.mrf.mxu1 }
 0xca0   : > { %v4036_v21 = vpop.f32.mrf.mxu1 }
 0xd27   : > { %v3294_v22 = vpop.xlane.xlu0 %3293 }
 0xd28   : > { %v3295_v23 = vmul.f32 0.03125, %v3294_v22 }
 0xd2a   : > { %v3296_v24 = vsub.f32 %v3287_v18, %v3295_v23 }
 0xd2c   : > { %v3297_v7 = vmul.f32 %v3296_v24, %v3296_v24 }
 0xd2e   : > { %v3298_v25 = vsel %vm853_vm1, %v3297_v7, 0.0 }
 0xd2f   : > { %3299 = vadd.xlane.f32.xlu1 %v3298_v25 }
 0xdb8   : > { %v3300_v35 = vpop.xlane.xlu1 %3299 }
 0xdb9   : > { %v3301_v36 = vmul.f32 0.03125, %v3300_v35 }
 0xdbb   : > { %v3302_v37 = vadd.f32 1e-12, %v3301_v36 }
 0xdbd   : > { %4187 = vrsqrt.f32 %v3302_v37 }
 0xdca   : > { %v4188_v39 = vpop.eup %4187 }
 0xdcb   : > { %v3304_v42 = vmul.f32 %v4188_v39, %v3296_v24 }
 0xdcd   : > { %v3311_v46 = vmul.f32 %v3809_v40, %v3304_v42 }
 0xdcf   : > { %v3318_v47 = vadd.f32 %v3810_v43, %v3311_v46 }
 0xdd1   : > { %v3319_v48 = vpack.c.bf16 %v3318_v47, %v3318_v47 }
 0xdd3   : > { %4042 = vmatmul.mubr.msk.bf16.vlgmr.msra.gmra.mxu0 %vm853_vm1, %v3319_v48 }
 0xe93   : > { %v3380_v51 = vpop.f32.mrf.mxu0 }
 0xe94   : > { %v3381_v52 = vadd.f32 %v3811_v50, %v3380_v51 }
 0xe95   : > { %v4043_v53 = vpop.f32.mrf.mxu0 }
 0xe96   : > { %v3386_v54 = vmax.f32 %v3381_v52, 0.0 }
 0xe97   : > { %v3383_v55 = vpop.f32.mrf.mxu0 }
 0xe98   : > { %v3387_v56 = vpack.c.bf16 %v3386_v54, %v3386_v54 }
 0xe99   : > { %v4044_v57 = vpop.f32.mrf.mxu0 }
 0xe9a   : > { %4054 = vmatmul.mubr.msk.bf16.vlgmr.msra.gmra.mxu1 %vm3427_vm7, %v3387_v56 }
 0xf5a   : > { %v3465_v16 = vpop.f32.mrf.mxu1 }
 0xf5b   : > { %v3466_v58 = vadd.f32 %v3815_v1, %v3465_v16 }
 0xf5c   : > { %v4055_v59 = vpop.f32.mrf.mxu1 }
 0xf5d   : > { %v3473_v60 = vadd.f32 %v3466_v58, %v3318_v47 }
 0xf5e   : > { %v3468_v61 = vpop.f32.mrf.mxu1 }
 0xf5f   : > { %v3474_v62 = vsel %vm853_vm1, %v3473_v60, 0.0 }
 0xf60   : > { %3475 = vadd.xlane.f32.xlu0 %v3474_v62  ;;  %v4056_v38 = vpop.f32.mrf.mxu1 }
 0xfe9   : > { %v3476_v31 = vpop.xlane.xlu0 %3475 }
 0xfea   : > { %v3477_v30 = vmul.f32 0.03125, %v3476_v31 }
 0xfec   : > { %v5047_v2 = vsub.f32 %v3473_v60, %v3477_v30 }
 0xfee   : > { %v3479_v20 = vmul.f32 %v5047_v2, %v5047_v2 }
 0xff0   : > { %v3480_v41 = vsel %vm853_vm1, %v3479_v20, 0.0 }
 0xff1   : > { %3481 = vadd.xlane.f32.xlu0 %v3480_v41 }
 0xff2   : > { %4204 = shalt.err (!%p4201_p5)
}
 0xff3   : > { %s4205_s3 = scalar_lea.hbm %s5062_s19, 512  ;;  %s4209_s0 = scalar_lea.hbm %s5194_s22, 1024 }
 0xff4   : > { %p4206_p6 = scmp.ne.s32.totalorder %s5062_s19, %s4205_s3  ;;  %p4210_p10 = scmp.lt.s32.totalorder %s5062_s19, %s5194_s22 }
 0xff5   : > { %p4211_p11 = scmp.lt.s32.totalorder %s4209_s0, %s4205_s3 }
 0xff6   : > { %p4207_p7 = pnand %p4206_p6, %p4503_p4 }
 0xff7   : > { %p4212_p12 = por %p4211_p11, %p4210_p10 }
 0xff8   : > { %p4208_p9 = pneg %p4207_p7 }
 0xffa   : > { %p4213_p13 = pnand %p4212_p12, %p4208_p9 }
 0xffc   : > { %4216 = shalt.err (!%p4213_p13)
}
 0xffd   : > { %s4338_s8 = smov 128   ;;  %s5255_s9 = scalar_lea.sflag [#allocation7], %s5054_s27 }
 0xffe   : > { %4058 = dma.vmem_to_hbm [thread:$0]  (%p4503_p4), %s5065_s23, 512, %s5062_s19, %s5255_s9, %s4338_s8, %s4338_s8, %s5252_s21  }
 0xfff   : > { %s5256_s26 = sshll.u32 %s4315_s25, 9  ;;  %s5257_s3 = sld [smem:[#allocation33_spill]] }
0x1000   : > { %s3558_s2 = sshll.u32 %s4937_s4, 4  ;;  %s4339_s10 = smov [#allocation8]   ;;  %s3559_s2 = int_to_ptr.vmem [resolvable:$true] %s3558_s2 }
0x1001   : > { %s4217_s0 = scalar_lea.vmem %s3559_s2, 512  ;;  %s4221_s11 = sshll.u32 %s4339_s10, 4  ;;  %s4222_s11 = int_to_ptr.vmem [resolvable:$false] %s4221_s11 }
0x1002   : > { %p4218_p0 = scmp.ne.s32.totalorder %s3559_s2, %s4217_s0  ;;  %s4223_s12 = scalar_lea.vmem %s4222_s11, 1024 }
0x1003   : > { %p4224_p3 = scmp.lt.s32.totalorder %s3559_s2, %s4222_s11  ;;  %p4225_p5 = scmp.lt.s32.totalorder %s4223_s12, %s4217_s0 }
0x1004   : > { %p4219_p1 = pnand %p4218_p0, %p4503_p4 }
0x1005   : > { %s5098_s29 = scalar_lea.hbm %s5257_s3, %s5256_s26  ;;  %p4226_p6 = por %p4225_p5, %p4224_p3 }
0x1006   : > { %p4220_p2 = pneg %p4219_p1 }
0x1008   : > { %p4227_p7 = pnand %p4226_p6, %p4220_p2 }
0x100a   : > { %4230 = shalt.err (!%p4227_p7)
}
0x100b   : > { %s4231_s4 = scalar_lea.hbm %s5098_s29, 512  ;;  %s4235_s10 = scalar_lea.hbm %s5257_s3, 1024 }
0x100c   : > { %p4232_p9 = scmp.ne.s32.totalorder %s5098_s29, %s4231_s4  ;;  %p4236_p12 = scmp.lt.s32.totalorder %s5098_s29, %s5257_s3 }
0x100d   : > { %p4237_p13 = scmp.lt.s32.totalorder %s4235_s10, %s4231_s4 }
0x100e   : > { %p4233_p10 = pnand %p4232_p9, %p4503_p4 }
0x100f   : > { %p4238_p0 = por %p4237_p13, %p4236_p12 }
0x1010   : > { %p4234_p11 = pneg %p4233_p10 }
0x1012   : > { %p4239_p1 = pnand %p4238_p0, %p4234_p11 }
0x1014   : > { %4242 = shalt.err (!%p4239_p1)
}
0x1015   : > { %s5258_s11 = scalar_lea.sflag [#allocation7], %s5054_s27  ;;  %s3750_s12 = sshll.u32 %s4703_s6, 3 }
0x1016   : > { %4059 = dma.vmem_to_hbm [thread:$0]  (%p4503_p4), %s3559_s2, 512, %s5098_s29, %s5258_s11, %s4338_s8, %s4338_s8, %s5252_s21  }
0x1017   : > { %s5259_s0 = sld [smem:[#allocation30_spill]]  ;;  %s3826_s23 = sshll.u32 %s4315_s25, 7 }
0x1018   : > { %s5260_s19 = sld [smem:[#allocation31_spill]]  ;;  %s789_s21 = scalar_lea.vmem [#allocation4], %s3750_s12 }
0x1019   : > { %s3527_s8 = sshll.u32 %s789_s21, 4  ;;  %s5261_s10 = sld [smem:[#allocation32_spill]]  ;;  %s3528_s8 = int_to_ptr.vmem [resolvable:$true] %s3527_s8 }
0x101a   : > { %s3503_s26 = scalar_lea.sflag [#allocation5], %s4703_s6  ;;  %s4243_s11 = scalar_lea.vmem %s3528_s8, 128 }
0x101b   : > { %p4244_p2 = scmp.ne.s32.totalorder %s3528_s8, %s4243_s11  ;;  %s4340_s5 = smov [#allocation4]  }
0x101c   : > { %s4247_s24 = sshll.u32 %s4340_s5, 4  ;;  %s4248_s24 = int_to_ptr.vmem [resolvable:$false] %s4247_s24 }
0x101d   : > { %v3821_v10 = vld [vmem:[%s5259_s0] ss:$0 sm:$0xff]  ;;  %p4245_p3 = pnand %p4244_p2, %p4503_p4  ;;  %s4249_s25 = scalar_lea.vmem %s4248_s24, 256 }
0x101e   : > { %v3822_v45 = vld [vmem:[%s5260_s19] ss:$0 sm:$0xff]  ;;  %p4250_p6 = scmp.lt.s32.totalorder %s3528_s8, %s4248_s24  ;;  %p4251_p7 = scmp.lt.s32.totalorder %s4249_s25, %s4243_s11 }
0x101f   : > { %s3525_s9 = scalar_lea.hbm %s5261_s10, %s3826_s23  ;;  %p4246_p5 = pneg %p4245_p3 }
0x1020   : > { %p4252_p9 = por %p4251_p7, %p4250_p6 }
0x1022   : > { %p4253_p10 = pnand %p4252_p9, %p4246_p5 }
0x107a   : > { %v3482_v3 = vpop.xlane.xlu0 %3481 }
0x107b   : > { %v3483_v4 = vmul.f32 0.03125, %v3482_v3 }
0x107d   : > { %v3484_v5 = vadd.f32 1e-12, %v3483_v4 }
0x107f   : > { %4189 = vrsqrt.f32 %v3484_v5 }
0x108c   : > { %v4190_v6 = vpop.eup %4189 }
0x108d   : > { %v3486_v28 = vmul.f32 %v4190_v6, %v5047_v2 }
0x108f   : > { %v3493_v29 = vmul.f32 %v3821_v10, %v3486_v28 }
0x1091   : > { %v3500_v34 = vadd.f32 %v3822_v45, %v3493_v29 }
0x1093   : > { %3501 = vst.msk [vmem:[%s789_s21] sm:$0xff] %vm853_vm1, %v3500_v34 }
0x1094   : > { %4256 = shalt.err (!%p4253_p10)
}
0x1095   : > { %s4257_s12 = scalar_lea.hbm %s3525_s9, 128  ;;  %s4261_s4 = scalar_lea.hbm %s5261_s10, 256 }
0x1096   : > { %p4258_p11 = scmp.ne.s32.totalorder %s3525_s9, %s4257_s12  ;;  %p4262_p0 = scmp.lt.s32.totalorder %s3525_s9, %s5261_s10 }
0x1097   : > { %p4263_p1 = scmp.lt.s32.totalorder %s4261_s4, %s4257_s12 }
0x1098   : > { %p4259_p12 = pnand %p4258_p11, %p4503_p4 }
0x1099   : > { %p4264_p2 = por %p4263_p1, %p4262_p0 }
0x109a   : > { %p4260_p13 = pneg %p4259_p12 }
0x109c   : > { %p4265_p3 = pnand %p4264_p2, %p4260_p13 }
0x109e   : > { %4268 = shalt.err (!%p4265_p3)
}
0x109f   : > { %4057 = dma.vmem_to_hbm [thread:$0]  (%p4503_p4), %s3528_s8, 128, %s3525_s9, %s3503_s26  }
0x10a0 PF: > { %s5262_s23 = sld [smem:[#allocation11_spill]]  ;;  %p4073_p5 = scmp.ge.s32.totalorder %s4323_s1, 2 }
0x10a2   : > { %p4064_p6 = pnand %p4073_p5, %p4512_p8 }
0x10a4   : > { %p4065_p7 = pneg %p4064_p6 }
0x10a6   : > { %s3573_s29 = sand.u32 1, %s5262_s23  }
0x10a7   : > { %s3574_s2 = scalar_lea.sflag [#allocation5], %s3573_s29 }
0x10a8   : > { %4294 = dma.done.wait (%p4065_p7), %s3574_s2, 128  }
0x10a9   : > { %4296 = vsyncadd (%p4065_p7), %s3574_s2, 4294967168  ;;  %s5264_s11 = sadd.s32 4294967294, %s4323_s1  }
0x10aa   : > { %s3582_s5 = sand.u32 1, %s5264_s11  }
0x10ab   : > { %s3583_s24 = scalar_lea.sflag [#allocation7], %s3582_s5 }
0x10ac   : > { %4298 = dma.done.wait (%p4065_p7), %s3583_s24, 1024  }
0x10ad   : > { %4300 = vsyncadd (%p4065_p7), %s3583_s24, 4294966272  ;;  %s40_s1 = sadd.s32 1, %s4323_s1   ;;  %s5265_s7 = sld [smem:[#allocation12_spill]] }
0x10ae   : > { %p37_p4 = scmp.ge.s32.totalorder %s40_s1, 4   ;;  %s5266_s24 = sld [smem:[#allocation16_spill]] }
0x10af   : > { %s5267_s25 = sld [smem:[#allocation13_spill]]  ;;  %s5269_s4 = smov %s4307_s30 }
0x10b0   : > { %s5268_s5 = sld [smem:[#allocation14_spill]]  ;;  %39 = sbr.rel (!%p37_p4) target bundleno = 24 (0x18), region = 187 }
0x10b3   : > { %s5270_s30 = smov %s5265_s7 }
0x10b5   :  { %3597 = vsyncpa [#allocation5], 1 }
0x10b6   :  { %3599 = vsyncpa [#allocation5 + $0x1], 1 }
0x10b7   :  { %3600 = vsyncpa [#allocation7], 1 }
0x10b8   :  { %3602 = vsyncpa [#allocation7 + $0x1], 1 }

// kernel: decoder_forward.2
= control target key start
LH: loop header
LB: loop body
LE: loop exit
PB: predicated region body
PF: predicated region fallthrough
CT: control target
= control target key end

     0   :  { %s5120_s0 = inlined_call_operand.vmem [shape: f32[2,8,32], index: 0, kind: input, shape index: {}, may-alias: {0,1}]   ;;  %s5121_s1 = inlined_call_operand.vmem [shape: f32[2,8,32], index: 1, kind: input, shape index: {}, may-alias: {0,1}]   ;;  %s5122_s2 = inlined_call_operand.vmem [shape: f32[2,8,32], index: 2, kind: input, shape index: {}]   ;;  %s5123_s3 = inlined_call_operand.vmem [shape: f32[2,8,8], index: 3, kind: input, shape index: {}]   ;;  %s5124_s4 = inlined_call_operand.vmem [shape: f32[2,1,8], index: 4, kind: input, shape index: {}]   ;;  %s5125_s5 = inlined_call_operand.vmem [shape: bf16[32,32], index: 5, kind: input, shape index: {}]   ;;  %s5126_s6 = inlined_call_operand.vmem [shape: bf16[32,64], index: 6, kind: input, shape index: {}]   ;;  %s5127_s7 = inlined_call_operand.vmem [shape: bf16[32,32], index: 7, kind: input, shape index: {}]   ;;  %s5128_s8 = inlined_call_operand.vmem [shape: f32[1,32], index: 8, kind: input, shape index: {}]   ;;  %s5129_s9 = inlined_call_operand.vmem [shape: f32[1,32], index: 9, kind: input, shape index: {}]   ;;  %s5130_s10 = inlined_call_operand.vmem [shape: bf16[32,32], index: 10, kind: input, shape index: {}]   ;;  %s5131_s11 = inlined_call_operand.vmem [shape: bf16[32,64], index: 11, kind: input, shape index: {}]   ;;  %s5132_s12 = inlined_call_operand.vmem [shape: bf16[32,32], index: 12, kind: input, shape index: {}]   ;;  %s5133_s13 = inlined_call_operand.vmem [shape: f32[1,32], index: 13, kind: input, shape index: {}]   ;;  %s5134_s14 = inlined_call_operand.vmem [shape: f32[1,32], index: 14, kind: input, shape index: {}]   ;;  %s5135_s15 = inlined_call_operand.vmem [shape: bf16[32,64], index: 15, kind: input, shape index: {}]   ;;  %s5136_s16 = inlined_call_operand.vmem [shape: f32[1,64], index: 16, kind: input, shape index: {}]   ;;  %s5137_s17 = inlined_call_operand.vmem [shape: bf16[64,32], index: 17, kind: input, shape index: {}]   ;;  %s5138_s18 = inlined_call_operand.vmem [shape: f32[1,32], index: 18, kind: input, shape index: {}]   ;;  %s5139_s19 = inlined_call_operand.vmem [shape: f32[1,32], index: 19, kind: input, shape index: {}]   ;;  %s5140_s20 = inlined_call_operand.vmem [shape: f32[1,32], index: 20, kind: input, shape index: {}]   ;;  %s5141_s21 = inlined_call_operand.vmem [shape: f32[2,8,32], index: 21, kind: output, shape index: {0}]   ;;  %s5142_s22 = inlined_call_operand.hbm [shape: f32[2,4,8,8], index: 22, kind: output, shape index: {1}]   ;;  %s5143_s23 = inlined_call_operand.hbm [shape: f32[2,4,8,8], index: 23, kind: output, shape index: {2}]  }
   0x1   :  { %5161 = sst [smem:[#allocation17_spill]] %s5120_s0 }
   0x2   :  { %5162 = sst [smem:[#allocation18_spill]] %s5121_s1 }
   0x3   :  { %5163 = sst [smem:[#allocation19_spill]] %s5122_s2 }
   0x4   :  { %5164 = sst [smem:[#allocation20_spill]] %s5123_s3 }
   0x5   :  { %5165 = sst [smem:[#allocation21_spill]] %s5124_s4 }
   0x6   :  { %5166 = sst [smem:[#allocation22_spill]] %s5125_s5 }
   0x7   :  { %5167 = sst [smem:[#allocation23_spill]] %s5126_s6 }
   0x8   :  { %5168 = sst [smem:[#allocation24_spill]] %s5127_s7 }
   0x9   :  { %5169 = sst [smem:[#allocation25_spill]] %s5128_s8 }
   0xa   :  { %5170 = sst [smem:[#allocation26_spill]] %s5129_s9 }
   0xb   :  { %5171 = sst [smem:[#allocation27_spill]] %s5139_s19 }
   0xc   :  { %5172 = sst [smem:[#allocation28_spill]] %s5140_s20 }
   0xd   :  { %5173 = sst [smem:[#allocation29_spill]] %s5141_s21 }
   0xe   :  { %29 = vsyncpa [#allocation5], 0 }
   0xf   :  { %31 = vsyncpa [#allocation5 + $0x1], 0 }
  0x10   :  { %32 = vsyncpa [#allocation7], 0 }
  0x11   :  { %34 = vsyncpa [#allocation7 + $0x1], 0  ;;  %s4428_s4 = smov 0   ;;  %s4430_s30 = smov 0  }
  0x12   :  { %s4432_s24 = smov 0   ;;  %s4434_s25 = smov 0  }
  0x13   :  { %s4436_s5 = smov 0   ;;  %s4438_s1 = smov 0  }
  0x14 LB: > { %5174 = sst [smem:[#allocation10_spill]] %s4271_s4  ;;  %s3746_s26 = sadd.s32 4294967295, %s4291_s1   ;;  %s4291_s1 = sphi %s4438_s1, %s40_s1   ;;  %s4287_s5 = sphi %s4436_s5, %s5208_s5   ;;  %s4283_s25 = sphi %s4434_s25, %s5207_s25   ;;  %s4279_s24 = sphi %s4432_s24, %s5206_s24   ;;  %s4275_s30 = sphi %s4430_s30, %s5210_s30   ;;  %s4271_s4 = sphi %s4428_s4, %s5209_s4  }
  0x15   : > { %5175 = sst [smem:[#allocation11_spill]] %s4279_s24  ;;  %s3747_s2 = sadd.s32 4294967294, %s4291_s1  }
  0x16   : > { %5176 = sst [smem:[#allocation12_spill]] %s4287_s5  ;;  %s52_s6 = sadd.s32 1, %s4287_s5 }
  0x17   : > { %5177 = sst [smem:[#allocation13_spill]] %s4291_s1  ;;  %s559_s27 = sadd.s32 1, %s4279_s24 }
  0x18   : > { %p54_p0 = scmp.ge.s32.totalorder %s52_s6, 2  ;;  %p569_p1 = scmp.ne.s32.totalorder %s4279_s24, %s4275_s30 }
  0x19   : > { %p570_p2 = scmp.eq.s32.totalorder %s3746_s26, 1  ;;  %p575_p3 = scmp.ne.s32.totalorder %s4275_s30, %s4271_s4 }
  0x1a   : > { %s5212_s6 = smov (%p54_p0, %s52_s6), 0  ;;  %p576_p5 = scmp.eq.s32.totalorder %s3747_s2, 1 }
  0x1b   : > { %5178 = sst [smem:[#allocation14_spill]] %s5212_s6  ;;  %p4468_p4 = por %p570_p2, %p569_p1 }
  0x1c   : > { %s554_s28 = ssub.s32 %s4287_s5, %s5212_s6  ;;  %p3750_p6 = scmp.ge.s32.totalorder %s4291_s1, 1 }
  0x1d   : > { %p557_p7 = scmp.eq.s32.totalorder %s554_s28, 0  ;;  %p4475_p8 = por %p576_p5, %p575_p3 }
  0x1e   : > { %p710_p9 = scmp.lt.s32.totalorder %s4291_s1, 3 }
  0x1f   : > { %s5180_s29 = scalar_select %p4475_p8, 1, 0 }
  0x20   : > { %s4481_s3 = scalar_select %p557_p7, %s4279_s24, %s559_s27  }
  0x21   : > { %5181 = sst [smem:[#allocation15_spill]] %s5180_s29  ;;  %p711_p10 = pnand %p3750_p6, %p710_p9 }
  0x22   : > { %5182 = sst [smem:[#allocation16_spill]] %s4481_s3  ;;  %p806_p11 = scmp.lt.s32.totalorder (!%p711_p10), %s4283_s25, 1 }
  0x23   : > { %714 = sbr.rel (%p711_p10) target bundleno = 4241 (0x1091), region = 104  ;;  %s5183_s4 = sld [smem:[#allocation23_spill]] (!%p711_p10) }
  0x24   : > { %s5185_s2 = sld [smem:[#allocation22_spill]] (!%p711_p10)  ;;  %s4296_s24 = smov (!%p711_p10), 120  }
  0x25   : > { %s5186_s6 = sld [smem:[#allocation18_spill]] (!%p711_p10)  ;;  %s4297_s26 = smov (!%p711_p10), 112  }
  0x26   : > { %s5187_s29 = sld [smem:[#allocation17_spill]] (!%p711_p10)  ;;  %s5156_s28 = smov (!%p711_p10), 8  }
  0x27   : > { %s5188_s3 = sld [smem:[#allocation19_spill]] (!%p711_p10) }
  0x28   : > { %v4293_v1 = vmov 0.0   ;;  %vm4294_vm0 = vmmov 0   ;;  %vm862_vm1 = vcmask 261120   ;;  %vm907_vm2 = vcmask 519168   ;;  %v4133_v15 = vld [vmem:[%s5131_s11 + $0x8] sm:$0xff]   ;;  %v4134_v19 = vld [vmem:[%s5131_s11] sm:$0xff]  }
  0x29   : > { %s5184_s21 = smov %s5183_s4  ;;  %v4129_v0 = vld [vmem:[%s5183_s4 + $0x8] sm:$0xff]   ;;  %3892 = vmatprep.subr.bf16.mxu0 %v4293_v1  ;;  %3900 = vmatprep.subr.bf16.mxu1 %v4293_v1  ;;  %v4298_v23 = vmov 1983009808   ;;  %v1055_v25 = vlaneseq  ;;  %v4299_v28 = vmov 1934713408   ;;  %vm1489_vm3 = vcmask 64512  }
  0x2a   : > { %3893 = vmatpush3.bf16.msra.mxu0 %v4129_v0  ;;  %v4130_v2 = vld [vmem:[%s5184_s21] sm:$0xff]   ;;  %3896 = vmatprep.mubr.msk.bf16.mxu0 %vm4294_vm0, %v4293_v1  ;;  %s4498_s4 = scalar_select %p806_p11, %s4283_s25, 1  ;;  %v4131_v3 = vld [vmem:[%s5185_s2 + $0x8] sm:$0xff]   ;;  %v1053_v24 = vunpack.c.l.s4 %v4298_v23  ;;  %v1085_v29 = vunpack.c.l.s4 %v4299_v28  ;;  %vm1729_vm4 = vcmask 1043456   ;;  %vm2060_vm5 = vcmask 130048  }
  0x2b   : > { %3894 = vmatprep.subr.bf16.mxu0 %v4293_v1  ;;  %3904 = vmatprep.mubr.msk.bf16.mxu1 %vm4294_vm0, %v4293_v1  ;;  %v4132_v6 = vld [vmem:[%s5185_s2] sm:$0xff]   ;;  %s4295_s21 = smov 104   ;;  %v4562_v27 = vshrl.u32 %v1055_v25, 7  ;;  %s5189_s20 = sld [smem:[#allocation20_spill]]  ;;  %vm2062_vm6 = vcmask 195584   ;;  %vm3436_vm7 = vcmask 523264  }
  0x2c   : > { %s4501_s27 = sshll.u32 %s4498_s4, 3  ;;  %3901 = vmatpush3.bf16.msra.mxu1 %v4133_v15  ;;  %v1054_v26 = vunpack.c.0.s8 %v1053_v24  ;;  %v1086_v36 = vunpack.c.0.s8 %v1085_v29  ;;  %s5190_s19 = sld [smem:[#allocation24_spill]] }
  0x2d   : > { %s816_s5 = scalar_lea.vmem %s5186_s6, %s4501_s27  ;;  %s812_s1 = scalar_lea.vmem %s5187_s29, %s4501_s27  ;;  %3902 = vmatprep.subr.bf16.mxu1 %v4293_v1 }
  0x2e   : > { %3895 = vmatpush3.bf16.msra.mxu0 %v4130_v2  ;;  %v844_v4 = vld [vmem:[%s816_s5] sm:$0xff]  ;;  %s820_s0 = scalar_lea.vmem %s5188_s3, %s4501_s27  ;;  %v4571_v34 = vsub.s32 %v1054_v26, %v4562_v27  ;;  %v4583_v44 = vsub.s32 %v1086_v36, %v4562_v27  ;;  %s4666_s6 = sand.u32 1, %s4275_s30  }
  0x2f   : > { %3908 = vmatprep.subr.bf16.mxu0 %v4293_v1  ;;  %v845_v5 = vpack.c.bf16 %v844_v4, %v844_v4  ;;  %v4518_v7 = vld [vmem:[%s812_s1] sm:$0xff]  ;;  %s4301_s1 = smov 96   ;;  %s3751_s29 = sshll.u32 %s4666_s6, 5 }
  0x30   : > { %v972_v8 = vpack.c.bf16 %v4518_v7, %v4518_v7  ;;  %3903 = vmatpush3.bf16.msra.mxu1 %v4134_v19  ;;  %v909_v21 = vld [vmem:[%s820_s0] sm:$0xff]  ;;  %s4679_s3 = scalar_lea.vmem [#allocation4], %s3751_s29  ;;  %s5158_s0 = smov 16  }
  0x31   : > { %3897 = vmatmul.mubr.msk.bf16.vlgmr.msra.gmra.mxu0 %vm862_vm1, %v845_v5  ;;  %v910_v22 = vpack.c.bf16 %v909_v21, %v909_v21  ;;  %3916 = vmatprep.subr.bf16.mxu1 %v4293_v1  ;;  %s827_s5 = scalar_lea.vmem %s5189_s20, %s4501_s27  ;;  %s5155_s20 = smov 24  }
  0x32   : > { %3909 = vmatpush3.bf16.msra.mxu0 %v4131_v3  ;;  %3912 = vmatprep.mubr.msk.bf16.mxu0 %vm4294_vm0, %v4293_v1  ;;  %s5191_s8 = sld [smem:[#allocation25_spill]] }
  0x33   : > { %3910 = vmatprep.subr.bf16.mxu0 %v4293_v1  ;;  %3905 = vmatmul.mubr.msk.bf16.vlgmr.msra.gmra.mxu1 %vm862_vm1, %v910_v22  ;;  %s5192_s9 = sld [smem:[#allocation26_spill]] }
  0x34   : > { %3918 = vmatprep.mubr.msk.bf16.mxu1 %vm4294_vm0, %v4293_v1 }
  0x36   : > { %3911 = vmatpush3.bf16.msra.mxu0 %v4132_v6 }
  0x37   : > { %3922 = vmatprep.subr.bf16.mxu0 %v4293_v1 }
  0x39   : > { %3913 = vmatmul.mubr.msk.bf16.vlgmr.msra.gmra.mxu0 %vm862_vm1, %v972_v8 }
  0x3a   : > { %3924 = vmatprep.mubr.msk.bf16.mxu0 %vm4294_vm0, %v4293_v1 }
  0xf1   : > { %v900_v9 = vpop.f32.mrf.mxu0 }
  0xf2   : > { %v906_v10 = vpack.c.bf16 %v900_v9, %v900_v9 }
  0xf3   : > { %v3898_v11 = vpop.f32.mrf.mxu0 }
  0xf4   : > { %908 = vst.msk [vmem:[#allocation2] sm:$0xf] %vm907_vm2, %v906_v10 }
  0xf5   : > { %v903_v12 = vpop.f32.mrf.mxu0 }
  0xf7   : > { %v3899_v13 = vpop.f32.mrf.mxu0 }
  0xf9   : > { %v4531_v14 = vpop.f32.mrf.mxu0 }
  0xfb   : > { %v4536_v16 = vld [vmem:[#allocation2] sm:$0xf]  ;;  %v3914_v17 = vpop.f32.mrf.mxu0 }
  0xfc   : > { %1195 = vrot.lane.b32.xlu1 %v4536_v16, %s4295_s21  ;;  %1191 = vrot.lane.b32.xlu0 %v4536_v16, %s4296_s24  ;;  %v1200_v33 = vshrl.u32 %v4536_v16, 16 }
  0xfd   : > { %v1030_v18 = vpop.f32.mrf.mxu0 }
  0xff   : > { %v3915_v20 = vpop.f32.mrf.mxu0 }
 0x100   : > { %1193 = vrot.lane.b32.xlu0 %v4536_v16, %s4297_s26  ;;  %1041 = vrot.lane.b32.xlu1 %v4531_v14, %s4296_s24 }
 0x104   : > { %1044 = vrot.lane.b32.xlu0 %v4531_v14, %s4297_s26  ;;  %1047 = vrot.lane.b32.xlu1 %v4531_v14, %s4295_s21 }
 0x16e   : > { %v4564_v30 = vpop.permute.xlu1 %1195  ;;  %v4566_v31 = vpop.permute.xlu0 %1191 }
 0x16f   : > { %v1201_v32 = vshrl.u32 %v4566_v31, 16  ;;  %v1199_v35 = vpack.i.b16 %v4566_v31, %v4536_v16  ;;  %v1207_v40 = vshrl.u32 %v4564_v30, 16 }
 0x171   : > { %v1202_v37 = vpack.i.b16 %v1201_v32, %v1200_v33  ;;  %v1216_v43 = vrot.slane %v1199_v35, %v4571_v34 }
 0x172   : > { %v4575_v38 = vpop.permute.xlu0 %1193  ;;  %v1042_v39 = vpop.permute.xlu1 %1041 }
 0x173   : > { %v1205_v41 = vpack.i.b16 %v4564_v30, %v4575_v38  ;;  %v1206_v42 = vshrl.u32 %v4575_v38, 16  ;;  %v1250_v47 = vrot.slane %v1202_v37, %v4571_v34 }
 0x175   : > { %v1208_v45 = vpack.i.b16 %v1207_v40, %v1206_v42  ;;  %v1224_v46 = vrot.slane %v1205_v41, %v4571_v34 }
 0x176   : > { %v1045_v48 = vpop.permute.xlu0 %1044  ;;  %v1048_v49 = vpop.permute.xlu1 %1047 }
 0x177   : > { %v1225_v50 = vcombine.low %v1216_v43, %v1224_v46  ;;  %v1226_v51 = vcombine.high %v1216_v43, %v1224_v46  ;;  %v1258_v52 = vrot.slane %v1208_v45, %v4571_v34  ;;  %v1050_v53 = vcombine.low %v4531_v14, %v1045_v48 }
 0x178   : > { %v1051_v54 = vcombine.high %v4531_v14, %v1045_v48  ;;  %v1066_v55 = vcombine.low %v1042_v39, %v1048_v49  ;;  %v1067_v56 = vcombine.high %v1042_v39, %v1048_v49  ;;  %v4300_v45 = vmov 0  }
 0x179   : > { %v1233_v57 = vrot.slane %v1225_v50, %v4583_v44  ;;  %v1240_v58 = vrot.slane %v1226_v51, %v4583_v44  ;;  %v1259_v59 = vcombine.low %v1250_v47, %v1258_v52  ;;  %v1260_v60 = vcombine.high %v1250_v47, %v1258_v52 }
 0x17a   : > { %v1058_v61 = vrot.slane %v1050_v53, %v4571_v34  ;;  %v1065_v62 = vrot.slane %v1051_v54, %v4571_v34  ;;  %v1074_v63 = vrot.slane %v1066_v55, %v4571_v34  ;;  %v1081_v0 = vrot.slane %v1067_v56, %v4571_v34 }
 0x17b   : > { %v1267_v2 = vrot.slane %v1259_v59, %v4583_v44  ;;  %v1274_v3 = vrot.slane %v1260_v60, %v4583_v44  ;;  %v1277_v4 = vcombine.low %v1233_v57, %v1240_v58  ;;  %v3769_v5 = vcombine.high %v1233_v57, %v1240_v58 }
 0x17c   : > { %v1082_v6 = vcombine.low %v1058_v61, %v1074_v63  ;;  %v1083_v8 = vcombine.high %v1058_v61, %v1074_v63  ;;  %v1098_v9 = vcombine.low %v1065_v62, %v1081_v0  ;;  %v1099_v10 = vcombine.high %v1065_v62, %v1081_v0 }
 0x17d   : > { %v1284_v11 = vrot.slane %v1277_v4, %v4571_v34  ;;  %v1292_v12 = vrot.slane %v3769_v5, %v4571_v34  ;;  %v1302_v13 = vcombine.low %v1267_v2, %v1274_v3  ;;  %v3770_v14 = vcombine.high %v1267_v2, %v1274_v3 }
 0x17e   : > { %v1090_v15 = vrot.slane %v1082_v6, %v4583_v44  ;;  %v1097_v17 = vrot.slane %v1083_v8, %v4583_v44  ;;  %v1106_v18 = vrot.slane %v1098_v9, %v4583_v44  ;;  %v1113_v19 = vrot.slane %v1099_v10, %v4583_v44  ;;  %v964_v9 = vpop.f32.mrf.mxu1 }
 0x17f   : > { %v1293_v20 = vcombine.low %v1284_v11, %v1292_v12  ;;  %v1309_v21 = vrot.slane %v1302_v13, %v4571_v34  ;;  %v1317_v22 = vrot.slane %v3770_v14, %v4571_v34  ;;  %v970_v10 = vpack.c.bf16 %v964_v9, %v964_v9  ;;  %v1033_v14 = vld [vmem:[%s827_s5] sm:$0xff]  ;;  %s5194_s5 = smov 16  }
 0x180   : > { %v1118_v23 = vcombine.low %v1090_v15, %v1097_v17  ;;  %v3767_v24 = vcombine.high %v1090_v15, %v1097_v17  ;;  %v1134_v25 = vcombine.low %v1106_v18, %v1113_v19  ;;  %v3768_v26 = vcombine.high %v1106_v18, %v1113_v19  ;;  %v3906_v11 = vpop.f32.mrf.mxu1 }
 0x181   : > { %v1300_v28 = vrot.slane %v1293_v20, %v4583_v44  ;;  %v1318_v29 = vcombine.low %v1309_v21, %v1317_v22  ;;  %971 = vst.msk [vmem:[#allocation3] sm:$0xf] %vm907_vm2, %v970_v10  ;;  %v1034_v15 = vmul.f32 -1e+30, %v1033_v14 }
 0x182   : > { %v1125_v32 = vrot.slane %v1118_v23, %v4571_v34  ;;  %v1133_v33 = vrot.slane %v3767_v24, %v4571_v34  ;;  %v1141_v35 = vrot.slane %v1134_v25, %v4571_v34  ;;  %v1149_v36 = vrot.slane %v3768_v26, %v4571_v34  ;;  %v967_v12 = vpop.f32.mrf.mxu1 }
 0x183   : > { %v1325_v37 = vrot.slane %v1318_v29, %v4583_v44  ;;  %v1330_v42 = vshrl.u32 %v1300_v28, 16  ;;  %v1301_v51 = vcombine.high %v1300_v28, %v4300_v45 }
 0x184   : > { %v1150_v39 = vcombine.low %v1125_v32, %v1133_v33  ;;  %v1166_v40 = vcombine.low %v1141_v35, %v1149_v36  ;;  %v1151_v52 = vcombine.high %v1125_v32, %v1133_v33  ;;  %v1167_v53 = vcombine.high %v1141_v35, %v1149_v36  ;;  %v3907_v13 = vpop.f32.mrf.mxu1 }
 0x185   : > { %v1329_v41 = vpack.i.b16 %v1325_v37, %v1300_v28  ;;  %v1331_v43 = vshrl.u32 %v1325_v37, 16  ;;  %v1326_v46 = vcombine.high %v1325_v37, %v4300_v45  ;;  %v1336_v59 = vshrl.u32 %v1301_v51, 16 }
 0x186   : > { %v1158_v47 = vrot.slane %v1150_v39, %v4583_v44  ;;  %v1174_v48 = vrot.slane %v1166_v40, %v4583_v44  ;;  %v1165_v62 = vrot.slane %v1151_v52, %v4583_v44  ;;  %v1181_v63 = vrot.slane %v1167_v53, %v4583_v44 }
 0x187   : > { %v1494_v49 = vsel %vm1489_vm3, %v1329_v41, 0  ;;  %v1332_v50 = vpack.i.b16 %v1331_v43, %v1330_v42  ;;  %v1337_v56 = vshrl.u32 %v1326_v46, 16  ;;  %v1335_v57 = vpack.i.b16 %v1326_v46, %v1301_v51 }
 0x188   : > { %3917 = vmatpush3.bf16.xpose.msra.mxu1 %v1494_v49  ;;  %v1182_v55 = vcombine.low %v1158_v47, %v1174_v48  ;;  %v1183_v58 = vcombine.high %v1158_v47, %v1174_v48  ;;  %v1184_v4 = vcombine.low %v1165_v62, %v1181_v63  ;;  %v1185_v5 = vcombine.high %v1165_v62, %v1181_v63 }
 0x189   : > { %v1540_v54 = vsel %vm1489_vm3, %v1332_v50, 0  ;;  %3928 = vmatprep.subr.bf16.mxu1 %v4293_v1  ;;  %v1338_v61 = vpack.i.b16 %v1337_v56, %v1336_v59  ;;  %v1586_v0 = vsel %vm1489_vm3, %v1335_v57, 0 }
 0x18a   : > { %3923 = vmatpush3.bf16.xpose.msra.mxu0 %v1540_v54  ;;  %v1186_v60 = vpack.c.bf16 %v1182_v55, %v1182_v55  ;;  %v1187_v2 = vpack.c.bf16 %v1183_v58, %v1183_v58  ;;  %v1188_v6 = vpack.c.bf16 %v1184_v4, %v1184_v4  ;;  %v1189_v8 = vpack.c.bf16 %v1185_v5, %v1185_v5 }
 0x18b   : > { %3934 = vmatprep.subr.bf16.mxu0 %v4293_v1  ;;  %v1632_v3 = vsel %vm1489_vm3, %v1338_v61, 0 }
 0x18f   : > { %3919 = vmatmul.mubr.msk.bf16.vlgmr.msra.gmra.mxu1 %vm1489_vm3, %v1186_v60 }
 0x190   : > { %3929 = vmatpush3.bf16.xpose.msra.mxu1 %v1586_v0  ;;  %3930 = vmatprep.mubr.msk.bf16.mxu1 %vm4294_vm0, %v4293_v1 }
 0x191   : > { %3925 = vmatmul.mubr.msk.bf16.vlgmr.msra.gmra.mxu0 %vm1489_vm3, %v1187_v2  ;;  %3940 = vmatprep.subr.bf16.mxu1 %v4293_v1 }
 0x192   : > { %3935 = vmatpush3.bf16.xpose.msra.mxu0 %v1632_v3  ;;  %3936 = vmatprep.mubr.msk.bf16.mxu0 %vm4294_vm0, %v4293_v1 }
 0x193   : > { %3946 = vmatprep.subr.bf16.mxu0 %v4293_v1 }
 0x197   : > { %3931 = vmatmul.mubr.msk.bf16.vlgmr.msra.gmra.mxu1 %vm1489_vm3, %v1188_v6 }
 0x198   : > { %3942 = vmatprep.mubr.msk.bf16.mxu1 %vm4294_vm0, %v4293_v1 }
 0x199   : > { %3937 = vmatmul.mubr.msk.bf16.vlgmr.msra.gmra.mxu0 %vm1489_vm3, %v1189_v8 }
 0x19a   : > { %3948 = vmatprep.mubr.msk.bf16.mxu0 %vm4294_vm0, %v4293_v1 }
 0x24f   : > { %v1530_v17 = vpop.f32.mrf.mxu1 }
 0x250   : > { %v1531_v18 = vadd.f32 %v1530_v17, %v1034_v15 }
 0x251   : > { %v3920_v19 = vpop.f32.mrf.mxu1  ;;  %v1576_v20 = vpop.f32.mrf.mxu0 }
 0x252   : > { %v1577_v21 = vadd.f32 %v1576_v20, %v1034_v15  ;;  %v1674_v22 = vsel %vm1489_vm3, %v1531_v18, -inf }
 0x253   : > { %1675 = vmax.xlane.f32.xlu0 %v1674_v22  ;;  %v1533_v23 = vpop.f32.mrf.mxu1  ;;  %v3926_v24 = vpop.f32.mrf.mxu0 }
 0x254   : > { %v1677_v25 = vsel %vm1489_vm3, %v1577_v21, -inf }
 0x255   : > { %v3921_v26 = vpop.f32.mrf.mxu1  ;;  %1678 = vmax.xlane.f32.xlu1 %v1677_v25  ;;  %v1579_v28 = vpop.f32.mrf.mxu0 }
 0x257   : > { %v3927_v29 = vpop.f32.mrf.mxu0  ;;  %v1622_v32 = vpop.f32.mrf.mxu1 }
 0x258   : > { %v1623_v33 = vadd.f32 %v1622_v32, %v1034_v15 }
 0x259   : > { %v3932_v35 = vpop.f32.mrf.mxu1  ;;  %v1668_v36 = vpop.f32.mrf.mxu0 }
 0x25a   : > { %v1669_v37 = vadd.f32 %v1668_v36, %v1034_v15  ;;  %v1680_v39 = vsel %vm1489_vm3, %v1623_v33, -inf }
 0x25b   : > { %1681 = vmax.xlane.f32.xlu0 %v1680_v39  ;;  %v1625_v40 = vpop.f32.mrf.mxu1  ;;  %v3938_v41 = vpop.f32.mrf.mxu0 }
 0x25c   : > { %v1683_v46 = vsel %vm1489_vm3, %v1669_v37, -inf }
 0x25d   : > { %v3933_v42 = vpop.f32.mrf.mxu1  ;;  %v1671_v43 = vpop.f32.mrf.mxu0 }
 0x25f   : > { %1684 = vmax.xlane.f32.xlu0 %v1683_v46  ;;  %v3939_v47 = vpop.f32.mrf.mxu0 }
 0x266   : > { %1339 = vrot.lane.b32.xlu1 %v4536_v16, %s4301_s1 }
 0x2dc   : > { %v1676_v48 = vpop.xlane.xlu0 %1675 }
 0x2dd   : > { %v1686_v49 = vsub.f32 %v1531_v18, %v1676_v48 }
 0x2de   : > { %v1679_v50 = vpop.xlane.xlu1 %1678 }
 0x2df   : > { %v1690_v51 = vmul.f32 1.442695, %v1686_v49  ;;  %v1687_v52 = vsub.f32 %v1577_v21, %v1679_v50 }
 0x2e1   : > { %4147 = vpow2.f32 %v1690_v51  ;;  %v1692_v53 = vmul.f32 1.442695, %v1687_v52 }
 0x2e3   : > { %4149 = vpow2.f32 %v1692_v53 }
 0x2e4   : > { %v1682_v16 = vpop.xlane.xlu0 %1681 }
 0x2e5   : > { %v1688_v59 = vsub.f32 %v1623_v33, %v1682_v16 }
 0x2e7   : > { %v1694_v61 = vmul.f32 1.442695, %v1688_v59 }
 0x2e8   : > { %v1685_v58 = vpop.xlane.xlu0 %1684 }
 0x2e9   : > { %v1689_v60 = vsub.f32 %v1669_v37, %v1685_v58  ;;  %4151 = vpow2.f32 %v1694_v61 }
 0x2eb   : > { %v1696_v62 = vmul.f32 1.442695, %v1689_v60 }
 0x2ed   : > { %4153 = vpow2.f32 %v1696_v62 }
 0x2ee   : > { %v4148_v54 = vpop.eup %4147 }
 0x2ef   : > { %v1698_v55 = vsel %vm1489_vm3, %v4148_v54, 0.0 }
 0x2f0   : > { %v4150_v56 = vpop.eup %4149  ;;  %1699 = vadd.xlane.f32.xlu1 %v1698_v55 }
 0x2f1   : > { %v1701_v57 = vsel %vm1489_vm3, %v4150_v56, 0.0 }
 0x2f2   : > { %1702 = vadd.xlane.f32.xlu0 %v1701_v57 }
 0x2f6   : > { %v4657_v63 = vpop.eup %4151 }
 0x2fa   : > { %v4659_v0 = vpop.eup %4153 }
 0x301   : > { %1343 = vrot.lane.b32.xlu1 %v4575_v38, %s4301_s1  ;;  %v1704_v38 = vsel %vm1489_vm3, %v4657_v63, 0.0 }
 0x305   : > { %1345 = vrot.lane.b32.xlu1 %v4564_v30, %s4301_s1  ;;  %v1707_v30 = vsel %vm1489_vm3, %v4659_v0, 0.0 }
 0x308   : > { %1341 = vrot.lane.b32.xlu0 %v4566_v31, %s4301_s1  ;;  %v1340_v31 = vpop.permute.xlu1 %1339 }
 0x309   : > { %v1350_v6 = vshrl.u32 %v1340_v31, 16 }
 0x327   : > { %1705 = vadd.xlane.f32.xlu0 %v1704_v38 }
 0x329   : > { %1708 = vadd.xlane.f32.xlu1 %v1707_v30 }
 0x379   : > { %v1700_v2 = vpop.xlane.xlu1 %1699 }
 0x37a   : > { %4155 = vrcp.f32 %v1700_v2 }
 0x37b   : > { %v1703_v3 = vpop.xlane.xlu0 %1702 }
 0x37c   : > { %4157 = vrcp.f32 %v1703_v3 }
 0x37d   : > { %v1344_v4 = vpop.permute.xlu1 %1343 }
 0x37e   : > { %v1356_v11 = vshrl.u32 %v1344_v4, 16 }
 0x37f   : > { %v1342_v5 = vpop.permute.xlu0 %1341 }
 0x380   : > { %v1349_v8 = vpack.i.b16 %v1342_v5, %v1340_v31  ;;  %v1351_v9 = vshrl.u32 %v1342_v5, 16 }
 0x381   : > { %v1346_v10 = vpop.permute.xlu1 %1345 }
 0x382   : > { %v1352_v12 = vpack.i.b16 %v1351_v9, %v1350_v6  ;;  %v1355_v13 = vpack.i.b16 %v1346_v10, %v1344_v4  ;;  %v1357_v14 = vshrl.u32 %v1346_v10, 16  ;;  %v1366_v15 = vrot.slane %v1349_v8, %v4571_v34 }
 0x384   : > { %v1358_v17 = vpack.i.b16 %v1357_v14, %v1356_v11  ;;  %v1374_v18 = vrot.slane %v1355_v13, %v4571_v34  ;;  %v1400_v19 = vrot.slane %v1352_v12, %v4571_v34 }
 0x386   : > { %v1375_v20 = vcombine.low %v1366_v15, %v1374_v18  ;;  %v1376_v21 = vcombine.high %v1366_v15, %v1374_v18  ;;  %v1408_v22 = vrot.slane %v1358_v17, %v4571_v34 }
 0x387   : > { %v4156_v23 = vpop.eup %4155 }
 0x388   : > { %v1383_v24 = vrot.slane %v1375_v20, %v4583_v44  ;;  %v1390_v25 = vrot.slane %v1376_v21, %v4583_v44  ;;  %v1409_v26 = vcombine.low %v1400_v19, %v1408_v22  ;;  %v1410_v28 = vcombine.high %v1400_v19, %v1408_v22 }
 0x389   : > { %v4158_v29 = vpop.eup %4157  ;;  %v1714_v32 = vmul.f32 %v4156_v23, %v4148_v54 }
 0x38a   : > { %v1417_v33 = vrot.slane %v1409_v26, %v4583_v44  ;;  %v1424_v35 = vrot.slane %v1410_v28, %v4583_v44  ;;  %v1427_v36 = vcombine.low %v1383_v24, %v1390_v25  ;;  %v3771_v37 = vcombine.high %v1383_v24, %v1390_v25 }
 0x38b   : > { %1718 = vst.msk [vmem:[%s4679_s3] sm:$0xff] %vm1489_vm3, %v1714_v32  ;;  %v1715_v39 = vmul.f32 %v4158_v29, %v4150_v56  ;;  %v1722_v62 = vpack.c.bf16 %v1714_v32, %v1714_v32 }
 0x38c   : > { %v1434_v40 = vrot.slane %v1427_v36, %v4571_v34  ;;  %v1442_v41 = vrot.slane %v3771_v37, %v4571_v34  ;;  %v1452_v42 = vcombine.low %v1417_v33, %v1424_v35  ;;  %v3772_v43 = vcombine.high %v1417_v33, %v1424_v35 }
 0x38d   : > { %1719 = vst.msk [vmem:[%s4679_s3 + $0x8] sm:$0xff] %vm1489_vm3, %v1715_v39  ;;  %v1723_v31 = vpack.c.bf16 %v1715_v39, %v1715_v39 }
 0x38e   : > { %v1459_v46 = vrot.slane %v1452_v42, %v4571_v34  ;;  %v1467_v47 = vrot.slane %v3772_v43, %v4571_v34  ;;  %v1443_v48 = vcombine.low %v1434_v40, %v1442_v41  ;;  %v4135_v43 = vld [vmem:[%s5190_s19 + $0x8] sm:$0xff]  }
 0x390   : > { %v1450_v49 = vrot.slane %v1443_v48, %v4583_v44  ;;  %v1468_v50 = vcombine.low %v1459_v46, %v1467_v47 }
 0x392   : > { %v1475_v51 = vrot.slane %v1468_v50, %v4583_v44  ;;  %v1451_v52 = vcombine.high %v1450_v49, %v4300_v45  ;;  %v1480_v54 = vshrl.u32 %v1450_v49, 16 }
 0x394   : > { %v1479_v53 = vpack.i.b16 %v1475_v51, %v1450_v49  ;;  %v1481_v55 = vshrl.u32 %v1475_v51, 16  ;;  %v1476_v56 = vcombine.high %v1475_v51, %v4300_v45  ;;  %v1486_v57 = vshrl.u32 %v1451_v52, 16 }
 0x396   : > { %v1731_v16 = vsel %vm1729_vm4, %v1479_v53, 0  ;;  %v1482_v58 = vpack.i.b16 %v1481_v55, %v1480_v54  ;;  %v1485_v59 = vpack.i.b16 %v1476_v56, %v1451_v52  ;;  %v1487_v60 = vshrl.u32 %v1476_v56, 16  ;;  %v4136_v55 = vld [vmem:[%s5190_s19] sm:$0xff]  }
 0x397   : > { %3941 = vmatpush3.bf16.msra.mxu1 %v1731_v16 }
 0x398   : > { %v1777_v61 = vsel %vm1729_vm4, %v1482_v58, 0  ;;  %3952 = vmatprep.subr.bf16.mxu1 %v4293_v1  ;;  %v1488_v38 = vpack.i.b16 %v1487_v60, %v1486_v57  ;;  %v1823_v30 = vsel %vm1729_vm4, %v1485_v59, 0 }
 0x399   : > { %3947 = vmatpush3.bf16.msra.mxu0 %v1777_v61 }
 0x39a   : > { %3943 = vmatmul.mubr.msk.bf16.vlgmr.msra.gmra.mxu1 %vm1489_vm3, %v1722_v62  ;;  %3958 = vmatprep.subr.bf16.mxu0 %v4293_v1  ;;  %v1869_v2 = vsel %vm1729_vm4, %v1488_v38, 0 }
 0x39b   : > { %3953 = vmatpush3.bf16.msra.mxu1 %v1823_v30  ;;  %3954 = vmatprep.mubr.msk.bf16.mxu1 %vm4294_vm0, %v4293_v1 }
 0x39c   : > { %3949 = vmatmul.mubr.msk.bf16.vlgmr.msra.gmra.mxu0 %vm1489_vm3, %v1723_v31  ;;  %3964 = vmatprep.subr.bf16.mxu1 %v4293_v1 }
 0x39d   : > { %3959 = vmatpush3.bf16.msra.mxu0 %v1869_v2  ;;  %3960 = vmatprep.mubr.msk.bf16.mxu0 %vm4294_vm0, %v4293_v1 }
 0x39e   : > { %3972 = vmatprep.subr.bf16.mxu0 %v4293_v1 }
 0x3b0   : > { %v1706_v3 = vpop.xlane.xlu0 %1705 }
 0x3b1   : > { %4159 = vrcp.f32 %v1706_v3 }
 0x3b2   : > { %v1709_v4 = vpop.xlane.xlu1 %1708 }
 0x3b3   : > { %4161 = vrcp.f32 %v1709_v4 }
 0x3be   : > { %v4160_v5 = vpop.eup %4159 }
 0x3bf   : > { %v1716_v6 = vmul.f32 %v4160_v5, %v4657_v63 }
 0x3c0   : > { %v4162_v8 = vpop.eup %4161 }
 0x3c1   : > { %1720 = vst.msk [vmem:[%s4679_s3 + $0x10] sm:$0xff] %vm1489_vm3, %v1716_v6  ;;  %v1724_v9 = vpack.c.bf16 %v1716_v6, %v1716_v6  ;;  %v1717_v10 = vmul.f32 %v4162_v8, %v4659_v0 }
 0x3c3   : > { %3955 = vmatmul.mubr.msk.bf16.vlgmr.msra.gmra.mxu1 %vm1489_vm3, %v1724_v9  ;;  %1721 = vst.msk [vmem:[%s4679_s3 + $0x18] sm:$0xff] %vm1489_vm3, %v1717_v10  ;;  %v1725_v11 = vpack.c.bf16 %v1717_v10, %v1717_v10 }
 0x3c4   : > { %3968 = vmatprep.mubr.msk.bf16.mxu1 %vm4294_vm0, %v4293_v1  ;;  %3965 = vmatpush3.bf16.msra.mxu1 %v4135_v43 }
 0x3c5   : > { %3961 = vmatmul.mubr.msk.bf16.vlgmr.msra.gmra.mxu0 %vm1489_vm3, %v1725_v11  ;;  %3966 = vmatprep.subr.bf16.mxu1 %v4293_v1 }
 0x3c6   : > { %3976 = vmatprep.mubr.msk.bf16.mxu0 %vm4294_vm0, %v4293_v1 }
 0x3c8   : > { %3967 = vmatpush3.bf16.msra.mxu1 %v4136_v55 }
 0x3c9   : > { %3980 = vmatprep.subr.bf16.mxu1 %v4293_v1 }
 0x45a   : > { %v1767_v63 = vpop.f32.mrf.mxu1 }
 0x45c   : > { %v3944_v12 = vpop.f32.mrf.mxu1  ;;  %v1813_v13 = vpop.f32.mrf.mxu0 }
 0x45e   : > { %v1770_v14 = vpop.f32.mrf.mxu1  ;;  %v3950_v15 = vpop.f32.mrf.mxu0 }
 0x460   : > { %v3945_v17 = vpop.f32.mrf.mxu1  ;;  %v1816_v0 = vpop.f32.mrf.mxu0 }
 0x462   : > { %v3951_v18 = vpop.f32.mrf.mxu0 }
 0x483   : > { %v1859_v19 = vpop.f32.mrf.mxu1 }
 0x484   : > { %v1911_v20 = vcombine.low %v1767_v63, %v1859_v19  ;;  %v1912_v21 = vcombine.high %v1767_v63, %v1859_v19 }
 0x485   : > { %v3956_v22 = vpop.f32.mrf.mxu1  ;;  %v1905_v23 = vpop.f32.mrf.mxu0 }
 0x486   : > { %v1927_v24 = vcombine.low %v1813_v13, %v1905_v23  ;;  %v1928_v25 = vcombine.high %v1813_v13, %v1905_v23  ;;  %v1919_v29 = vrot.slane %v1911_v20, %v4571_v34  ;;  %v1926_v32 = vrot.slane %v1912_v21, %v4571_v34  ;;  %v4754_v20 = vld [vmem:[#allocation3] sm:$0xf] }
 0x487   : > { %v1862_v26 = vpop.f32.mrf.mxu1  ;;  %v3962_v28 = vpop.f32.mrf.mxu0 }
 0x488   : > { %v1935_v33 = vrot.slane %v1927_v24, %v4571_v34  ;;  %v1942_v35 = vrot.slane %v1928_v25, %v4571_v34  ;;  %v4137_v25 = vld [vmem:[%s5130_s10 + $0x8] sm:$0xff]   ;;  %v4138_v26 = vld [vmem:[%s5130_s10] sm:$0xff]  }
 0x489   : > { %v3957_v36 = vpop.f32.mrf.mxu1  ;;  %v1908_v37 = vpop.f32.mrf.mxu0  ;;  %3973 = vmatpush3.bf16.msra.mxu0 %v4137_v25 }
 0x48a   : > { %v1943_v39 = vcombine.low %v1919_v29, %v1935_v33  ;;  %v1944_v40 = vcombine.high %v1919_v29, %v1935_v33  ;;  %v1959_v41 = vcombine.low %v1926_v32, %v1942_v35  ;;  %v1960_v42 = vcombine.high %v1926_v32, %v1942_v35  ;;  %3974 = vmatprep.subr.bf16.mxu0 %v4293_v1 }
 0x48b   : > { %v3963_v46 = vpop.f32.mrf.mxu0 }
 0x48c   : > { %v1951_v47 = vrot.slane %v1943_v39, %v4583_v44  ;;  %v1958_v48 = vrot.slane %v1944_v40, %v4583_v44  ;;  %v1967_v49 = vrot.slane %v1959_v41, %v4583_v44  ;;  %v1974_v50 = vrot.slane %v1960_v42, %v4583_v44 }
 0x48d   : > { %3975 = vmatpush3.bf16.msra.mxu0 %v4138_v26  ;;  %v2377_v40 = vshrl.u32 %v4754_v20, 16 }
 0x48e   : > { %v1979_v51 = vcombine.low %v1951_v47, %v1958_v48  ;;  %v3781_v52 = vcombine.high %v1951_v47, %v1958_v48  ;;  %v1995_v53 = vcombine.low %v1967_v49, %v1974_v50  ;;  %v3782_v54 = vcombine.high %v1967_v49, %v1974_v50  ;;  %3986 = vmatprep.subr.bf16.mxu0 %v4293_v1 }
 0x490   : > { %v1986_v56 = vrot.slane %v1979_v51, %v4571_v34  ;;  %v1994_v57 = vrot.slane %v3781_v52, %v4571_v34  ;;  %v2002_v16 = vrot.slane %v1995_v53, %v4571_v34  ;;  %v2010_v58 = vrot.slane %v3782_v54, %v4571_v34 }
 0x492   : > { %v2012_v59 = vcombine.high %v1986_v56, %v1994_v57  ;;  %v2028_v60 = vcombine.high %v2002_v16, %v2010_v58  ;;  %v2011_v61 = vcombine.low %v1986_v56, %v1994_v57  ;;  %v2027_v62 = vcombine.low %v2002_v16, %v2010_v58 }
 0x494   : > { %v2026_v38 = vrot.slane %v2012_v59, %v4583_v44  ;;  %v2042_v30 = vrot.slane %v2028_v60, %v4583_v44  ;;  %v2019_v31 = vrot.slane %v2011_v61, %v4583_v44  ;;  %v2035_v2 = vrot.slane %v2027_v62, %v4583_v44 }
 0x496   : > { %v2045_v3 = vcombine.low %v2026_v38, %v2042_v30  ;;  %v2044_v4 = vcombine.high %v2019_v31, %v2035_v2  ;;  %v2043_v5 = vcombine.low %v2019_v31, %v2035_v2  ;;  %v2046_v6 = vcombine.high %v2026_v38, %v2042_v30 }
 0x498   : > { %2052 = vrot.lane.b32.xlu1 %v2045_v3, %s5158_s0  ;;  %2048 = vrot.lane.b32.xlu0 %v2044_v4, %s5156_s28  ;;  %s5160_s28 = sshll.u32 %s4283_s25, 9 }
 0x49c   : > { %2056 = vrot.lane.b32.xlu0 %v2046_v6, %s5155_s20  ;;  %s3541_s20 = sshll.u32 %s4679_s3, 4  ;;  %s5024_s20 = int_to_ptr.vmem [resolvable:$true] %s3541_s20 }
 0x50a   : > { %v2049_v8 = vpop.permute.xlu0 %2048  ;;  %v2053_v9 = vpop.permute.xlu1 %2052 }
 0x50b   : > { %v2059_v10 = vsel %vm1489_vm3, %v2043_v5, %v2049_v8  ;;  %v3786_v5 = vld [vmem:[%s5191_s8] ss:$0 sm:$0xff] }
 0x50c   : > { %v2061_v63 = vsel %vm2060_vm5, %v2059_v10, %v2053_v9  ;;  %v3787_v10 = vld [vmem:[%s5192_s9] ss:$0 sm:$0xff] }
 0x50e   : > { %v2057_v11 = vpop.permute.xlu0 %2056 }
 0x50f   : > { %v2063_v12 = vsel %vm2062_vm6, %v2061_v63, %v2057_v11 }
 0x510   : > { %v2064_v13 = vpack.c.bf16 %v2063_v12, %v2063_v12 }
 0x512   : > { %3969 = vmatmul.mubr.msk.bf16.vlgmr.msra.gmra.mxu1 %vm862_vm1, %v2064_v13 }
 0x513   : > { %3982 = vmatprep.mubr.msk.bf16.mxu1 %vm4294_vm0, %v4293_v1 }
 0x5d2   : > { %v2116_v14 = vpop.f32.mrf.mxu1 }
 0x5d3   : > { %v2117_v15 = vadd.f32 %v2116_v14, %v4518_v7 }
 0x5d4   : > { %v3970_v17 = vpop.f32.mrf.mxu1 }
 0x5d5   : > { %v2122_v0 = vsel %vm862_vm1, %v2117_v15, 0.0 }
 0x5d6   : > { %2123 = vadd.xlane.f32.xlu1 %v2122_v0  ;;  %v2119_v18 = vpop.f32.mrf.mxu1 }
 0x5d8   : > { %v3971_v19 = vpop.f32.mrf.mxu1 }
 0x5e7   : > { %2370 = vrot.lane.b32.xlu1 %v4754_v20, %s4297_s26 }
 0x5eb   : > { %2372 = vrot.lane.b32.xlu1 %v4754_v20, %s4295_s21 }
 0x65f   : > { %v2124_v21 = vpop.xlane.xlu1 %2123 }
 0x660   : > { %v2126_v22 = vmul.f32 0.03125, %v2124_v21 }
 0x662   : > { %v2127_v23 = vsub.f32 %v2117_v15, %v2126_v22 }
 0x663   : > { %v4771_v28 = vpop.permute.xlu1 %2370 }
 0x664   : > { %v2128_v24 = vmul.f32 %v2127_v23, %v2127_v23  ;;  %v2383_v36 = vshrl.u32 %v4771_v28, 16 }
 0x666   : > { %v2129_v7 = vsel %vm862_vm1, %v2128_v24, 0.0 }
 0x667   : > { %2130 = vadd.xlane.f32.xlu0 %v2129_v7  ;;  %v4773_v29 = vpop.permute.xlu1 %2372 }
 0x668   : > { %v2384_v33 = vshrl.u32 %v4773_v29, 16  ;;  %v2382_v37 = vpack.i.b16 %v4773_v29, %v4771_v28 }
 0x66a   : > { %v2385_v42 = vpack.i.b16 %v2384_v33, %v2383_v36  ;;  %v2401_v47 = vrot.slane %v2382_v37, %v4571_v34 }
 0x66c   : > { %v2435_v50 = vrot.slane %v2385_v42, %v4571_v34 }
 0x67d   : > { %2368 = vrot.lane.b32.xlu0 %v4754_v20, %s4296_s24 }
 0x6f0   : > { %v2131_v32 = vpop.xlane.xlu0 %2130 }
 0x6f1   : > { %v2132_v35 = vmul.f32 0.03125, %v2131_v32 }
 0x6f3   : > { %v2133_v39 = vadd.f32 1e-12, %v2132_v35 }
 0x6f4   : > { %v4780_v41 = vpop.permute.xlu0 %2368 }
 0x6f5   : > { %4163 = vrsqrt.f32 %v2133_v39  ;;  %v2376_v43 = vpack.i.b16 %v4780_v41, %v4754_v20  ;;  %v2378_v46 = vshrl.u32 %v4780_v41, 16 }
 0x6f7   : > { %v2379_v48 = vpack.i.b16 %v2378_v46, %v2377_v40  ;;  %v2393_v49 = vrot.slane %v2376_v43, %v4571_v34 }
 0x6f9   : > { %v2402_v51 = vcombine.low %v2393_v49, %v2401_v47  ;;  %v2403_v52 = vcombine.high %v2393_v49, %v2401_v47  ;;  %v2427_v53 = vrot.slane %v2379_v48, %v4571_v34 }
 0x6fb   : > { %v2410_v54 = vrot.slane %v2402_v51, %v4583_v44  ;;  %v2417_v55 = vrot.slane %v2403_v52, %v4583_v44  ;;  %v2436_v56 = vcombine.low %v2427_v53, %v2435_v50  ;;  %v2437_v57 = vcombine.high %v2427_v53, %v2435_v50 }
 0x6fd   : > { %v2444_v16 = vrot.slane %v2436_v56, %v4583_v44  ;;  %v2451_v58 = vrot.slane %v2437_v57, %v4583_v44  ;;  %v2454_v59 = vcombine.low %v2410_v54, %v2417_v55  ;;  %v3793_v60 = vcombine.high %v2410_v54, %v2417_v55 }
 0x6ff   : > { %v2461_v61 = vrot.slane %v2454_v59, %v4571_v34  ;;  %v2469_v62 = vrot.slane %v3793_v60, %v4571_v34  ;;  %v2479_v38 = vcombine.low %v2444_v16, %v2451_v58  ;;  %v3794_v30 = vcombine.high %v2444_v16, %v2451_v58 }
 0x701   : > { %v2470_v31 = vcombine.low %v2461_v61, %v2469_v62  ;;  %v2486_v2 = vrot.slane %v2479_v38, %v4571_v34  ;;  %v2494_v3 = vrot.slane %v3794_v30, %v4571_v34 }
 0x702   : > { %v4164_v4 = vpop.eup %4163 }
 0x703   : > { %v2135_v6 = vmul.f32 %v4164_v4, %v2127_v23  ;;  %v2477_v8 = vrot.slane %v2470_v31, %v4583_v44  ;;  %v2495_v9 = vcombine.low %v2486_v2, %v2494_v3 }
 0x705   : > { %v2502_v11 = vrot.slane %v2495_v9, %v4583_v44  ;;  %v2142_v63 = vmul.f32 %v3786_v5, %v2135_v6  ;;  %v2507_v12 = vshrl.u32 %v2477_v8, 16  ;;  %v4806_v13 = vcombine.high %v2477_v8, %v4300_v45 }
 0x707   : > { %v2506_v14 = vpack.i.b16 %v2502_v11, %v2477_v8  ;;  %v4808_v15 = vadd.f32 %v3787_v10, %v2142_v63  ;;  %v2508_v17 = vshrl.u32 %v2502_v11, 16  ;;  %v4811_v0 = vcombine.high %v2502_v11, %v4300_v45 }
 0x708   : > { %v2513_v23 = vshrl.u32 %v4806_v13, 16 }
 0x709   : > { %v2676_v18 = vsel %vm1489_vm3, %v2506_v14, 0  ;;  %v2150_v19 = vpack.c.bf16 %v4808_v15, %v4808_v15  ;;  %v2509_v21 = vpack.i.b16 %v2508_v17, %v2507_v12  ;;  %v2512_v22 = vpack.i.b16 %v4811_v0, %v4806_v13 }
 0x70a   : > { %3981 = vmatpush3.bf16.xpose.msra.mxu1 %v2676_v18  ;;  %v2514_v24 = vshrl.u32 %v4811_v0, 16 }
 0x70b   : > { %3977 = vmatmul.mubr.msk.bf16.vlgmr.msra.gmra.mxu0 %vm862_vm1, %v2150_v19  ;;  %v2722_v7 = vsel %vm1489_vm3, %v2509_v21, 0  ;;  %3992 = vmatprep.subr.bf16.mxu1 %v4293_v1  ;;  %v2768_v14 = vsel %vm1489_vm3, %v2512_v22, 0 }
 0x70c   : > { %3987 = vmatpush3.bf16.xpose.msra.mxu0 %v2722_v7  ;;  %3988 = vmatprep.mubr.msk.bf16.mxu0 %vm4294_vm0, %v4293_v1  ;;  %v2515_v25 = vpack.i.b16 %v2514_v24, %v2513_v23  ;;  %v2669_v24 = vsub.s32 0, %v4562_v27 }
 0x70d   : > { %3998 = vmatprep.subr.bf16.mxu0 %v4293_v1 }
 0x70e   : > { %v2814_v17 = vsel %vm1489_vm3, %v2515_v25, 0 }
 0x7cb   : > { %v2204_v26 = vpop.f32.mrf.mxu0 }
 0x7cc   : > { %2221 = vrot.lane.b32.xlu1 %v2204_v26, %s4297_s26  ;;  %2218 = vrot.lane.b32.xlu0 %v2204_v26, %s4296_s24  ;;  %s5193_s26 = sld [smem:[#allocation21_spill]]  ;;  %s5196_s24 = smov 24  }
 0x7cd   : > { %v3978_v32 = vpop.f32.mrf.mxu0 }
 0x7cf   : > { %v2207_v33 = vpop.f32.mrf.mxu0 }
 0x7d0   : > { %2224 = vrot.lane.b32.xlu0 %v2204_v26, %s4295_s21  ;;  %s5195_s21 = smov 8  }
 0x7d1   : > { %v3979_v35 = vpop.f32.mrf.mxu0 }
 0x7d2   : > { %s830_s0 = scalar_lea.vmem %s5193_s26, %s4498_s4  ;;  %s4900_s4 = scalar_lea.vmem [#allocation6], %s3751_s29 }
 0x7d3   : > { %v2210_v22 = vld [vmem:[%s830_s0] sm:$0x1]  ;;  %s5022_s26 = scalar_lea.hbm %s5142_s22, %s5160_s28  ;;  %s4305_s29 = smov [#allocation4]  }
 0x7d4   : > { %v2211_v23 = vmul.f32 -1e+30, %v2210_v22  ;;  %s4189_s2 = sshll.u32 %s4305_s29, 4  ;;  %s4190_s2 = int_to_ptr.vmem [resolvable:$false] %s4189_s2 }
 0x7d5   : > { %s4191_s3 = scalar_lea.vmem %s4190_s2, 1024  ;;  %p4192_p1 = scmp.lt.s32.totalorder %s5024_s20, %s4190_s2 }
 0x7d6   : > { %v2670_v7 = vrot.slane %v2211_v23, %v2669_v24 }
 0x83e   : > { %v2222_v36 = vpop.permute.xlu1 %2221  ;;  %v2219_v37 = vpop.permute.xlu0 %2218 }
 0x83f   : > { %v2227_v39 = vcombine.low %v2204_v26, %v2222_v36  ;;  %v2228_v40 = vcombine.high %v2204_v26, %v2222_v36 }
 0x841   : > { %v2235_v47 = vrot.slane %v2227_v39, %v4571_v34  ;;  %v2242_v48 = vrot.slane %v2228_v40, %v4571_v34 }
 0x842   : > { %v2225_v42 = vpop.permute.xlu0 %2224 }
 0x843   : > { %v2243_v43 = vcombine.low %v2219_v37, %v2225_v42  ;;  %v2244_v46 = vcombine.high %v2219_v37, %v2225_v42 }
 0x845   : > { %v2251_v49 = vrot.slane %v2243_v43, %v4571_v34  ;;  %v2258_v50 = vrot.slane %v2244_v46, %v4571_v34 }
 0x847   : > { %v2259_v51 = vcombine.low %v2235_v47, %v2251_v49  ;;  %v2260_v52 = vcombine.high %v2235_v47, %v2251_v49  ;;  %v2275_v53 = vcombine.low %v2242_v48, %v2258_v50  ;;  %v2276_v54 = vcombine.high %v2242_v48, %v2258_v50 }
 0x849   : > { %v2267_v55 = vrot.slane %v2259_v51, %v4583_v44  ;;  %v2274_v56 = vrot.slane %v2260_v52, %v4583_v44  ;;  %v2283_v57 = vrot.slane %v2275_v53, %v4583_v44  ;;  %v2290_v16 = vrot.slane %v2276_v54, %v4583_v44 }
 0x84b   : > { %v2295_v58 = vcombine.low %v2267_v55, %v2274_v56  ;;  %v3791_v59 = vcombine.high %v2267_v55, %v2274_v56  ;;  %v2311_v60 = vcombine.low %v2283_v57, %v2290_v16  ;;  %v3792_v61 = vcombine.high %v2283_v57, %v2290_v16 }
 0x84d   : > { %v2302_v62 = vrot.slane %v2295_v58, %v4571_v34  ;;  %v2310_v38 = vrot.slane %v3791_v59, %v4571_v34  ;;  %v2318_v30 = vrot.slane %v2311_v60, %v4571_v34  ;;  %v2326_v31 = vrot.slane %v3792_v61, %v4571_v34 }
 0x84f   : > { %v2327_v2 = vcombine.low %v2302_v62, %v2310_v38  ;;  %v2343_v3 = vcombine.low %v2318_v30, %v2326_v31  ;;  %v2328_v4 = vcombine.high %v2302_v62, %v2310_v38  ;;  %v2344_v5 = vcombine.high %v2318_v30, %v2326_v31 }
 0x851   : > { %v2335_v6 = vrot.slane %v2327_v2, %v4583_v44  ;;  %v2351_v8 = vrot.slane %v2343_v3, %v4583_v44  ;;  %v2342_v12 = vrot.slane %v2328_v4, %v4583_v44  ;;  %v2358_v13 = vrot.slane %v2344_v5, %v4583_v44 }
 0x853   : > { %v2359_v9 = vcombine.low %v2335_v6, %v2351_v8  ;;  %v2360_v10 = vcombine.high %v2335_v6, %v2351_v8  ;;  %v2361_v0 = vcombine.low %v2342_v12, %v2358_v13  ;;  %v2362_v18 = vcombine.high %v2342_v12, %v2358_v13 }
 0x855   : > { %v2363_v11 = vpack.c.bf16 %v2359_v9, %v2359_v9  ;;  %v2364_v63 = vpack.c.bf16 %v2360_v10, %v2360_v10  ;;  %v2365_v19 = vpack.c.bf16 %v2361_v0, %v2361_v0  ;;  %v2366_v21 = vpack.c.bf16 %v2362_v18, %v2362_v18 }
 0x857   : > { %3983 = vmatmul.mubr.msk.bf16.vlgmr.msra.gmra.mxu1 %vm1489_vm3, %v2363_v11  ;;  %3989 = vmatmul.mubr.msk.bf16.vlgmr.msra.gmra.mxu0 %vm1489_vm3, %v2364_v63 }
 0x858   : > { %3993 = vmatpush3.bf16.xpose.msra.mxu1 %v2768_v14  ;;  %3999 = vmatpush3.bf16.xpose.msra.mxu0 %v2814_v17 }
 0x859   : > { %3994 = vmatprep.mubr.msk.bf16.mxu1 %vm4294_vm0, %v4293_v1  ;;  %4000 = vmatprep.mubr.msk.bf16.mxu0 %vm4294_vm0, %v4293_v1 }
 0x85a   : > { %4004 = vmatprep.subr.bf16.mxu1 %v4293_v1  ;;  %4010 = vmatprep.subr.bf16.mxu0 %v4293_v1 }
 0x85f   : > { %3995 = vmatmul.mubr.msk.bf16.vlgmr.msra.gmra.mxu1 %vm1489_vm3, %v2365_v19  ;;  %4001 = vmatmul.mubr.msk.bf16.vlgmr.msra.gmra.mxu0 %vm1489_vm3, %v2366_v21 }
 0x860   : > { %4006 = vmatprep.mubr.msk.bf16.mxu1 %vm4294_vm0, %v4293_v1  ;;  %4012 = vmatprep.mubr.msk.bf16.mxu0 %vm4294_vm0, %v4293_v1 }
 0x917   : > { %v2712_v25 = vpop.f32.mrf.mxu1  ;;  %v2758_v26 = vpop.f32.mrf.mxu0 }
 0x918   : > { %v2713_v32 = vadd.f32 %v2712_v25, %v2670_v7  ;;  %v2759_v33 = vadd.f32 %v2758_v26, %v2670_v7 }
 0x919   : > { %v3984_v35 = vpop.f32.mrf.mxu1  ;;  %v3990_v36 = vpop.f32.mrf.mxu0 }
 0x91a   : > { %v2856_v37 = vsel %vm1489_vm3, %v2713_v32, -inf  ;;  %v2859_v39 = vsel %vm1489_vm3, %v2759_v33, -inf }
 0x91b   : > { %2857 = vmax.xlane.f32.xlu1 %v2856_v37  ;;  %v2715_v40 = vpop.f32.mrf.mxu1  ;;  %2860 = vmax.xlane.f32.xlu0 %v2859_v39  ;;  %v2761_v42 = vpop.f32.mrf.mxu0 }
 0x91d   : > { %v3985_v43 = vpop.f32.mrf.mxu1  ;;  %v3991_v46 = vpop.f32.mrf.mxu0 }
 0x91f   : > { %v2804_v47 = vpop.f32.mrf.mxu1  ;;  %v2850_v48 = vpop.f32.mrf.mxu0 }
 0x920   : > { %v2805_v27 = vadd.f32 %v2804_v47, %v2670_v7  ;;  %v2851_v49 = vadd.f32 %v2850_v48, %v2670_v7 }
 0x921   : > { %v3996_v50 = vpop.f32.mrf.mxu1  ;;  %v4002_v51 = vpop.f32.mrf.mxu0 }
 0x922   : > { %v2862_v52 = vsel %vm1489_vm3, %v2805_v27, -inf  ;;  %v2865_v53 = vsel %vm1489_vm3, %v2851_v49, -inf }
 0x923   : > { %v2807_v54 = vpop.f32.mrf.mxu1  ;;  %2863 = vmax.xlane.f32.xlu0 %v2862_v52  ;;  %2866 = vmax.xlane.f32.xlu1 %v2865_v53  ;;  %v2853_v55 = vpop.f32.mrf.mxu0 }
 0x925   : > { %v3997_v56 = vpop.f32.mrf.mxu1  ;;  %v4003_v57 = vpop.f32.mrf.mxu0 }
 0x934   : > { %2518 = vrot.lane.b32.xlu1 %v4780_v41, %s4301_s1 }
 0x939   : > { %2516 = vrot.lane.b32.xlu0 %v4754_v20, %s4301_s1 }
 0x9a4   : > { %v2858_v16 = vpop.xlane.xlu1 %2857  ;;  %v2861_v58 = vpop.xlane.xlu0 %2860 }
 0x9a5   : > { %v2868_v59 = vsub.f32 %v2713_v32, %v2858_v16  ;;  %v2869_v60 = vsub.f32 %v2759_v33, %v2861_v58 }
 0x9a7   : > { %v2872_v61 = vmul.f32 1.442695, %v2868_v59  ;;  %v2874_v62 = vmul.f32 1.442695, %v2869_v60 }
 0x9a9   : > { %4165 = vpow2.f32 %v2872_v61 }
 0x9aa   : > { %4167 = vpow2.f32 %v2874_v62 }
 0x9ac   : > { %v2867_v20 = vpop.xlane.xlu1 %2866  ;;  %v2864_v41 = vpop.xlane.xlu0 %2863 }
 0x9ad   : > { %v2871_v3 = vsub.f32 %v2851_v49, %v2867_v20  ;;  %v2870_v4 = vsub.f32 %v2805_v27, %v2864_v41 }
 0x9af   : > { %v2878_v5 = vmul.f32 1.442695, %v2871_v3  ;;  %v2876_v6 = vmul.f32 1.442695, %v2870_v4 }
 0x9b0   : > { %v2519_v11 = vpop.permute.xlu1 %2518 }
 0x9b1   : > { %4169 = vpow2.f32 %v2878_v5  ;;  %v2528_v14 = vshrl.u32 %v2519_v11, 16 }
 0x9b2   : > { %4171 = vpow2.f32 %v2876_v6 }
 0x9b6   : > { %v4166_v38 = vpop.eup %4165 }
 0x9b7   : > { %v4168_v30 = vpop.eup %4167  ;;  %v2880_v31 = vsel %vm1489_vm3, %v4166_v38, 0.0 }
 0x9b8   : > { %2881 = vadd.xlane.f32.xlu0 %v2880_v31  ;;  %v2883_v2 = vsel %vm1489_vm3, %v4168_v30, 0.0 }
 0x9b9   : > { %2884 = vadd.xlane.f32.xlu1 %v2883_v2 }
 0x9be   : > { %v4880_v8 = vpop.eup %4169 }
 0x9bf   : > { %v4882_v9 = vpop.eup %4171  ;;  %v2889_v10 = vsel %vm1489_vm3, %v4880_v8, 0.0 }
 0x9ca   : > { %2520 = vrot.lane.b32.xlu1 %v4771_v28, %s4301_s1  ;;  %v2886_v28 = vsel %vm1489_vm3, %v4882_v9, 0.0 }
 0x9ce   : > { %2522 = vrot.lane.b32.xlu0 %v4773_v29, %s4301_s1  ;;  %v2517_v29 = vpop.permute.xlu0 %2516  ;;  %s4185_s1 = scalar_lea.vmem %s5024_s20, 512 }
 0x9cf   : > { %v2527_v13 = vshrl.u32 %v2517_v29, 16  ;;  %v2526_v17 = vpack.i.b16 %v2519_v11, %v2517_v29  ;;  %p4186_p12 = scmp.ne.s32.totalorder %s5024_s20, %s4185_s1  ;;  %p4193_p2 = scmp.lt.s32.totalorder %s4191_s3, %s4185_s1 }
 0x9d1   : > { %v2529_v21 = vpack.i.b16 %v2528_v14, %v2527_v13  ;;  %v2543_v24 = vrot.slane %v2526_v17, %v4571_v34  ;;  %p4187_p13 = pnand %p4186_p12, %p4468_p4  ;;  %p4194_p3 = por %p4193_p2, %p4192_p1 }
 0x9d3   : > { %v2577_v26 = vrot.slane %v2529_v21, %v4571_v34  ;;  %p4188_p0 = pneg %p4187_p13 }
 0x9d5   : > { %p4195_p5 = pnand %p4194_p3, %p4188_p0 }
 0x9ed   : > { %2890 = vadd.xlane.f32.xlu0 %v2889_v10 }
 0x9ee   : > { %2887 = vadd.xlane.f32.xlu1 %v2886_v28 }
 0xa41   : > { %v2882_v63 = vpop.xlane.xlu0 %2881 }
 0xa42   : > { %4173 = vrcp.f32 %v2882_v63  ;;  %v2885_v12 = vpop.xlane.xlu1 %2884 }
 0xa43   : > { %4175 = vrcp.f32 %v2885_v12 }
 0xa45   : > { %v2523_v0 = vpop.permute.xlu0 %2522 }
 0xa46   : > { %v2534_v18 = vshrl.u32 %v2523_v0, 16  ;;  %v2521_v19 = vpop.permute.xlu1 %2520 }
 0xa47   : > { %v2532_v22 = vpack.i.b16 %v2523_v0, %v2521_v19  ;;  %v2533_v23 = vshrl.u32 %v2521_v19, 16 }
 0xa49   : > { %v2535_v7 = vpack.i.b16 %v2534_v18, %v2533_v23  ;;  %v2551_v25 = vrot.slane %v2532_v22, %v4571_v34 }
 0xa4b   : > { %v2552_v32 = vcombine.low %v2543_v24, %v2551_v25  ;;  %v2553_v33 = vcombine.high %v2543_v24, %v2551_v25  ;;  %v2585_v35 = vrot.slane %v2535_v7, %v4571_v34 }
 0xa4d   : > { %v2560_v36 = vrot.slane %v2552_v32, %v4583_v44  ;;  %v2567_v37 = vrot.slane %v2553_v33, %v4583_v44  ;;  %v2586_v39 = vcombine.low %v2577_v26, %v2585_v35  ;;  %v2587_v40 = vcombine.high %v2577_v26, %v2585_v35 }
 0xa4f   : > { %v4174_v42 = vpop.eup %4173  ;;  %v2594_v43 = vrot.slane %v2586_v39, %v4583_v44  ;;  %v2601_v46 = vrot.slane %v2587_v40, %v4583_v44  ;;  %v2604_v47 = vcombine.low %v2560_v36, %v2567_v37  ;;  %v3795_v48 = vcombine.high %v2560_v36, %v2567_v37 }
 0xa50   : > { %v4176_v27 = vpop.eup %4175  ;;  %v2896_v49 = vmul.f32 %v4174_v42, %v4166_v38 }
 0xa51   : > { %v2611_v50 = vrot.slane %v2604_v47, %v4571_v34  ;;  %v2619_v51 = vrot.slane %v3795_v48, %v4571_v34  ;;  %v2629_v52 = vcombine.low %v2594_v43, %v2601_v46  ;;  %v3796_v53 = vcombine.high %v2594_v43, %v2601_v46 }
 0xa52   : > { %2900 = vst.msk [vmem:[%s4900_s4] sm:$0xff] %vm1489_vm3, %v2896_v49  ;;  %v2897_v54 = vmul.f32 %v4176_v27, %v4168_v30  ;;  %v2904_v5 = vpack.c.bf16 %v2896_v49, %v2896_v49 }
 0xa53   : > { %v2636_v55 = vrot.slane %v2629_v52, %v4571_v34  ;;  %v2644_v56 = vrot.slane %v3796_v53, %v4571_v34  ;;  %v2620_v57 = vcombine.low %v2611_v50, %v2619_v51  ;;  %v4139_v52 = vld [vmem:[%s5132_s12 + $0x8] sm:$0xff]  }
 0xa54   : > { %2901 = vst.msk [vmem:[%s4900_s4 + $0x8] sm:$0xff] %vm1489_vm3, %v2897_v54  ;;  %v2905_v28 = vpack.c.bf16 %v2897_v54, %v2897_v54 }
 0xa55   : > { %v2627_v16 = vrot.slane %v2620_v57, %v4583_v44  ;;  %v2645_v58 = vcombine.low %v2636_v55, %v2644_v56 }
 0xa57   : > { %v2652_v59 = vrot.slane %v2645_v58, %v4583_v44  ;;  %v2628_v60 = vcombine.high %v2627_v16, %v4300_v45  ;;  %v2657_v62 = vshrl.u32 %v2627_v16, 16 }
 0xa59   : > { %v2656_v61 = vpack.i.b16 %v2652_v59, %v2627_v16  ;;  %v2658_v38 = vshrl.u32 %v2652_v59, 16  ;;  %v2653_v31 = vcombine.high %v2652_v59, %v4300_v45  ;;  %v2663_v30 = vshrl.u32 %v2628_v60, 16 }
 0xa5b   : > { %v2912_v2 = vsel %vm1729_vm4, %v2656_v61, 0  ;;  %v2659_v20 = vpack.i.b16 %v2658_v38, %v2657_v62  ;;  %v2662_v41 = vpack.i.b16 %v2653_v31, %v2628_v60  ;;  %v2664_v3 = vshrl.u32 %v2653_v31, 16  ;;  %v4140_v61 = vld [vmem:[%s5132_s12] sm:$0xff]  }
 0xa5c   : > { %4005 = vmatpush3.bf16.msra.mxu1 %v2912_v2 }
 0xa5d   : > { %v2958_v4 = vsel %vm1729_vm4, %v2659_v20, 0  ;;  %4016 = vmatprep.subr.bf16.mxu1 %v4293_v1  ;;  %v2665_v6 = vpack.i.b16 %v2664_v3, %v2663_v30  ;;  %v3004_v10 = vsel %vm1729_vm4, %v2662_v41, 0 }
 0xa5e   : > { %4011 = vmatpush3.bf16.msra.mxu0 %v2958_v4 }
 0xa5f   : > { %4007 = vmatmul.mubr.msk.bf16.vlgmr.msra.gmra.mxu1 %vm1489_vm3, %v2904_v5  ;;  %4022 = vmatprep.subr.bf16.mxu0 %v4293_v1  ;;  %v3050_v45 = vsel %vm1729_vm4, %v2665_v6, 0 }
 0xa60   : > { %4017 = vmatpush3.bf16.msra.mxu1 %v3004_v10  ;;  %4018 = vmatprep.mubr.msk.bf16.mxu1 %vm4294_vm0, %v4293_v1 }
 0xa61   : > { %4013 = vmatmul.mubr.msk.bf16.vlgmr.msra.gmra.mxu0 %vm1489_vm3, %v2905_v28  ;;  %4028 = vmatprep.subr.bf16.mxu1 %v4293_v1 }
 0xa62   : > { %4023 = vmatpush3.bf16.msra.mxu0 %v3050_v45  ;;  %4024 = vmatprep.mubr.msk.bf16.mxu0 %vm4294_vm0, %v4293_v1 }
 0xa63   : > { %4036 = vmatprep.subr.bf16.mxu0 %v4293_v1 }
 0xa76   : > { %v2891_v29 = vpop.xlane.xlu0 %2890 }
 0xa77   : > { %4177 = vrcp.f32 %v2891_v29  ;;  %v2888_v11 = vpop.xlane.xlu1 %2887 }
 0xa78   : > { %4179 = vrcp.f32 %v2888_v11 }
 0xa84   : > { %v4178_v63 = vpop.eup %4177 }
 0xa85   : > { %v4180_v12 = vpop.eup %4179  ;;  %v2899_v13 = vmul.f32 %v4178_v63, %v4880_v8 }
 0xa86   : > { %v2898_v14 = vmul.f32 %v4180_v12, %v4882_v9 }
 0xa87   : > { %2903 = vst.msk [vmem:[%s4900_s4 + $0x18] sm:$0xff] %vm1489_vm3, %v2899_v13  ;;  %v2907_v17 = vpack.c.bf16 %v2899_v13, %v2899_v13 }
 0xa88   : > { %2902 = vst.msk [vmem:[%s4900_s4 + $0x10] sm:$0xff] %vm1489_vm3, %v2898_v14  ;;  %v2906_v0 = vpack.c.bf16 %v2898_v14, %v2898_v14 }
 0xa89   : > { %4025 = vmatmul.mubr.msk.bf16.vlgmr.msra.gmra.mxu0 %vm1489_vm3, %v2907_v17 }
 0xa8a   : > { %4019 = vmatmul.mubr.msk.bf16.vlgmr.msra.gmra.mxu1 %vm1489_vm3, %v2906_v0  ;;  %4040 = vmatprep.mubr.msk.bf16.mxu0 %vm4294_vm0, %v4293_v1 }
 0xa8b   : > { %4032 = vmatprep.mubr.msk.bf16.mxu1 %vm4294_vm0, %v4293_v1  ;;  %4029 = vmatpush3.bf16.msra.mxu1 %v4139_v52 }
 0xa8c   : > { %4030 = vmatprep.subr.bf16.mxu1 %v4293_v1 }
 0xa8f   : > { %4031 = vmatpush3.bf16.msra.mxu1 %v4140_v61 }
 0xa90   : > { %4044 = vmatprep.subr.bf16.mxu1 %v4293_v1 }
 0xb1f   : > { %v2948_v18 = vpop.f32.mrf.mxu1 }
 0xb21   : > { %v4008_v8 = vpop.f32.mrf.mxu1  ;;  %v2994_v19 = vpop.f32.mrf.mxu0 }
 0xb23   : > { %v2951_v9 = vpop.f32.mrf.mxu1  ;;  %v4014_v21 = vpop.f32.mrf.mxu0 }
 0xb25   : > { %v4009_v22 = vpop.f32.mrf.mxu1  ;;  %v2997_v23 = vpop.f32.mrf.mxu0 }
 0xb27   : > { %v4015_v24 = vpop.f32.mrf.mxu0 }
 0xb49   : > { %v3086_v7 = vpop.f32.mrf.mxu0 }
 0xb4a   : > { %v3040_v25 = vpop.f32.mrf.mxu1  ;;  %v3108_v26 = vcombine.low %v2994_v19, %v3086_v7  ;;  %v3109_v32 = vcombine.high %v2994_v19, %v3086_v7 }
 0xb4b   : > { %v3092_v33 = vcombine.low %v2948_v18, %v3040_v25  ;;  %v3093_v35 = vcombine.high %v2948_v18, %v3040_v25  ;;  %v4026_v36 = vpop.f32.mrf.mxu0 }
 0xb4c   : > { %v3116_v37 = vrot.slane %v3108_v26, %v4571_v34  ;;  %v3123_v39 = vrot.slane %v3109_v32, %v4571_v34  ;;  %v4020_v40 = vpop.f32.mrf.mxu1  ;;  %v4141_v26 = vld [vmem:[%s5135_s15 + $0x8] sm:$0xff]   ;;  %v4143_v32 = vld [vmem:[%s5137_s17 + $0x18] sm:$0xff]  }
 0xb4d   : > { %v3100_v42 = vrot.slane %v3092_v33, %v4571_v34  ;;  %v3107_v43 = vrot.slane %v3093_v35, %v4571_v34  ;;  %v3089_v46 = vpop.f32.mrf.mxu0  ;;  %4037 = vmatpush3.bf16.msra.mxu0 %v4141_v26  ;;  %v4144_v33 = vld [vmem:[%s5137_s17 + $0x10] sm:$0xff]   ;;  %v3810_v40 = vld [vmem:[%s5133_s13] ss:$0 sm:$0xff] }
 0xb4e   : > { %v3043_v47 = vpop.f32.mrf.mxu1  ;;  %4038 = vmatprep.subr.bf16.mxu0 %v4293_v1 }
 0xb4f   : > { %v3124_v48 = vcombine.low %v3100_v42, %v3116_v37  ;;  %v3125_v27 = vcombine.high %v3100_v42, %v3116_v37  ;;  %v3140_v49 = vcombine.low %v3107_v43, %v3123_v39  ;;  %v3141_v50 = vcombine.high %v3107_v43, %v3123_v39  ;;  %v4027_v51 = vpop.f32.mrf.mxu0  ;;  %v3811_v43 = vld [vmem:[%s5134_s14] ss:$0 sm:$0xff] }
 0xb50   : > { %v4021_v53 = vpop.f32.mrf.mxu1 }
 0xb51   : > { %v3132_v54 = vrot.slane %v3124_v48, %v4583_v44  ;;  %v3139_v55 = vrot.slane %v3125_v27, %v4583_v44  ;;  %v3148_v56 = vrot.slane %v3140_v49, %v4583_v44  ;;  %v3155_v57 = vrot.slane %v3141_v50, %v4583_v44  ;;  %v4145_v27 = vld [vmem:[%s5137_s17 + $0x8] sm:$0xff]   ;;  %v4146_v49 = vld [vmem:[%s5137_s17] sm:$0xff]  }
 0xb52   : > { %v3812_v50 = vld [vmem:[%s5136_s16] ss:$0 sm:$0xff] }
 0xb53   : > { %v3160_v16 = vcombine.low %v3132_v54, %v3139_v55  ;;  %v3805_v58 = vcombine.high %v3132_v54, %v3139_v55  ;;  %v3176_v59 = vcombine.low %v3148_v56, %v3155_v57  ;;  %v3806_v60 = vcombine.high %v3148_v56, %v3155_v57 }
 0xb55   : > { %v3167_v62 = vrot.slane %v3160_v16, %v4571_v34  ;;  %v3175_v38 = vrot.slane %v3805_v58, %v4571_v34  ;;  %v3183_v31 = vrot.slane %v3176_v59, %v4571_v34  ;;  %v3191_v30 = vrot.slane %v3806_v60, %v4571_v34 }
 0xb57   : > { %v3193_v2 = vcombine.high %v3167_v62, %v3175_v38  ;;  %v3209_v20 = vcombine.high %v3183_v31, %v3191_v30  ;;  %v3192_v41 = vcombine.low %v3167_v62, %v3175_v38  ;;  %v3208_v3 = vcombine.low %v3183_v31, %v3191_v30 }
 0xb59   : > { %v3207_v4 = vrot.slane %v3193_v2, %v4583_v44  ;;  %v3223_v5 = vrot.slane %v3209_v20, %v4583_v44  ;;  %v3200_v6 = vrot.slane %v3192_v41, %v4583_v44  ;;  %v3216_v10 = vrot.slane %v3208_v3, %v4583_v44 }
 0xb5b   : > { %v3226_v28 = vcombine.low %v3207_v4, %v3223_v5  ;;  %v3225_v45 = vcombine.high %v3200_v6, %v3216_v10  ;;  %v3224_v29 = vcombine.low %v3200_v6, %v3216_v10  ;;  %v3227_v34 = vcombine.high %v3207_v4, %v3223_v5 }
 0xb5d   : > { %3233 = vrot.lane.b32.xlu1 %v3226_v28, %s5194_s5  ;;  %3229 = vrot.lane.b32.xlu0 %v3225_v45, %s5195_s21 }
 0xb61   : > { %3237 = vrot.lane.b32.xlu1 %v3227_v34, %s5196_s24 }
 0xbcf   : > { %v3234_v11 = vpop.permute.xlu1 %3233  ;;  %v3230_v63 = vpop.permute.xlu0 %3229 }
 0xbd0   : > { %v3240_v12 = vsel %vm1489_vm3, %v3224_v29, %v3230_v63 }
 0xbd1   : > { %v3241_v14 = vsel %vm2060_vm5, %v3240_v12, %v3234_v11 }
 0xbd3   : > { %v3238_v13 = vpop.permute.xlu1 %3237 }
 0xbd4   : > { %v3242_v17 = vsel %vm2062_vm6, %v3241_v14, %v3238_v13 }
 0xbd5   : > { %v3243_v44 = vpack.c.bf16 %v3242_v17, %v3242_v17 }
 0xbd7   : > { %4033 = vmatmul.mubr.msk.bf16.vlgmr.msra.gmra.mxu1 %vm862_vm1, %v3243_v44 }
 0xbd8   : > { %4052 = vmatprep.mubr.msk.bf16.mxu1 %vm4294_vm0, %v4293_v1  ;;  %4045 = vmatpush3.bf16.msra.mxu1 %v4143_v32 }
 0xbd9   : > { %4046 = vmatprep.subr.bf16.mxu1 %v4293_v1 }
 0xbdc   : > { %4047 = vmatpush3.bf16.msra.mxu1 %v4144_v33 }
 0xbdd   : > { %4048 = vmatprep.subr.bf16.mxu1 %v4293_v1 }
 0xbe0   : > { %4049 = vmatpush3.bf16.msra.mxu1 %v4145_v27 }
 0xbe1   : > { %4050 = vmatprep.subr.bf16.mxu1 %v4293_v1  ;;  %v3816_v1 = vld [vmem:[%s5138_s18] ss:$0 sm:$0xff] }
 0xbe4   : > { %4051 = vmatpush3.bf16.msra.mxu1 %v4146_v49 }
 0xc97   : > { %v3295_v0 = vpop.f32.mrf.mxu1 }
 0xc98   : > { %v3296_v18 = vadd.f32 %v3295_v0, %v4808_v15  ;;  %v4142_v15 = vld [vmem:[%s5135_s15] sm:$0xff]  }
 0xc99   : > { %v4034_v8 = vpop.f32.mrf.mxu1  ;;  %4039 = vmatpush3.bf16.msra.mxu0 %v4142_v15 }
 0xc9a   : > { %v3301_v19 = vsel %vm862_vm1, %v3296_v18, 0.0 }
 0xc9b   : > { %3302 = vadd.xlane.f32.xlu0 %v3301_v19  ;;  %v3298_v9 = vpop.f32.mrf.mxu1 }
 0xc9d   : > { %v4035_v21 = vpop.f32.mrf.mxu1 }
 0xd24   : > { %v3303_v22 = vpop.xlane.xlu0 %3302 }
 0xd25   : > { %v3304_v23 = vmul.f32 0.03125, %v3303_v22 }
 0xd27   : > { %v3305_v24 = vsub.f32 %v3296_v18, %v3304_v23 }
 0xd29   : > { %v3306_v7 = vmul.f32 %v3305_v24, %v3305_v24 }
 0xd2b   : > { %v3307_v25 = vsel %vm862_vm1, %v3306_v7, 0.0 }
 0xd2c   : > { %3308 = vadd.xlane.f32.xlu1 %v3307_v25 }
 0xdb5   : > { %v3309_v35 = vpop.xlane.xlu1 %3308 }
 0xdb6   : > { %v3310_v36 = vmul.f32 0.03125, %v3309_v35 }
 0xdb8   : > { %v3311_v37 = vadd.f32 1e-12, %v3310_v36 }
 0xdba   : > { %4181 = vrsqrt.f32 %v3311_v37 }
 0xdc7   : > { %v4182_v39 = vpop.eup %4181 }
 0xdc8   : > { %v3313_v42 = vmul.f32 %v4182_v39, %v3305_v24 }
 0xdca   : > { %v3320_v46 = vmul.f32 %v3810_v40, %v3313_v42 }
 0xdcc   : > { %v3327_v47 = vadd.f32 %v3811_v43, %v3320_v46 }
 0xdce   : > { %v3328_v48 = vpack.c.bf16 %v3327_v47, %v3327_v47 }
 0xdd0   : > { %4041 = vmatmul.mubr.msk.bf16.vlgmr.msra.gmra.mxu0 %vm862_vm1, %v3328_v48 }
 0xe90   : > { %v3389_v51 = vpop.f32.mrf.mxu0 }
 0xe91   : > { %v3390_v52 = vadd.f32 %v3812_v50, %v3389_v51 }
 0xe92   : > { %v4042_v53 = vpop.f32.mrf.mxu0 }
 0xe93   : > { %v3395_v54 = vmax.f32 %v3390_v52, 0.0 }
 0xe94   : > { %v3392_v55 = vpop.f32.mrf.mxu0 }
 0xe95   : > { %v3396_v56 = vpack.c.bf16 %v3395_v54, %v3395_v54 }
 0xe96   : > { %v4043_v57 = vpop.f32.mrf.mxu0 }
 0xe97   : > { %4053 = vmatmul.mubr.msk.bf16.vlgmr.msra.gmra.mxu1 %vm3436_vm7, %v3396_v56 }
 0xf57   : > { %v3474_v16 = vpop.f32.mrf.mxu1 }
 0xf58   : > { %v3475_v58 = vadd.f32 %v3816_v1, %v3474_v16 }
 0xf59   : > { %v4054_v59 = vpop.f32.mrf.mxu1 }
 0xf5a   : > { %v3482_v60 = vadd.f32 %v3475_v58, %v3327_v47 }
 0xf5b   : > { %v3477_v61 = vpop.f32.mrf.mxu1 }
 0xf5c   : > { %v3483_v62 = vsel %vm862_vm1, %v3482_v60, 0.0 }
 0xf5d   : > { %3484 = vadd.xlane.f32.xlu0 %v3483_v62  ;;  %v4055_v38 = vpop.f32.mrf.mxu1 }
 0xfe6   : > { %v3485_v31 = vpop.xlane.xlu0 %3484 }
 0xfe7   : > { %v3486_v30 = vmul.f32 0.03125, %v3485_v31 }
 0xfe9   : > { %v5010_v2 = vsub.f32 %v3482_v60, %v3486_v30 }
 0xfeb   : > { %v3488_v20 = vmul.f32 %v5010_v2, %v5010_v2 }
 0xfed   : > { %v3489_v41 = vsel %vm862_vm1, %v3488_v20, 0.0 }
 0xfee   : > { %3490 = vadd.xlane.f32.xlu0 %v3489_v41 }
 0xfef   : > { %4198 = shalt.err (!%p4195_p5)
}
 0xff0   : > { %s4199_s5 = scalar_lea.hbm %s5022_s26, 512  ;;  %s4203_s29 = scalar_lea.hbm %s5142_s22, 1024 }
 0xff1   : > { %p4200_p6 = scmp.ne.s32.totalorder %s5022_s26, %s4199_s5  ;;  %p4204_p10 = scmp.lt.s32.totalorder %s5022_s26, %s5142_s22 }
 0xff2   : > { %p4205_p11 = scmp.lt.s32.totalorder %s4203_s29, %s4199_s5 }
 0xff3   : > { %p4201_p7 = pnand %p4200_p6, %p4468_p4 }
 0xff4   : > { %p4206_p12 = por %p4205_p11, %p4204_p10 }
 0xff5   : > { %p4202_p9 = pneg %p4201_p7 }
 0xff7   : > { %p4207_p13 = pnand %p4206_p12, %p4202_p9 }
 0xff9   : > { %4210 = shalt.err (!%p4207_p13)
}
 0xffa   : > { %s4306_s2 = smov 128   ;;  %s5197_s1 = scalar_lea.sflag [#allocation5], %s4666_s6 }
 0xffb   : > { %4056 = dma.vmem_to_hbm [thread:$0]  (%p4468_p4), %s5024_s20, 512, %s5022_s26, %s5197_s1, %s4306_s2, %s4306_s2, %s5195_s21  }
 0xffc   : > { %s5198_s8 = sshll.u32 %s4283_s25, 9  ;;  %s3558_s5 = sshll.u32 %s4900_s4, 4  ;;  %s5060_s5 = int_to_ptr.vmem [resolvable:$true] %s3558_s5 }
 0xffd   : > { %s5057_s3 = scalar_lea.hbm %s5143_s23, %s5198_s8  ;;  %s3524_s24 = scalar_lea.sflag [#allocation7], %s4666_s6 }
 0xffe   : > { %s4211_s29 = scalar_lea.vmem %s5060_s5, 512  ;;  %s4307_s9 = smov [#allocation6]  }
 0xfff   : > { %p4212_p0 = scmp.ne.s32.totalorder %s5060_s5, %s4211_s29  ;;  %s4215_s20 = sshll.u32 %s4307_s9, 4  ;;  %s4216_s20 = int_to_ptr.vmem [resolvable:$false] %s4215_s20 }
0x1000   : > { %s4217_s25 = scalar_lea.vmem %s4216_s20, 1024  ;;  %p4218_p3 = scmp.lt.s32.totalorder %s5060_s5, %s4216_s20 }
0x1001   : > { %p4213_p1 = pnand %p4212_p0, %p4468_p4  ;;  %p4219_p5 = scmp.lt.s32.totalorder %s4217_s25, %s4211_s29 }
0x1003   : > { %p4214_p2 = pneg %p4213_p1  ;;  %p4220_p6 = por %p4219_p5, %p4218_p3 }
0x1005   : > { %p4221_p7 = pnand %p4220_p6, %p4214_p2 }
0x1007   : > { %4224 = shalt.err (!%p4221_p7)
}
0x1008   : > { %s4225_s4 = scalar_lea.hbm %s5057_s3, 512  ;;  %s4229_s9 = scalar_lea.hbm %s5143_s23, 1024 }
0x1009   : > { %p4226_p9 = scmp.ne.s32.totalorder %s5057_s3, %s4225_s4  ;;  %p4230_p12 = scmp.lt.s32.totalorder %s5057_s3, %s5143_s23 }
0x100a   : > { %p4231_p13 = scmp.lt.s32.totalorder %s4229_s9, %s4225_s4 }
0x100b   : > { %p4227_p10 = pnand %p4226_p9, %p4468_p4 }
0x100c   : > { %p4232_p0 = por %p4231_p13, %p4230_p12 }
0x100d   : > { %p4228_p11 = pneg %p4227_p10 }
0x100f   : > { %p4233_p1 = pnand %p4232_p0, %p4228_p11 }
0x1011   : > { %4236 = shalt.err (!%p4233_p1)
}
0x1012   : > { %4057 = dma.vmem_to_hbm [thread:$0]  (%p4468_p4), %s5060_s5, 512, %s5057_s3, %s3524_s24, %s4306_s2, %s4306_s2, %s5195_s21  }
0x1013   : > { %s5199_s29 = sld [smem:[#allocation27_spill]] }
0x1014   : > { %s5200_s25 = sld [smem:[#allocation28_spill]] }
0x1015   : > { %s5201_s26 = sld [smem:[#allocation29_spill]] }
0x1019   : > { %v3822_v10 = vld [vmem:[%s5199_s29] ss:$0 sm:$0xff] }
0x101a   : > { %v3823_v45 = vld [vmem:[%s5200_s25] ss:$0 sm:$0xff] }
0x101b   : > { %s837_s21 = scalar_lea.vmem %s5201_s26, %s4501_s27 }
0x1077   : > { %v3491_v3 = vpop.xlane.xlu0 %3490 }
0x1078   : > { %v3492_v4 = vmul.f32 0.03125, %v3491_v3 }
0x107a   : > { %v3493_v5 = vadd.f32 1e-12, %v3492_v4 }
0x107c   : > { %4183 = vrsqrt.f32 %v3493_v5 }
0x1089   : > { %v4184_v6 = vpop.eup %4183 }
0x108a   : > { %v3495_v28 = vmul.f32 %v4184_v6, %v5010_v2 }
0x108c   : > { %v3502_v29 = vmul.f32 %v3822_v10, %v3495_v28 }
0x108e   : > { %v3509_v34 = vadd.f32 %v3823_v45, %v3502_v29 }
0x1090   : > { %3510 = vst.msk [vmem:[%s837_s21] sm:$0xff] %vm862_vm1, %v3509_v34 }
0x1091 PF: > { %s5202_s2 = sld [smem:[#allocation13_spill]] }
0x1092   : > { %s5203_s3 = sld [smem:[#allocation10_spill]] }
0x1097   : > { %p4067_p4 = scmp.ge.s32.totalorder %s5202_s2, 2 }
0x1098   : > { %s3583_s24 = sand.u32 1, %s5203_s3  }
0x1099   : > { %p4061_p2 = pnand %p4067_p4, %p4475_p8  ;;  %s3584_s9 = scalar_lea.sflag [#allocation5], %s3583_s24 }
0x109b   : > { %p4062_p3 = pneg %p4061_p2 }
0x109d   : > { %4262 = dma.done.wait (%p4062_p3), %s3584_s9, 512  }
0x109e   : > { %4264 = vsyncadd (%p4062_p3), %s3584_s9, 4294966784  ;;  %s3593_s1 = scalar_lea.sflag [#allocation7], %s3583_s24 }
0x109f   : > { %4266 = dma.done.wait (%p4062_p3), %s3593_s1, 512  }
0x10a0   : > { %4268 = vsyncadd (%p4062_p3), %s3593_s1, 4294966784  ;;  %s40_s1 = sadd.s32 1, %s5202_s2   ;;  %s5205_s27 = sld [smem:[#allocation11_spill]] }
0x10a1   : > { %p37_p5 = scmp.ge.s32.totalorder %s40_s1, 4   ;;  %s5206_s24 = sld [smem:[#allocation16_spill]] }
0x10a2   : > { %s5207_s25 = sld [smem:[#allocation12_spill]]  ;;  %s5209_s4 = smov %s4275_s30 }
0x10a3   : > { %s5208_s5 = sld [smem:[#allocation14_spill]]  ;;  %39 = sbr.rel (!%p37_p5) target bundleno = 20 (0x14), region = 184 }
0x10a6   : > { %s5210_s30 = smov %s5205_s27 }
0x10a8   :  { %3598 = vsyncpa [#allocation5], 1 }
0x10a9   :  { %3600 = vsyncpa [#allocation5 + $0x1], 1 }
0x10aa   :  { %3601 = vsyncpa [#allocation7], 1 }
0x10ab   :  { %3603 = vsyncpa [#allocation7 + $0x1], 1 }

</bundles_post_ra>
